<compile_context>
chip_gen: v5e
topology: v5e:2x2
jax: 0.10.0
libtpu: 0.0.40
codegen_flags: <defaults>
</compile_context>

<pallas_src>
import functools

import numpy as np

import jax
import jax.numpy as jnp
from jax.experimental import pallas as pl
from jax.experimental.pallas import tpu as pltpu


FIELDS = ("peptide", "A1", "A2", "A3", "B1", "B2", "B3")
LANES = 128
TILE_ROWS = 256            # packed rows per grid step (= TILE_ROWS*PACK tokens)


def _round_up(x, m):
    return ((x + m - 1) // m) * m


def _pack_factor(emb_size):
    """How many tokens share one 128-lane output row."""
    if emb_size <= LANES and LANES % emb_size == 0:
        return LANES // emb_size
    return 1


def _packed_gather_kernel(idx_ref, table_ref, out_ref):
    """One grid step: gather PACK tokens per output row via a one-hot matmul.

    idx_ref:   (TILE_ROWS, PACK) int32 — column indices into the packed table
               (already include field*vocab_size and copy*V_pad offsets;
                padding slots hold a large negative value -> match no column).
    table_ref: (K, 128) f32 — packed mega-table; constant index_map keeps it
               VMEM-resident across all grid steps (DMA'd once).
    out_ref:   (TILE_ROWS, 128) f32 — lane-dense output slab, PACK tokens/row.
    """
    idx = idx_ref[...]
    table = table_ref[...]
    t_rows = idx.shape[0]
    pack = idx.shape[1]
    k = table.shape[0]

    cols = jax.lax.broadcasted_iota(jnp.int32, (t_rows, k), 1)
    hit = cols == idx[:, 0:1]
    for c in range(1, pack):                        # static, tiny (PACK <= 4)
        hit = jnp.logical_or(hit, cols == idx[:, c:c + 1])
    onehot = hit.astype(table.dtype)                # (TILE_ROWS, K)

    # Each packed row has exactly PACK nonzeros, each in a disjoint copy of
    # the table, so the single matmul writes PACK embeddings per 128-lane row.
    out_ref[...] = jnp.dot(
        onehot, table, preferred_element_type=jnp.float32
    ).astype(out_ref.dtype)


def _fused_lookup(idx2d, packed_table):
    rows, pack = idx2d.shape
    k, e_out = packed_table.shape
    grid = (rows // TILE_ROWS,)

    cost = pl.CostEstimate(
        flops=2 * rows * k * e_out,
        transcendentals=0,
        bytes_accessed=idx2d.size * 4 + packed_table.size * 4 + rows * e_out * 4,
    )

    return pl.pallas_call(
        _packed_gather_kernel,
        out_shape=jax.ShapeDtypeStruct((rows, e_out), packed_table.dtype),
        grid=grid,
        in_specs=[
            pl.BlockSpec((TILE_ROWS, pack), lambda i: (i, 0)),
            pl.BlockSpec((k, e_out), lambda i: (0, 0)),     # resident table
        ],
        out_specs=pl.BlockSpec((TILE_ROWS, e_out), lambda i: (i, 0)),
        compiler_params=pltpu.CompilerParams(
            dimension_semantics=("parallel",),               # v7x megacore
        ),
        cost_estimate=cost,
    )(idx2d, packed_table)


@functools.partial(jax.jit, static_argnames=("emb_size", "vocab_size"))
def _cdr_emb_forward(packed_table, batch, *, emb_size, vocab_size):
    pack = _pack_factor(emb_size)
    k, e_out = packed_table.shape
    v_pad = k // pack

    # ---- 1) index plumbing (constants folded at trace time) ---------------
    shapes = [batch[name].shape for name in FIELDS]
    field_off = np.concatenate(
        [np.full(int(np.prod(s)), f * vocab_size, np.int32)
         for f, s in enumerate(shapes)])
    flat = jnp.concatenate(
        [batch[name].astype(jnp.int32).ravel() for name in FIELDS]
    ) + jnp.asarray(field_off)

    n_tok = flat.shape[0]
    tok_pad = _round_up(n_tok, pack * TILE_ROWS)
    flat = jnp.pad(flat, (0, tok_pad - n_tok), constant_values=-(2 ** 30))
    rows = tok_pad // pack
    # Copy offset routes token (row p, slot c) into copy c's slice of K.
    copy_off = np.arange(pack, dtype=np.int32) * v_pad
    idx2d = flat.reshape(rows, pack) + jnp.asarray(copy_off)

    # ---- 2) fused, tiled one-hot-matmul gather -----------------------------
    out = _fused_lookup(idx2d, packed_table)        # (rows, e_out) lane-dense

    # ---- 3) unpack: free reshapes / slices outside the kernel -------------
    if pack > 1:
        tok = out.reshape(rows * pack, emb_size)    # token 4p+c <- row p, slot c
    else:
        tok = out[:, :emb_size]

    result, off = {}, 0
    for s, name in zip(shapes, FIELDS):
        n = int(np.prod(s))
        result[name] = tok[off:off + n].reshape(*s, emb_size)
        off += n
    return result


class CDREmbNetPallas:
    """JAX/Pallas equivalent of deeptcr's CDREmbNet (fused 7-table lookup)."""

    FIELDS = FIELDS

    def __init__(self, emb_size, vocab_size=33, key=None):
        self.emb_size = emb_size
        self.vocab_size = vocab_size
        if key is None:
            key = jax.random.PRNGKey(0)
        keys = jax.random.split(key, len(FIELDS))
        # nn.init.uniform_(w, -1, 1) for every table.
        self.tables = {
            name: jax.random.uniform(
                k, (vocab_size, emb_size), jnp.float32, -1.0, 1.0)
            for name, k in zip(FIELDS, keys)
        }

        # Build the packed mega-table ONCE:
        #   row  c*V_pad + f*vocab + v,  lanes [c*emb : (c+1)*emb]  = table_f[v]
        # (pack copies of the 7 stacked tables, each lane-shifted by c*emb).
        pack = _pack_factor(emb_size)
        n_rows = len(FIELDS) * vocab_size
        v_pad = _round_up(n_rows, LANES)                      # 231 -> 256
        e_out = LANES if pack > 1 else _round_up(emb_size, LANES)
        packed = np.zeros((pack * v_pad, e_out), np.float32)  # (1024, 128)
        for c in range(pack):
            for f, name in enumerate(FIELDS):
                r0 = c * v_pad + f * vocab_size
                packed[r0:r0 + vocab_size,
                       c * emb_size:(c + 1) * emb_size] = np.asarray(
                           self.tables[name])
        self.packed_table = jnp.asarray(packed)

    def __call__(self, batch):
        return _cdr_emb_forward(
            self.packed_table, batch,
            emb_size=self.emb_size, vocab_size=self.vocab_size,
        )


if __name__ == "__main__":
    emb_size = 32
    vocab_size = 33
    batch_size = 2

    # Small, deterministic per-field sequence lengths (CDR loops / peptide).
    seq_lens = {
        "peptide": 9,
        "A1": 7,
        "A2": 8,
        "A3": 12,
        "B1": 7,
        "B2": 8,
        "B3": 12,
    }

    root = jax.random.PRNGKey(0)
    param_key, data_key = jax.random.split(root)

    model = CDREmbNetPallas(emb_size, vocab_size=vocab_size, key=param_key)

    batch = {}
    data_keys = jax.random.split(data_key, len(seq_lens))
    for (name, L), k in zip(seq_lens.items(), data_keys):
        batch[name] = jax.random.randint(
            k, (batch_size, L), minval=0, maxval=vocab_size, dtype=jnp.int32
        )

    emb_dict = model(batch)
    jax.block_until_ready(emb_dict)

    # Sanity-check against plain-JAX reference (table[idx]) for every field.
    for name in model.FIELDS:
        ref = model.tables[name][batch[name]]
        got = emb_dict[name]
        assert got.shape == (batch_size, seq_lens[name], emb_size), got.shape
        assert jnp.allclose(got, ref, atol=1e-6), f"mismatch in {name}"

    print("KERNEL_OK")
</pallas_src>

<mosaic_0001>
module attributes {stable_mosaic.version = 11 : i64} {
  func.func @_packed_gather_kernel(%arg0: i32, %arg1: memref<256x4xi32, #tpu.memory_space<vmem>>, %arg2: memref<1024x128xf32, #tpu.memory_space<vmem>>, %arg3: memref<256x128xf32, #tpu.memory_space<vmem>>) attributes {dimension_semantics = [#tpu.dimension_semantics<parallel>], iteration_bounds = array<i64: 1>, scalar_prefetch = 0 : i64, scratch_operands = 0 : i64, tpu.core_type = #tpu.core_type<tc>, window_params = [{transform_indices = @transform_0, window_bounds = array<i64: 256, 4>}, {pipeline_mode = #tpu.pipeline_mode<synchronous>, transform_indices = @transform_1, window_bounds = array<i64: 1024, 128>}, {transform_indices = @transform_2, window_bounds = array<i64: 256, 128>}]} {
    %c0 = arith.constant 0 : index
    %c0_0 = arith.constant 0 : index
    %0 = vector.load %arg1[%c0, %c0_0] : memref<256x4xi32, #tpu.memory_space<vmem>>, vector<256x4xi32>
    %c0_1 = arith.constant 0 : index
    %c0_2 = arith.constant 0 : index
    %1 = vector.load %arg2[%c0_1, %c0_2] : memref<1024x128xf32, #tpu.memory_space<vmem>>, vector<1024x128xf32>
    %2 = tpu.iota {dimensions = array<i32: 1>} : vector<256x1024xi32>
    %3 = vector.extract_strided_slice %0 {offsets = [0, 0], sizes = [256, 1], strides = [1, 1]} : vector<256x4xi32> to vector<256x1xi32>
    %4 = vector.broadcast %3 : vector<256x1xi32> to vector<256x1024xi32>
    %5 = arith.cmpi eq, %2, %4 : vector<256x1024xi32>
    %6 = vector.extract_strided_slice %0 {offsets = [0, 1], sizes = [256, 1], strides = [1, 1]} : vector<256x4xi32> to vector<256x1xi32>
    %7 = vector.broadcast %6 : vector<256x1xi32> to vector<256x1024xi32>
    %8 = arith.cmpi eq, %2, %7 : vector<256x1024xi32>
    %9 = arith.ori %5, %8 : vector<256x1024xi1>
    %10 = vector.extract_strided_slice %0 {offsets = [0, 2], sizes = [256, 1], strides = [1, 1]} : vector<256x4xi32> to vector<256x1xi32>
    %11 = vector.broadcast %10 : vector<256x1xi32> to vector<256x1024xi32>
    %12 = arith.cmpi eq, %2, %11 : vector<256x1024xi32>
    %13 = arith.ori %9, %12 : vector<256x1024xi1>
    %14 = vector.extract_strided_slice %0 {offsets = [0, 3], sizes = [256, 1], strides = [1, 1]} : vector<256x4xi32> to vector<256x1xi32>
    %15 = vector.broadcast %14 : vector<256x1xi32> to vector<256x1024xi32>
    %16 = arith.cmpi eq, %2, %15 : vector<256x1024xi32>
    %17 = arith.ori %13, %16 : vector<256x1024xi1>
    %18 = arith.extui %17 : vector<256x1024xi1> to vector<256x1024xi32>
    %19 = arith.sitofp %18 : vector<256x1024xi32> to vector<256x1024xf32>
    %cst = arith.constant dense<0.000000e+00> : vector<256x128xf32>
    %20 = tpu.matmul %19, %1, %cst {dimension_numbers = #tpu.dot_dimension_numbers<[1], [0], [0], [1], [0, 0, 1, 1], [], []>} : vector<256x1024xf32>, vector<1024x128xf32>, vector<256x128xf32> -> vector<256x128xf32>
    %c0_3 = arith.constant 0 : index
    %c0_4 = arith.constant 0 : index
    %21 = vector.load %arg3[%c0_3, %c0_4] : memref<256x128xf32, #tpu.memory_space<vmem>>, vector<256x128xf32>
    tpu.vector_store %arg3[%c0_3, %c0_4], %20 {strides = array<i32>} : memref<256x128xf32, #tpu.memory_space<vmem>>, vector<256x128xf32>,
    return
  }
  func.func @transform_0(%arg0: i32) -> (i32, i32) {
    %c0_i32 = arith.constant 0 : i32
    %c0_i32_0 = arith.constant 0 : i32
    return %arg0, %c0_i32 : i32, i32
  }
  func.func @transform_1(%arg0: i32) -> (i32, i32) {
    %c0_i32 = arith.constant 0 : i32
    %c0_i32_0 = arith.constant 0 : i32
    %c0_i32_1 = arith.constant 0 : i32
    return %c0_i32, %c0_i32_0 : i32, i32
  }
  func.func @transform_2(%arg0: i32) -> (i32, i32) {
    %c0_i32 = arith.constant 0 : i32
    %c0_i32_0 = arith.constant 0 : i32
    return %arg0, %c0_i32 : i32, i32
  }
}

</mosaic_0001>

<bundles_post_ra>
// kernel: _cdr_emb_forward.1
= control target key start
LH: loop header
LB: loop body
LE: loop exit
PB: predicated region body
PF: predicated region fallthrough
CT: control target
= control target key end

     0   :  { %7 = vsyncpa [#allocation3], 0  ;;  %s4463_s12 = smov [#allocation2]   ;;  %s4464_s14 = smov 128   ;;  %s8363_s0 = inlined_call_operand.vmem [shape: s32[256,4], index: 0, kind: input, shape index: {}]   ;;  %s8364_s1 = inlined_call_operand.hbm [shape: f32[1024,128], index: 1, kind: input, shape index: {}]   ;;  %s8365_s2 = inlined_call_operand.vmem [shape: f32[256,128], index: 2, kind: output, shape index: {}]  }
   0x1   :  { %s14_s11 = sshll.u32 %s8364_s1, 4  ;;  %s16_s13 = sshll.u32 %s4463_s12, 4  ;;  %s15_s11 = int_to_ptr.hbm [resolvable:$true] %s14_s11  ;;  %s17_s13 = int_to_ptr.vmem [resolvable:$true] %s16_s13 }
   0x2   :  { %s4465_s15 = smov 8  }
   0x3   :  { %22 = dma.hbm_to_vmem [thread:$0]  %s15_s11, 16384, %s17_s13, [#allocation3], %s4464_s14, %s4464_s14, %s4465_s15  }
   0x4   :  { %4461 = dma.done.wait [#allocation3], 16384  }
   0x5   :  { %4462 = vsyncadd [#allocation3], 4294950912  ;;  %v8366_v0 = vmov 0   ;;  %v31_v1 = vld [vmem:[%s8363_s0 + $0x20] sm:$0xff]  ;;  %v29_v2 = vld [vmem:[%s8363_s0 + $0x10] sm:$0xff]  ;;  %v8370_v9 = vmov 1  }
   0x6   :  { %4347 = vset.pattern.permute.xlu2 %v8366_v0  ;;  %4346 = vset.pattern.permute.xlu1 %v8366_v0  ;;  %v27_v3 = vld [vmem:[%s8363_s0] sm:$0xff]  ;;  %v32_v4 = vld [vmem:[%s8363_s0 + $0x28] sm:$0xff]  ;;  %v30_v5 = vld [vmem:[%s8363_s0 + $0x18] sm:$0xff]  ;;  %v8368_v14 = vmov 2   ;;  %v8372_v15 = vmov 3  }
   0x7   :  { %4345 = vset.pattern.permute.xlu0 %v8366_v0  ;;  %209 = vperm.xlu2 %4347, %v31_v1   ;;  %v28_v6 = vld [vmem:[%s8363_s0 + $0x8] sm:$0xff]  ;;  %v4513_v7 = vld [vmem:[%s8363_s0 + $0x40] sm:$0xff]  ;;  %v4518_v8 = vld [vmem:[%s8363_s0 + $0x38] sm:$0xff] }
   0x8   :  { %203 = vperm.xlu1 %4346, %v29_v2   ;;  %197 = vperm.xlu0 %4345, %v27_v3   ;;  %v4526_v10 = vld [vmem:[%s8363_s0 + $0x58] sm:$0xff]  ;;  %v4531_v11 = vld [vmem:[%s8363_s0 + $0x50] sm:$0xff]  ;;  %v4543_v13 = vld [vmem:[%s8363_s0 + $0x68] sm:$0xff] }
   0x9   :  { %v4538_v12 = vld [vmem:[%s8363_s0 + $0x70] sm:$0xff]  ;;  %v4564_v17 = vld [vmem:[%s8363_s0 + $0x48] sm:$0xff]  ;;  %v4574_v19 = vld [vmem:[%s8363_s0 + $0x60] sm:$0xff] }
   0xa   :  { %v33_v16 = vld [vmem:[%s8363_s0 + $0x30] sm:$0xff]  ;;  %v74_v20 = vld [vmem:[#allocation2 + $0x78] sm:$0xff]  ;;  %v72_v30 = vld [vmem:[#allocation2 + $0x68] sm:$0xff] }
   0xb   :  { %v90_v21 = vld [vmem:[#allocation2 + $0xf8] sm:$0xff]  ;;  %2884 = vmatpush.msra.mxu0 %v74_v20  ;;  %v73_v24 = vld [vmem:[#allocation2 + $0x70] sm:$0xff]  ;;  %v88_v31 = vld [vmem:[#allocation2 + $0xe8] sm:$0xff] }
   0xc   :  { %v106_v22 = vld [vmem:[#allocation2 + $0x178] sm:$0xff]  ;;  %2997 = vmatpush.msra.mxu1 %v90_v21  ;;  %v89_v25 = vld [vmem:[#allocation2 + $0xf0] sm:$0xff]  ;;  %v104_v32 = vld [vmem:[#allocation2 + $0x168] sm:$0xff] }
   0xd   :  { %v122_v23 = vld [vmem:[#allocation2 + $0x1f8] sm:$0xff]  ;;  %3110 = vmatpush.msra.mxu2 %v106_v22  ;;  %v105_v26 = vld [vmem:[#allocation2 + $0x170] sm:$0xff]  ;;  %2885 = vmatpush.msra.mxu0 %v73_v24  ;;  %v120_v33 = vld [vmem:[#allocation2 + $0x1e8] sm:$0xff] }
   0xe   :  { %3223 = vmatpush.msra.mxu3 %v122_v23  ;;  %v121_v27 = vld [vmem:[#allocation2 + $0x1f0] sm:$0xff]  ;;  %v4582_v29 = vld [vmem:[%s8363_s0 + $0x78] sm:$0xff]  ;;  %2998 = vmatpush.msra.mxu1 %v89_v25  ;;  %v71_v34 = vld [vmem:[#allocation2 + $0x60] sm:$0xff] }
   0xf   :  { %212 = vperm.xlu2 %4347, %v32_v4   ;;  %3111 = vmatpush.msra.mxu2 %v105_v26  ;;  %v87_v35 = vld [vmem:[#allocation2 + $0xe0] sm:$0xff]  ;;  %v70_v38 = vld [vmem:[#allocation2 + $0x58] sm:$0xff]  ;;  %v69_v42 = vld [vmem:[#allocation2 + $0x50] sm:$0xff] }
  0x10   :  { %206 = vperm.xlu1 %4346, %v30_v5   ;;  %200 = vperm.xlu0 %4345, %v28_v6   ;;  %v103_v36 = vld [vmem:[#allocation2 + $0x160] sm:$0xff]  ;;  %v86_v39 = vld [vmem:[#allocation2 + $0xd8] sm:$0xff]  ;;  %v85_v44 = vld [vmem:[#allocation2 + $0xd0] sm:$0xff] }
  0x11   :  { %3224 = vmatpush.msra.mxu3 %v121_v27  ;;  %2886 = vmatpush.msra.mxu0 %v72_v30  ;;  %v119_v37 = vld [vmem:[#allocation2 + $0x1e0] sm:$0xff]  ;;  %v102_v40 = vld [vmem:[#allocation2 + $0x158] sm:$0xff]  ;;  %v101_v45 = vld [vmem:[#allocation2 + $0x150] sm:$0xff] }
  0x12   :  { %2999 = vmatpush.msra.mxu1 %v88_v31  ;;  %3112 = vmatpush.msra.mxu2 %v104_v32  ;;  %v118_v41 = vld [vmem:[#allocation2 + $0x1d8] sm:$0xff]  ;;  %v117_v46 = vld [vmem:[#allocation2 + $0x1d0] sm:$0xff]  ;;  %v68_v47 = vld [vmem:[#allocation2 + $0x48] sm:$0xff] }
  0x13   :  { %3225 = vmatpush.msra.mxu3 %v120_v33  ;;  %2887 = vmatpush.msra.mxu0 %v71_v34  ;;  %v84_v48 = vld [vmem:[#allocation2 + $0xc8] sm:$0xff]  ;;  %v67_v51 = vld [vmem:[#allocation2 + $0x40] sm:$0xff]  ;;  %v66_v55 = vld [vmem:[#allocation2 + $0x38] sm:$0xff] }
  0x14   :  { %3000 = vmatpush.msra.mxu1 %v87_v35  ;;  %3113 = vmatpush.msra.mxu2 %v103_v36  ;;  %v100_v49 = vld [vmem:[#allocation2 + $0x148] sm:$0xff]  ;;  %v83_v52 = vld [vmem:[#allocation2 + $0xc0] sm:$0xff]  ;;  %v82_v58 = vld [vmem:[#allocation2 + $0xb8] sm:$0xff] }
  0x15   :  { %3226 = vmatpush.msra.mxu3 %v119_v37  ;;  %2888 = vmatpush.msra.mxu0 %v70_v38  ;;  %v116_v50 = vld [vmem:[#allocation2 + $0x1c8] sm:$0xff]  ;;  %v99_v53 = vld [vmem:[#allocation2 + $0x140] sm:$0xff]  ;;  %v98_v61 = vld [vmem:[#allocation2 + $0x138] sm:$0xff] }
  0x16   :  { %3001 = vmatpush.msra.mxu1 %v86_v39  ;;  %3114 = vmatpush.msra.mxu2 %v102_v40  ;;  %v115_v54 = vld [vmem:[#allocation2 + $0x1c0] sm:$0xff]  ;;  %v114_v62 = vld [vmem:[#allocation2 + $0x1b8] sm:$0xff]  ;;  %v65_v63 = vld [vmem:[#allocation2 + $0x30] sm:$0xff] }
  0x17   :  { %221 = vperm.xlu2 %4347, %v4513_v7   ;;  %3227 = vmatpush.msra.mxu3 %v118_v41  ;;  %v4602_v60 = vld [vmem:[%s8363_s0 + $0x80] sm:$0xff]  ;;  %v48_v25 = vld [vmem:[%s8363_s0 + $0xa8] sm:$0xff]  ;;  %v62_v27 = vld [vmem:[#allocation2 + $0x18] sm:$0xff] }
  0x18   :  { %218 = vperm.xlu1 %4346, %v4518_v8   ;;  %4348 = vset.pattern.permute.xlu0 %v8370_v9  ;;  %v63_v21 = vld [vmem:[#allocation2 + $0x20] sm:$0xff]  ;;  %v78_v30 = vld [vmem:[#allocation2 + $0x98] sm:$0xff]  ;;  %v61_v33 = vld [vmem:[#allocation2 + $0x10] sm:$0xff] }
  0x19   :  { %549 = vperm.xlu0 %4348, %v27_v3   ;;  %2889 = vmatpush.msra.mxu0 %v69_v42  ;;  %v79_v22 = vld [vmem:[#allocation2 + $0xa0] sm:$0xff]  ;;  %v94_v31 = vld [vmem:[#allocation2 + $0x118] sm:$0xff]  ;;  %v77_v34 = vld [vmem:[#allocation2 + $0x90] sm:$0xff] }
  0x1a   :  { %3002 = vmatpush.msra.mxu1 %v85_v44  ;;  %3115 = vmatpush.msra.mxu2 %v101_v45  ;;  %v95_v24 = vld [vmem:[#allocation2 + $0x120] sm:$0xff]  ;;  %v110_v32 = vld [vmem:[#allocation2 + $0x198] sm:$0xff]  ;;  %v93_v35 = vld [vmem:[#allocation2 + $0x110] sm:$0xff] }
  0x1b   :  { %3228 = vmatpush.msra.mxu3 %v117_v46  ;;  %2890 = vmatpush.msra.mxu0 %v68_v47  ;;  %v111_v26 = vld [vmem:[#allocation2 + $0x1a0] sm:$0xff]  ;;  %v109_v36 = vld [vmem:[#allocation2 + $0x190] sm:$0xff]  ;;  %v60_v37 = vld [vmem:[#allocation2 + $0x8] sm:$0xff] }
  0x1c   :  { %3003 = vmatpush.msra.mxu1 %v84_v48  ;;  %3116 = vmatpush.msra.mxu2 %v100_v49  ;;  %v76_v39 = vld [vmem:[#allocation2 + $0x88] sm:$0xff]  ;;  %v59_v44 = vld [vmem:[#allocation2] sm:$0xff] }
  0x1d   :  { %3229 = vmatpush.msra.mxu3 %v116_v50  ;;  %2891 = vmatpush.msra.mxu0 %v67_v51  ;;  %v92_v40 = vld [vmem:[#allocation2 + $0x108] sm:$0xff]  ;;  %v75_v45 = vld [vmem:[#allocation2 + $0x80] sm:$0xff]  ;;  %v187_v51 = vlaneseq }
  0x1e   :  { %3004 = vmatpush.msra.mxu1 %v83_v52  ;;  %3117 = vmatpush.msra.mxu2 %v99_v53  ;;  %v91_v46 = vld [vmem:[#allocation2 + $0x100] sm:$0xff] }
  0x1f   :  { %230 = vperm.xlu2 %4347, %v4526_v10   ;;  %3230 = vmatpush.msra.mxu3 %v115_v54  ;;  %v107_v47 = vld [vmem:[#allocation2 + $0x180] sm:$0xff] }
  0x20   :  { %227 = vperm.xlu1 %4346, %v4531_v11   ;;  %2892 = vmatpush.msra.mxu0 %v66_v55 }
  0x21   :  { %564 = vperm.xlu0 %4348, %v32_v4   ;;  %3005 = vmatpush.msra.mxu1 %v82_v58 }
  0x22   :  { %3118 = vmatpush.msra.mxu2 %v98_v61  ;;  %3231 = vmatpush.msra.mxu3 %v114_v62  ;;  %v5101_v61 = vld [vmem:[%s8363_s0 + $0xb8] sm:$0xff] }
  0x23   :  { %2893 = vmatpush.msra.mxu0 %v65_v63 }
  0x27   :  { %239 = vperm.xlu2 %4347, %v4538_v12  }
  0x28   :  { %236 = vperm.xlu1 %4346, %v4543_v13  }
  0x29   :  { %4357 = vset.pattern.permute.xlu0 %v8368_v14 }
  0x2a   :  { %1166 = vperm.xlu0 %4357, %v30_v5  }
  0x2f   :  { %4350 = vset.pattern.permute.xlu2 %v8372_v15 }
  0x30   :  { %4349 = vset.pattern.permute.xlu1 %v8368_v14  ;;  %1765 = vperm.xlu2 %4350, %v27_v3  }
  0x31   :  { %1157 = vperm.xlu1 %4349, %v27_v3   ;;  %v113_v3 = vld [vmem:[#allocation2 + $0x1b0] sm:$0xff] }
  0x32   :  { %1181 = vperm.xlu0 %4357, %v4513_v7   ;;  %3232 = vmatpush.msra.mxu3 %v113_v3  ;;  %v8390_v3 = vmov 1.0  }
  0x38   :  { %4352 = vset.pattern.permute.xlu2 %v8368_v14 }
  0x39   :  { %4351 = vset.pattern.permute.xlu1 %v8370_v9  ;;  %1160 = vperm.xlu2 %4352, %v28_v6  }
  0x3a   :  { %552 = vperm.xlu1 %4351, %v28_v6   ;;  %4362 = vset.pattern.permute.xlu0 %v8372_v15 }
  0x3b   :  { %1768 = vperm.xlu0 %4362, %v28_v6   ;;  %v96_v6 = vld [vmem:[#allocation2 + $0x128] sm:$0xff] }
  0x41   :  { %1163 = vperm.xlu2 %4352, %v29_v2  }
  0x42   :  { %555 = vperm.xlu1 %4351, %v29_v2  }
  0x43   :  { %1783 = vperm.xlu0 %4362, %v33_v16  }
  0x49   :  { %4354 = vset.pattern.permute.xlu2 %v8370_v9 }
  0x4a   :  { %4353 = vset.pattern.permute.xlu1 %v8372_v15  ;;  %558 = vperm.xlu2 %4354, %v30_v5  }
  0x4b   :  { %1771 = vperm.xlu1 %4353, %v29_v2   ;;  %1798 = vperm.xlu0 %4362, %v4526_v10   ;;  %v97_v2 = vld [vmem:[#allocation2 + $0x130] sm:$0xff] }
  0x4c   :  { %3119 = vmatpush.msra.mxu2 %v97_v2 }
  0x4e   :  { %3120 = vmatpush.msra.mxu2 %v96_v6 }
  0x50   :  { %3121 = vmatpush.msra.mxu2 %v95_v24 }
  0x52   :  { %561 = vperm.xlu2 %4354, %v31_v1   ;;  %3122 = vmatpush.msra.mxu2 %v94_v31  ;;  %v5160_v31 = vld [vmem:[%s8363_s0 + $0xa0] sm:$0xff] }
  0x53   :  { %1774 = vperm.xlu1 %4353, %v30_v5   ;;  %4367 = vset.pattern.permute.xlu0 %v8366_v0  ;;  %v80_v5 = vld [vmem:[#allocation2 + $0xa8] sm:$0xff] }
  0x54   :  { %215 = vperm.xlu0 %4367, %v33_v16   ;;  %3123 = vmatpush.msra.mxu2 %v93_v35 }
  0x56   :  { %3124 = vmatpush.msra.mxu2 %v92_v40 }
  0x58   :  { %3125 = vmatpush.msra.mxu2 %v91_v46 }
  0x5a   :  { %4356 = vset.pattern.permute.xlu2 %v8372_v15 }
  0x5b   :  { %4355 = vset.pattern.permute.xlu1 %v8368_v14  ;;  %1777 = vperm.xlu2 %4356, %v31_v1  }
  0x5c   :  { %1169 = vperm.xlu1 %4355, %v31_v1   ;;  %224 = vperm.xlu0 %4367, %v4564_v17   ;;  %v81_v1 = vld [vmem:[#allocation2 + $0xb0] sm:$0xff] }
  0x5d   :  { %3006 = vmatpush.msra.mxu1 %v81_v1 }
  0x5f   :  { %3007 = vmatpush.msra.mxu1 %v80_v5 }
  0x61   :  { %v4569_v18 = vpop.permute.xlu2 %209  ;;  %3008 = vmatpush.msra.mxu1 %v79_v22 }
  0x63   :  { %1780 = vperm.xlu2 %4356, %v32_v4   ;;  %3009 = vmatpush.msra.mxu1 %v78_v30  ;;  %v4890_v30 = vld [vmem:[%s8363_s0 + $0x88] sm:$0xff] }
  0x64   :  { %1172 = vperm.xlu1 %4355, %v32_v4   ;;  %233 = vperm.xlu0 %4367, %v4574_v19   ;;  %v64_v4 = vld [vmem:[#allocation2 + $0x28] sm:$0xff] }
  0x65   :  { %2894 = vmatpush.msra.mxu0 %v64_v4  ;;  %3010 = vmatpush.msra.mxu1 %v77_v34  ;;  %v4948_v34 = vld [vmem:[%s8363_s0 + $0xb0] sm:$0xff] }
  0x67   :  { %2895 = vmatpush.msra.mxu0 %v63_v21  ;;  %3011 = vmatpush.msra.mxu1 %v76_v39 }
  0x69   :  { %v4577_v28 = vpop.permute.xlu2 %212  ;;  %2896 = vmatpush.msra.mxu0 %v62_v27  ;;  %3012 = vmatpush.msra.mxu1 %v75_v45 }
  0x6b   :  { %4359 = vset.pattern.permute.xlu2 %v8368_v14  ;;  %2897 = vmatpush.msra.mxu0 %v61_v33 }
  0x6c   :  { %4358 = vset.pattern.permute.xlu1 %v8370_v9  ;;  %242 = vperm.xlu0 %4367, %v4582_v29  }
  0x6d   :  { %1175 = vperm.xlu2 %4359, %v33_v16   ;;  %567 = vperm.xlu1 %4358, %v33_v16   ;;  %v112_v16 = vld [vmem:[#allocation2 + $0x1a8] sm:$0xff] }
  0x6e   :  { %3233 = vmatpush.msra.mxu3 %v112_v16  ;;  %2898 = vmatpush.msra.mxu0 %v60_v37 }
  0x70   :  { %3234 = vmatpush.msra.mxu3 %v111_v26  ;;  %2899 = vmatpush.msra.mxu0 %v59_v44 }
  0x71   :  { %v4587_v43 = vpop.permute.xlu2 %221 }
  0x72   :  { %8554 = vst [vmem:[#allocation5_spill] sm:$0xff] %v4587_v43  ;;  %3235 = vmatpush.msra.mxu3 %v110_v32 }
  0x74   :  { %4372 = vset.pattern.permute.xlu0 %v8370_v9  ;;  %3236 = vmatpush.msra.mxu3 %v109_v36 }
  0x75   :  { %1178 = vperm.xlu2 %4359, %v4518_v8   ;;  %570 = vperm.xlu1 %4358, %v4518_v8  }
  0x76   :  { %579 = vperm.xlu0 %4372, %v4531_v11  }
  0x79   :  { %v4593_v56 = vpop.permute.xlu2 %230 }
  0x7a   :  { %8555 = vst [vmem:[#allocation6_spill] sm:$0xff] %v4593_v56  ;;  %v4595_v57 = vpop.permute.xlu1 %203  ;;  %v4597_v59 = vpop.permute.xlu0 %197 }
  0x7d   :  { %4361 = vset.pattern.permute.xlu2 %v8370_v9  ;;  %4360 = vset.pattern.permute.xlu1 %v8372_v15 }
  0x7e   :  { %573 = vperm.xlu2 %4361, %v4513_v7   ;;  %1786 = vperm.xlu1 %4360, %v4518_v8  }
  0x7f   :  { %597 = vperm.xlu0 %4372, %v4602_v60  }
  0x81   :  { %v4611_v23 = vpop.permute.xlu2 %239 }
  0x82   :  { %v4609_v20 = vpop.permute.xlu1 %206  ;;  %8556 = vst [vmem:[#allocation7_spill] sm:$0xff] %v4611_v23  ;;  %v4613_v8 = vpop.permute.xlu0 %200 }
  0x86   :  { %576 = vperm.xlu2 %4361, %v4564_v17   ;;  %1789 = vperm.xlu1 %4360, %v4513_v7   ;;  %v108_v7 = vld [vmem:[#allocation2 + $0x188] sm:$0xff] }
  0x87   :  { %612 = vperm.xlu0 %4372, %v48_v25   ;;  %3237 = vmatpush.msra.mxu3 %v108_v7 }
  0x89   :  { %3238 = vmatpush.msra.mxu3 %v107_v47 }
  0x8a   :  { %v4620_v38 = vpop.permute.xlu1 %218  ;;  %v4622_v41 = vpop.permute.xlu2 %1765 }
  0x8b   :  { %v4624_v42 = vpop.permute.xlu0 %549 }
  0x8e   :  { %4364 = vset.pattern.permute.xlu2 %v8372_v15  ;;  %4363 = vset.pattern.permute.xlu1 %v8368_v14 }
  0x8f   :  { %1792 = vperm.xlu2 %4364, %v4564_v17   ;;  %1184 = vperm.xlu1 %4363, %v4564_v17   ;;  %v4640_v17 = vand.u32 127, %v187_v51 }
  0x90   :  { %4393 = vset.pattern.permute.xlu0 %v8368_v14 }
  0x91   :  { %1196 = vperm.xlu0 %4393, %v4543_v13   ;;  %v4649_v55 = vadd.s32 128, %v4640_v17  ;;  %vm292_vm0 = vcmp.eq.s32.totalorder %v4640_v17, %v4597_v59  ;;  %vm644_vm1 = vcmp.eq.s32.totalorder %v4640_v17, %v4624_v42  ;;  %v4656_v58 = vadd.s32 256, %v4640_v17 }
  0x92   :  { %v4632_v48 = vpop.permute.xlu1 %227  ;;  %vm900_vm6 = vmor %vm292_vm0, %vm644_vm1  ;;  %vm1860_vm10 = vcmp.eq.s32.totalorder %v4640_v17, %v4622_v41 }
  0x93   :  { %8557 = vst [vmem:[#allocation8_spill] sm:$0xff] %v4632_v48  ;;  %v4634_v49 = vpop.permute.xlu2 %1160  ;;  %v4636_v50 = vpop.permute.xlu0 %564  ;;  %vm293_vm2 = vcmp.eq.s32.totalorder %v4649_v55, %v4597_v59  ;;  %vm645_vm3 = vcmp.eq.s32.totalorder %v4649_v55, %v4624_v42  ;;  %vm294_vm4 = vcmp.eq.s32.totalorder %v4656_v58, %v4597_v59  ;;  %vm646_vm5 = vcmp.eq.s32.totalorder %v4656_v58, %v4624_v42 }
  0x94   :  { %vm4677_vm9 = vmor %vm293_vm2, %vm645_vm3  ;;  %vm1861_vm0 = vcmp.eq.s32.totalorder %v4649_v55, %v4622_v41 }
  0x95   :  { %vm4685_vm11 = vmor %vm294_vm4, %vm646_vm5  ;;  %vm1862_vm4 = vcmp.eq.s32.totalorder %v4656_v58, %v4622_v41 }
  0x97   :  { %1795 = vperm.xlu2 %4364, %v4531_v11   ;;  %1187 = vperm.xlu1 %4363, %v4531_v11   ;;  %v4664_v11 = vadd.s32 384, %v4640_v17 }
  0x99   :  { %vm295_vm7 = vcmp.eq.s32.totalorder %v4664_v11, %v4597_v59  ;;  %vm647_vm8 = vcmp.eq.s32.totalorder %v4664_v11, %v4624_v42  ;;  %1208 = vperm.xlu0 %4393, %v4890_v30  }
  0x9a   :  { %v4642_v52 = vpop.permute.xlu1 %236  ;;  %vm4693_vm14 = vmor %vm295_vm7, %vm647_vm8  ;;  %vm1863_vm8 = vcmp.eq.s32.totalorder %v4664_v11, %v4622_v41 }
  0x9b   :  { %8558 = vst [vmem:[#allocation9_spill] sm:$0xff] %v4642_v52  ;;  %v4644_v53 = vpop.permute.xlu2 %1163 }
  0x9c   :  { %v4646_v54 = vpop.permute.xlu0 %1166 }
  0x9f   :  { %4366 = vset.pattern.permute.xlu2 %v8368_v14  ;;  %4365 = vset.pattern.permute.xlu1 %v8370_v9 }
  0xa0   :  { %1190 = vperm.xlu2 %4366, %v4526_v10   ;;  %582 = vperm.xlu1 %4365, %v4526_v10  }
  0xa1   :  { %1223 = vperm.xlu0 %4393, %v4948_v34  }
  0xa3   :  { %v4681_v62 = vpop.permute.xlu1 %1157 }
  0xa4   :  { %vm1252_vm12 = vcmp.eq.s32.totalorder %v4640_v17, %v4681_v62  ;;  %vm1253_vm13 = vcmp.eq.s32.totalorder %v4649_v55, %v4681_v62  ;;  %v4697_v1 = vpop.permute.xlu2 %558  ;;  %v4699_v2 = vpop.permute.xlu0 %1181  ;;  %vm1254_vm2 = vcmp.eq.s32.totalorder %v4656_v58, %v4681_v62 }
  0xa5   :  { %vm1508_vm15 = vmor %vm900_vm6, %vm1252_vm12  ;;  %vm1255_vm6 = vcmp.eq.s32.totalorder %v4664_v11, %v4681_v62  ;;  %vm300_vm12 = vcmp.eq.s32.totalorder %v4640_v17, %v4613_v8 }
  0xa6   :  { %vm2116_vm1 = vmor %vm1508_vm15, %vm1860_vm10 }
  0xa7   :  { %4081 = vmatmul.msk.f32.vlgmr.msra.gmra.mxu0 %vm2116_vm1, %v8390_v3  ;;  %vm1509_vm3 = vmor %vm4677_vm9, %vm1253_vm13 }
  0xa8   :  { %vm2117_vm5 = vmor %vm1509_vm3, %vm1861_vm0  ;;  %1193 = vperm.xlu2 %4366, %v4574_v19   ;;  %585 = vperm.xlu1 %4365, %v4574_v19  }
  0xa9   :  { %4113 = vmatmul.msk.f32.vlgmr.msra.gmra.mxu1 %vm2117_vm5, %v8390_v3  ;;  %vm1510_vm7 = vmor %vm4685_vm11, %vm1254_vm2  ;;  %vm1260_vm11 = vcmp.eq.s32.totalorder %v4640_v17, %v4634_v49  ;;  %4398 = vset.pattern.permute.xlu0 %v8372_v15 }
  0xaa   :  { %vm2118_vm9 = vmor %vm1510_vm7, %vm1862_vm4  ;;  %vm1261_vm4 = vcmp.eq.s32.totalorder %v4649_v55, %v4634_v49 }
  0xab   :  { %4145 = vmatmul.msk.f32.vlgmr.msra.gmra.mxu2 %vm2118_vm9, %v8390_v3  ;;  %vm1511_vm10 = vmor %vm4693_vm14, %vm1255_vm6  ;;  %vm301_vm14 = vcmp.eq.s32.totalorder %v4649_v55, %v4613_v8 }
  0xac   :  { %vm2119_vm13 = vmor %vm1511_vm10, %vm1863_vm8  ;;  %v4724_v4 = vpop.permute.xlu1 %552  ;;  %v4731_v5 = vpop.permute.xlu2 %561  ;;  %vm302_vm8 = vcmp.eq.s32.totalorder %v4656_v58, %v4613_v8 }
  0xad   :  { %4177 = vmatmul.msk.f32.vlgmr.msra.gmra.mxu3 %vm2119_vm13, %v8390_v3  ;;  %vm652_vm15 = vcmp.eq.s32.totalorder %v4640_v17, %v4724_v4  ;;  %v4733_v6 = vpop.permute.xlu0 %1768  ;;  %vm653_vm1 = vcmp.eq.s32.totalorder %v4649_v55, %v4724_v4  ;;  %vm654_vm9 = vcmp.eq.s32.totalorder %v4656_v58, %v4724_v4 }
  0xae   :  { %vm908_vm0 = vmor %vm300_vm12, %vm652_vm15  ;;  %vm1868_vm3 = vcmp.eq.s32.totalorder %v4640_v17, %v4733_v6  ;;  %vm1869_vm6 = vcmp.eq.s32.totalorder %v4649_v55, %v4733_v6  ;;  %vm1262_vm12 = vcmp.eq.s32.totalorder %v4656_v58, %v4634_v49 }
  0xaf   :  { %vm1516_vm2 = vmor %vm908_vm0, %vm1260_vm11  ;;  %vm1870_vm11 = vcmp.eq.s32.totalorder %v4656_v58, %v4733_v6  ;;  %vm303_vm0 = vcmp.eq.s32.totalorder %v4664_v11, %v4613_v8 }
  0xb0   :  { %4369 = vset.pattern.permute.xlu2 %v8370_v9  ;;  %vm2124_vm5 = vmor %vm1516_vm2, %vm1868_vm3  ;;  %4368 = vset.pattern.permute.xlu1 %v8372_v15  ;;  %vm1263_vm2 = vcmp.eq.s32.totalorder %v4664_v11, %v4634_v49 }
  0xb1   :  { %588 = vperm.xlu2 %4369, %v4543_v13   ;;  %vm909_vm7 = vmor %vm301_vm14, %vm653_vm1  ;;  %1801 = vperm.xlu1 %4368, %v4574_v19   ;;  %vm655_vm14 = vcmp.eq.s32.totalorder %v4664_v11, %v4724_v4 }
  0xb2   :  { %4082 = vmatmul.msk.f32.gmra.mxu0 %vm2124_vm5, %v8390_v3  ;;  %vm1517_vm10 = vmor %vm909_vm7, %vm1261_vm4  ;;  %vm1871_vm4 = vcmp.eq.s32.totalorder %v4664_v11, %v4733_v6 }
  0xb3   :  { %vm2125_vm13 = vmor %vm1517_vm10, %vm1869_vm6  ;;  %vm308_vm10 = vcmp.eq.s32.totalorder %v4640_v17, %v4595_v57 }
  0xb4   :  { %4114 = vmatmul.msk.f32.gmra.mxu1 %vm2125_vm13, %v8390_v3  ;;  %vm910_vm15 = vmor %vm302_vm8, %vm654_vm9  ;;  %v4763_v19 = vpop.permute.xlu1 %555  ;;  %vm668_vm8 = vcmp.eq.s32.totalorder %v4640_v17, %v4697_v1 }
  0xb5   :  { %vm1518_vm1 = vmor %vm910_vm15, %vm1262_vm12  ;;  %v4769_v16 = vpop.permute.xlu2 %1777  ;;  %vm660_vm6 = vcmp.eq.s32.totalorder %v4640_v17, %v4763_v19  ;;  %vm661_vm12 = vcmp.eq.s32.totalorder %v4649_v55, %v4763_v19  ;;  %vm316_vm15 = vcmp.eq.s32.totalorder %v4640_v17, %v4609_v20  ;;  %v4863_v25 = vpop.permute.xlu0 %1783 }
  0xb6   :  { %vm2126_vm3 = vmor %vm1518_vm1, %vm1870_vm11  ;;  %vm1268_vm11 = vcmp.eq.s32.totalorder %v4640_v17, %v4644_v53  ;;  %vm662_vm1 = vcmp.eq.s32.totalorder %v4656_v58, %v4763_v19 }
  0xb7   :  { %4146 = vmatmul.msk.f32.gmra.mxu2 %vm2126_vm3, %v8390_v3  ;;  %vm911_vm5 = vmor %vm303_vm0, %vm655_vm14  ;;  %vm309_vm14 = vcmp.eq.s32.totalorder %v4649_v55, %v4595_v57 }
  0xb8   :  { %vm1519_vm7 = vmor %vm911_vm5, %vm1263_vm2 }
  0xb9   :  { %vm2127_vm9 = vmor %vm1519_vm7, %vm1871_vm4  ;;  %591 = vperm.xlu2 %4369, %v4538_v12   ;;  %1804 = vperm.xlu1 %4368, %v4543_v13   ;;  %vm1269_vm4 = vcmp.eq.s32.totalorder %v4649_v55, %v4644_v53 }
  0xba   :  { %4178 = vmatmul.msk.f32.gmra.mxu3 %vm2127_vm9, %v8390_v3  ;;  %vm916_vm13 = vmor %vm308_vm10, %vm660_vm6  ;;  %vm310_vm6 = vcmp.eq.s32.totalorder %v4656_v58, %v4595_v57 }
  0xbb   :  { %vm1524_vm0 = vmor %vm916_vm13, %vm1268_vm11  ;;  %vm1270_vm11 = vcmp.eq.s32.totalorder %v4656_v58, %v4644_v53 }
  0xbc   :  { %vm4791_vm2 = vmor %vm316_vm15, %vm668_vm8  ;;  %vm663_vm15 = vcmp.eq.s32.totalorder %v4664_v11, %v4763_v19 }
  0xbd   :  { %vm917_vm3 = vmor %vm309_vm14, %vm661_vm12  ;;  %v4797_v13 = vpop.permute.xlu1 %1771  ;;  %v4801_v22 = vpop.permute.xlu2 %1780 }
  0xbe   :  { %vm1525_vm5 = vmor %vm917_vm3, %vm1269_vm4  ;;  %vm1876_vm7 = vcmp.eq.s32.totalorder %v4640_v17, %v4797_v13  ;;  %vm1877_vm8 = vcmp.eq.s32.totalorder %v4649_v55, %v4797_v13  ;;  %vm1878_vm12 = vcmp.eq.s32.totalorder %v4656_v58, %v4797_v13  ;;  %v4933_v33 = vpop.permute.xlu0 %1798 }
  0xbf   :  { %vm918_vm9 = vmor %vm310_vm6, %vm662_vm1  ;;  %vm1879_vm1 = vcmp.eq.s32.totalorder %v4664_v11, %v4797_v13  ;;  %vm1276_vm6 = vcmp.eq.s32.totalorder %v4640_v17, %v4646_v54  ;;  %8571 = vst [vmem:[#allocation10_spill] sm:$0xff] %v4933_v33 }
  0xc0   :  { %vm2132_vm10 = vmor %vm1524_vm0, %vm1876_vm7  ;;  %vm311_vm0 = vcmp.eq.s32.totalorder %v4664_v11, %v4595_v57 }
  0xc1   :  { %4083 = vmatmul.msk.f32.gmra.mxu0 %vm2132_vm10, %v8390_v3  ;;  %vm2133_vm13 = vmor %vm1525_vm5, %vm1877_vm8  ;;  %4371 = vset.pattern.permute.xlu2 %v8372_v15  ;;  %vm1271_vm5 = vcmp.eq.s32.totalorder %v4664_v11, %v4644_v53 }
  0xc2   :  { %4115 = vmatmul.msk.f32.gmra.mxu1 %vm2133_vm13, %v8390_v3  ;;  %vm1526_vm14 = vmor %vm918_vm9, %vm1270_vm11  ;;  %4370 = vset.pattern.permute.xlu1 %v8368_v14  ;;  %vm669_vm9 = vcmp.eq.s32.totalorder %v4649_v55, %v4697_v1  ;;  %vm1277_vm13 = vcmp.eq.s32.totalorder %v4649_v55, %v4646_v54 }
  0xc3   :  { %vm2134_vm3 = vmor %vm1526_vm14, %vm1878_vm12  ;;  %1807 = vperm.xlu2 %4371, %v4538_v12   ;;  %1199 = vperm.xlu1 %4370, %v4538_v12  }
  0xc4   :  { %4147 = vmatmul.msk.f32.gmra.mxu2 %vm2134_vm3, %v8390_v3  ;;  %vm919_vm4 = vmor %vm311_vm0, %vm663_vm15  ;;  %vm317_vm15 = vcmp.eq.s32.totalorder %v4649_v55, %v4609_v20 }
  0xc5   :  { %vm1527_vm7 = vmor %vm919_vm4, %vm1271_vm5  ;;  %v4828_v24 = vpop.permute.xlu1 %1774  ;;  %vm318_vm5 = vcmp.eq.s32.totalorder %v4656_v58, %v4609_v20 }
  0xc6   :  { %vm2135_vm8 = vmor %vm1527_vm7, %vm1879_vm1  ;;  %vm1884_vm12 = vcmp.eq.s32.totalorder %v4640_v17, %v4828_v24  ;;  %vm1885_vm14 = vcmp.eq.s32.totalorder %v4649_v55, %v4828_v24  ;;  %vm1278_vm1 = vcmp.eq.s32.totalorder %v4656_v58, %v4646_v54  ;;  %v5005_v7 = vpop.permute.xlu0 %215 }
  0xc7   :  { %4179 = vmatmul.msk.f32.gmra.mxu3 %vm2135_vm8, %v8390_v3  ;;  %vm1532_vm10 = vmor %vm4791_vm2, %vm1276_vm6  ;;  %v4839_v12 = vpop.permute.xlu2 %1175  ;;  %vm670_vm2 = vcmp.eq.s32.totalorder %v4656_v58, %v4697_v1  ;;  %vm1886_vm6 = vcmp.eq.s32.totalorder %v4656_v58, %v4828_v24  ;;  %vm671_vm8 = vcmp.eq.s32.totalorder %v4664_v11, %v4697_v1 }
  0xc8   :  { %vm2140_vm11 = vmor %vm1532_vm10, %vm1884_vm12  ;;  %vm1279_vm10 = vcmp.eq.s32.totalorder %v4664_v11, %v4646_v54 }
  0xc9   :  { %4084 = vmatmul.msk.f32.gmra.mxu0 %vm2140_vm11, %v8390_v3  ;;  %vm925_vm3 = vmor %vm317_vm15, %vm669_vm9  ;;  %vm1887_vm11 = vcmp.eq.s32.totalorder %v4664_v11, %v4828_v24 }
  0xca   :  { %vm1533_vm0 = vmor %vm925_vm3, %vm1277_vm13  ;;  %vm319_vm13 = vcmp.eq.s32.totalorder %v4664_v11, %v4609_v20 }
  0xcb   :  { %vm2141_vm4 = vmor %vm1533_vm0, %vm1885_vm14  ;;  %4374 = vset.pattern.permute.xlu2 %v8368_v14  ;;  %4373 = vset.pattern.permute.xlu1 %v8370_v9  ;;  %vm676_vm14 = vcmp.eq.s32.totalorder %v4640_v17, %v4731_v5 }
  0xcc   :  { %4116 = vmatmul.msk.f32.gmra.mxu1 %vm2141_vm4, %v8390_v3  ;;  %vm926_vm7 = vmor %vm318_vm5, %vm670_vm2  ;;  %594 = vperm.xlu1 %4373, %v4582_v29   ;;  %vm1892_vm4 = vcmp.eq.s32.totalorder %v4640_v17, %v4769_v16 }
  0xcd   :  { %vm1534_vm9 = vmor %vm926_vm7, %vm1278_vm1  ;;  %1202 = vperm.xlu2 %4374, %v4582_v29   ;;  %vm324_vm1 = vcmp.eq.s32.totalorder %v4640_v17, %v4569_v18  ;;  %vm684_vm7 = vcmp.eq.s32.totalorder %v4640_v17, %v4636_v50 }
  0xce   :  { %vm2142_vm12 = vmor %vm1534_vm9, %vm1886_vm6  ;;  %v4870_v26 = vpop.permute.xlu1 %1169  ;;  %vm677_vm6 = vcmp.eq.s32.totalorder %v4649_v55, %v4731_v5  ;;  %v5071_v46 = vpop.permute.xlu0 %224 }
  0xcf   :  { %4148 = vmatmul.msk.f32.gmra.mxu2 %vm2142_vm12, %v8390_v3  ;;  %vm927_vm15 = vmor %vm319_vm13, %vm671_vm8  ;;  %v4874_v27 = vpop.permute.xlu2 %1178  ;;  %vm1284_vm2 = vcmp.eq.s32.totalorder %v4640_v17, %v4870_v26  ;;  %vm1285_vm9 = vcmp.eq.s32.totalorder %v4649_v55, %v4870_v26  ;;  %vm325_vm12 = vcmp.eq.s32.totalorder %v4649_v55, %v4569_v18  ;;  %vm1893_vm13 = vcmp.eq.s32.totalorder %v4649_v55, %v4769_v16 }
  0xd0   :  { %vm1535_vm3 = vmor %vm927_vm15, %vm1279_vm10  ;;  %vm685_vm15 = vcmp.eq.s32.totalorder %v4649_v55, %v4636_v50  ;;  %8578 = vst [vmem:[#allocation13_spill] sm:$0xff] %v5071_v46 }
  0xd1   :  { %vm2143_vm0 = vmor %vm1535_vm3, %vm1887_vm11  ;;  %vm332_vm11 = vcmp.eq.s32.totalorder %v4640_v17, %v4577_v28  ;;  %vm678_vm3 = vcmp.eq.s32.totalorder %v4656_v58, %v4731_v5 }
  0xd2   :  { %4180 = vmatmul.msk.f32.gmra.mxu3 %vm2143_vm0, %v8390_v3  ;;  %vm932_vm5 = vmor %vm324_vm1, %vm676_vm14  ;;  %vm1286_vm1 = vcmp.eq.s32.totalorder %v4656_v58, %v4870_v26 }
  0xd3   :  { %vm1540_vm8 = vmor %vm932_vm5, %vm1284_vm2  ;;  %vm686_vm5 = vcmp.eq.s32.totalorder %v4656_v58, %v4636_v50 }
  0xd4   :  { %vm2148_vm10 = vmor %vm1540_vm8, %vm1892_vm4  ;;  %4375 = vset.pattern.permute.xlu1 %v8372_v15  ;;  %vm333_vm4 = vcmp.eq.s32.totalorder %v4649_v55, %v4577_v28  ;;  %vm1894_vm8 = vcmp.eq.s32.totalorder %v4656_v58, %v4769_v16 }
  0xd5   :  { %4085 = vmatmul.msk.f32.gmra.mxu0 %vm2148_vm10, %v8390_v3  ;;  %vm933_vm14 = vmor %vm325_vm12, %vm677_vm6  ;;  %1810 = vperm.xlu1 %4375, %v4582_v29   ;;  %vm679_vm12 = vcmp.eq.s32.totalorder %v4664_v11, %v4731_v5 }
  0xd6   :  { %vm4907_vm2 = vmor %vm332_vm11, %vm684_vm7  ;;  %4376 = vset.pattern.permute.xlu2 %v8366_v0  ;;  %vm326_vm7 = vcmp.eq.s32.totalorder %v4656_v58, %v4569_v18  ;;  %v4923_v32 = vpop.permute.xlu1 %1172  ;;  %vm687_vm11 = vcmp.eq.s32.totalorder %v4664_v11, %v4636_v50  ;;  %v5127_v10 = vpop.permute.xlu0 %233 }
  0xd7   :  { %vm1541_vm0 = vmor %vm933_vm14, %vm1285_vm9  ;;  %245 = vperm.xlu2 %4376, %v4602_v60   ;;  %vm1287_vm14 = vcmp.eq.s32.totalorder %v4664_v11, %v4870_v26  ;;  %8581 = vst [vmem:[#allocation16_spill] sm:$0xff] %v5127_v10 }
  0xd8   :  { %vm2149_vm6 = vmor %vm1541_vm0, %vm1893_vm13  ;;  %vm334_vm13 = vcmp.eq.s32.totalorder %v4656_v58, %v4577_v28  ;;  %v4955_v35 = vpop.permute.xlu2 %573 }
  0xd9   :  { %vm4928_vm9 = vmor %vm333_vm4, %vm685_vm15  ;;  %4117 = vmatmul.msk.f32.gmra.mxu1 %vm2149_vm6, %v8390_v3  ;;  %vm327_vm4 = vcmp.eq.s32.totalorder %v4664_v11, %v4569_v18  ;;  %vm335_vm6 = vcmp.eq.s32.totalorder %v4664_v11, %v4577_v28 }
  0xda   :  { %vm934_vm10 = vmor %vm326_vm7, %vm678_vm3 }
  0xdb   :  { %vm1542_vm15 = vmor %vm934_vm10, %vm1286_vm1  ;;  %vm1895_vm1 = vcmp.eq.s32.totalorder %v4664_v11, %v4769_v16 }
  0xdc   :  { %vm4960_vm3 = vmor %vm334_vm13, %vm686_vm5  ;;  %vm1292_vm5 = vcmp.eq.s32.totalorder %v4640_v17, %v4923_v32 }
  0xdd   :  { %vm2150_vm0 = vmor %vm1542_vm15, %vm1894_vm8  ;;  %vm1293_vm15 = vcmp.eq.s32.totalorder %v4649_v55, %v4923_v32  ;;  %4377 = vset.pattern.permute.xlu1 %v8368_v14 }
  0xde   :  { %4149 = vmatmul.msk.f32.gmra.mxu2 %vm2150_vm0, %v8390_v3  ;;  %vm935_vm7 = vmor %vm327_vm4, %vm679_vm12  ;;  %vm1900_vm12 = vcmp.eq.s32.totalorder %v4640_v17, %v4801_v22  ;;  %vm1294_vm4 = vcmp.eq.s32.totalorder %v4656_v58, %v4923_v32  ;;  %1205 = vperm.xlu1 %4377, %v4602_v60   ;;  %v5175_v36 = vpop.permute.xlu0 %242 }
  0xdf   :  { %vm4976_vm10 = vmor %vm335_vm6, %vm687_vm11  ;;  %4378 = vset.pattern.permute.xlu2 %v8372_v15  ;;  %vm1295_vm6 = vcmp.eq.s32.totalorder %v4664_v11, %v4923_v32  ;;  %v5001_v39 = vpop.permute.xlu1 %567  ;;  %8584 = vst [vmem:[#allocation19_spill] sm:$0xff] %v5175_v36 }
  0xe0   :  { %vm1543_vm8 = vmor %vm935_vm7, %vm1287_vm14  ;;  %1813 = vperm.xlu2 %4378, %v4602_v60   ;;  %v5003_v40 = vpop.permute.xlu2 %576  ;;  %vm1902_vm7 = vcmp.eq.s32.totalorder %v4656_v58, %v4801_v22  ;;  %v5019_v60 = vld [vmem:[%s8363_s0 + $0x90] sm:$0xff] }
  0xe1   :  { %vm2151_vm13 = vmor %vm1543_vm8, %vm1895_vm1  ;;  %8576 = vst [vmem:[#allocation11_spill] sm:$0xff] %v5003_v40  ;;  %vm340_vm8 = vcmp.eq.s32.totalorder %v4640_v17, %v5005_v7  ;;  %1819 = vperm.xlu0 %4398, %v5019_v60  }
  0xe2   :  { %4181 = vmatmul.msk.f32.gmra.mxu3 %vm2151_vm13, %v8390_v3  ;;  %vm1548_vm0 = vmor %vm4907_vm2, %vm1292_vm5  ;;  %vm1901_vm2 = vcmp.eq.s32.totalorder %v4649_v55, %v4801_v22  ;;  %vm692_vm13 = vcmp.eq.s32.totalorder %v4640_v17, %v5001_v39 }
  0xe3   :  { %vm2156_vm11 = vmor %vm1548_vm0, %vm1900_vm12  ;;  %vm1300_vm0 = vcmp.eq.s32.totalorder %v4640_v17, %v4839_v12 }
  0xe4   :  { %4086 = vmatmul.msk.f32.gmra.mxu0 %vm2156_vm11, %v8390_v3  ;;  %vm1549_vm14 = vmor %vm4928_vm9, %vm1293_vm15  ;;  %vm1903_vm15 = vcmp.eq.s32.totalorder %v4664_v11, %v4801_v22  ;;  %vm1908_vm11 = vcmp.eq.s32.totalorder %v4640_v17, %v4863_v25 }
  0xe5   :  { %vm2157_vm1 = vmor %vm1549_vm14, %vm1901_vm2  ;;  %vm341_vm14 = vcmp.eq.s32.totalorder %v4649_v55, %v5005_v7 }
  0xe6   :  { %4118 = vmatmul.msk.f32.gmra.mxu1 %vm2157_vm1, %v8390_v3  ;;  %vm1550_vm9 = vmor %vm4960_vm3, %vm1294_vm4  ;;  %vm1301_vm1 = vcmp.eq.s32.totalorder %v4649_v55, %v4839_v12  ;;  %4379 = vset.pattern.permute.xlu1 %v8366_v0 }
  0xe7   :  { %vm2158_vm5 = vmor %vm1550_vm9, %vm1902_vm7  ;;  %vm1909_vm9 = vcmp.eq.s32.totalorder %v4649_v55, %v4863_v25  ;;  %248 = vperm.xlu1 %4379, %v4890_v30   ;;  %v5049_v44 = vpop.permute.xlu1 %570 }
  0xe8   :  { %4150 = vmatmul.msk.f32.gmra.mxu2 %vm2158_vm5, %v8390_v3  ;;  %vm1551_vm3 = vmor %vm4976_vm10, %vm1295_vm6  ;;  %vm693_vm10 = vcmp.eq.s32.totalorder %v4649_v55, %v5001_v39  ;;  %4380 = vset.pattern.permute.xlu2 %v8370_v9  ;;  %vm342_vm5 = vcmp.eq.s32.totalorder %v4656_v58, %v5005_v7 }
  0xe9   :  { %vm2159_vm12 = vmor %vm1551_vm3, %vm1903_vm15  ;;  %600 = vperm.xlu2 %4380, %v4890_v30   ;;  %vm1302_vm3 = vcmp.eq.s32.totalorder %v4656_v58, %v4839_v12  ;;  %v5054_v45 = vpop.permute.xlu2 %1792  ;;  %1834 = vperm.xlu0 %4398, %v5101_v61  }
  0xea   :  { %4182 = vmatmul.msk.f32.gmra.mxu3 %vm2159_vm12, %v8390_v3  ;;  %vm948_vm4 = vmor %vm340_vm8, %vm692_vm13  ;;  %vm694_vm8 = vcmp.eq.s32.totalorder %v4656_v58, %v5001_v39  ;;  %8577 = vst [vmem:[#allocation12_spill] sm:$0xff] %v5054_v45 }
  0xeb   :  { %vm1556_vm2 = vmor %vm948_vm4, %vm1300_vm0  ;;  %vm1910_vm0 = vcmp.eq.s32.totalorder %v4656_v58, %v4863_v25  ;;  %vm695_vm4 = vcmp.eq.s32.totalorder %v4664_v11, %v5001_v39 }
  0xec   :  { %vm2164_vm6 = vmor %vm1556_vm2, %vm1908_vm11  ;;  %vm343_vm11 = vcmp.eq.s32.totalorder %v4664_v11, %v5005_v7 }
  0xed   :  { %4087 = vmatmul.msk.f32.gmra.mxu0 %vm2164_vm6, %v8390_v3  ;;  %vm949_vm7 = vmor %vm341_vm14, %vm693_vm10  ;;  %vm1303_vm10 = vcmp.eq.s32.totalorder %v4664_v11, %v4839_v12 }
  0xee   :  { %vm1557_vm13 = vmor %vm949_vm7, %vm1301_vm1  ;;  %vm1911_vm1 = vcmp.eq.s32.totalorder %v4664_v11, %v4863_v25 }
  0xef   :  { %vm2165_vm15 = vmor %vm1557_vm13, %vm1909_vm9  ;;  %vm700_vm9 = vcmp.eq.s32.totalorder %v4640_v17, %v5049_v44  ;;  %4381 = vset.pattern.permute.xlu1 %v8372_v15 }
  0xf0   :  { %4119 = vmatmul.msk.f32.gmra.mxu1 %vm2165_vm15, %v8390_v3  ;;  %vm950_vm12 = vmor %vm342_vm5, %vm694_vm8  ;;  %1816 = vperm.xlu1 %4381, %v4890_v30   ;;  %vm348_vm8 = vcmp.eq.s32.totalorder %v4640_v17, %v4620_v38  ;;  %v5078_v47 = vpop.permute.xlu1 %1786  ;;  %vm701_vm15 = vcmp.eq.s32.totalorder %v4649_v55, %v5049_v44  ;;  %v46_v30 = vld [vmem:[%s8363_s0 + $0x98] sm:$0xff] }
  0xf1   :  { %vm1558_vm14 = vmor %vm950_vm12, %vm1302_vm3  ;;  %4382 = vset.pattern.permute.xlu2 %v8366_v0  ;;  %v5080_v51 = vpop.permute.xlu2 %1795  ;;  %vm1308_vm3 = vcmp.eq.s32.totalorder %v4640_v17, %v4874_v27  ;;  %vm1916_vm12 = vcmp.eq.s32.totalorder %v4640_v17, %v5078_v47  ;;  %4403 = vset.pattern.permute.xlu0 %v8366_v0 }
  0xf2   :  { %vm2166_vm2 = vmor %vm1558_vm14, %vm1910_vm0  ;;  %8579 = vst [vmem:[#allocation14_spill] sm:$0xff] %v5080_v51  ;;  %251 = vperm.xlu2 %4382, %v5019_v60   ;;  %vm1917_vm14 = vcmp.eq.s32.totalorder %v4649_v55, %v5078_v47  ;;  %257 = vperm.xlu0 %4403, %v5160_v31  }
  0xf3   :  { %4151 = vmatmul.msk.f32.gmra.mxu2 %vm2166_vm2, %v8390_v3  ;;  %vm951_vm6 = vmor %vm343_vm11, %vm695_vm4  ;;  %vm349_vm4 = vcmp.eq.s32.totalorder %v4649_v55, %v4620_v38  ;;  %vm1309_vm2 = vcmp.eq.s32.totalorder %v4649_v55, %v4874_v27 }
  0xf4   :  { %vm1559_vm7 = vmor %vm951_vm6, %vm1303_vm10 }
  0xf5   :  { %vm2167_vm5 = vmor %vm1559_vm7, %vm1911_vm1  ;;  %vm702_vm1 = vcmp.eq.s32.totalorder %v4656_v58, %v5049_v44  ;;  %vm350_vm7 = vcmp.eq.s32.totalorder %v4656_v58, %v4620_v38 }
  0xf6   :  { %4183 = vmatmul.msk.f32.gmra.mxu3 %vm2167_vm5, %v8390_v3  ;;  %vm956_vm13 = vmor %vm348_vm8, %vm700_vm9  ;;  %vm1918_vm5 = vcmp.eq.s32.totalorder %v4656_v58, %v5078_v47 }
  0xf7   :  { %vm1564_vm0 = vmor %vm956_vm13, %vm1308_vm3  ;;  %vm1310_vm13 = vcmp.eq.s32.totalorder %v4656_v58, %v4874_v27  ;;  %vm703_vm3 = vcmp.eq.s32.totalorder %v4664_v11, %v5049_v44 }
  0xf8   :  { %vm2172_vm11 = vmor %vm1564_vm0, %vm1916_vm12  ;;  %4383 = vset.pattern.permute.xlu1 %v8370_v9  ;;  %vm351_vm12 = vcmp.eq.s32.totalorder %v4664_v11, %v4620_v38  ;;  %v5119_v63 = vpop.permute.xlu1 %1789 }
  0xf9   :  { %4088 = vmatmul.msk.f32.gmra.mxu0 %vm2172_vm11, %v8390_v3  ;;  %vm957_vm10 = vmor %vm349_vm4, %vm701_vm15  ;;  %vm1919_vm11 = vcmp.eq.s32.totalorder %v4664_v11, %v5078_v47  ;;  %603 = vperm.xlu1 %4383, %v5019_v60   ;;  %8580 = vst [vmem:[#allocation15_spill] sm:$0xff] %v5119_v63 }
  0xfa   :  { %vm1565_vm6 = vmor %vm957_vm10, %vm1309_vm2  ;;  %4384 = vset.pattern.permute.xlu2 %v8368_v14  ;;  %vm708_vm10 = vcmp.eq.s32.totalorder %v4640_v17, %v4955_v35  ;;  %v5129_v21 = vpop.permute.xlu2 %1190 }
  0xfb   :  { %vm2173_vm9 = vmor %vm1565_vm6, %vm1917_vm14  ;;  %vm1311_vm14 = vcmp.eq.s32.totalorder %v4664_v11, %v4874_v27  ;;  %8582 = vst [vmem:[#allocation17_spill] sm:$0xff] %v5129_v21  ;;  %1211 = vperm.xlu2 %4384, %v5019_v60  }
  0xfc   :  { %4120 = vmatmul.msk.f32.gmra.mxu1 %vm2173_vm9, %v8390_v3  ;;  %vm958_vm8 = vmor %vm350_vm7, %vm702_vm1  ;;  %vm1316_vm1 = vcmp.eq.s32.totalorder %v4640_v17, %v4699_v2  ;;  %vm356_vm9 = vcmp.eq.s32.totalorder %v4640_v17, %v4587_v43  ;;  %vm1924_vm7 = vcmp.eq.s32.totalorder %v4640_v17, %v5119_v63 }
  0xfd   :  { %vm1566_vm15 = vmor %vm958_vm8, %vm1310_vm13  ;;  %vm709_vm8 = vcmp.eq.s32.totalorder %v4649_v55, %v4955_v35 }
  0xfe   :  { %vm2174_vm0 = vmor %vm1566_vm15, %vm1918_vm5 }
  0xff   :  { %4152 = vmatmul.msk.f32.gmra.mxu2 %vm2174_vm0, %v8390_v3  ;;  %vm959_vm4 = vmor %vm351_vm12, %vm703_vm3  ;;  %vm1317_vm3 = vcmp.eq.s32.totalorder %v4649_v55, %v4699_v2  ;;  %vm357_vm0 = vcmp.eq.s32.totalorder %v4649_v55, %v4587_v43  ;;  %vm1925_vm12 = vcmp.eq.s32.totalorder %v4649_v55, %v5119_v63 }
 0x100   :  { %vm1567_vm2 = vmor %vm959_vm4, %vm1311_vm14  ;;  %vm710_vm4 = vcmp.eq.s32.totalorder %v4656_v58, %v4955_v35 }
 0x101   :  { %vm2175_vm6 = vmor %vm1567_vm2, %vm1919_vm11  ;;  %4385 = vset.pattern.permute.xlu1 %v8366_v0  ;;  %v5166_v29 = vpop.permute.xlu1 %1184  ;;  %v5214_v0 = vpop.permute.xlu0 %579 }
 0x102   :  { %4184 = vmatmul.msk.f32.gmra.mxu3 %vm2175_vm6, %v8390_v3  ;;  %vm964_vm5 = vmor %vm356_vm9, %vm708_vm10  ;;  %vm1318_vm10 = vcmp.eq.s32.totalorder %v4656_v58, %v4699_v2  ;;  %vm1926_vm6 = vcmp.eq.s32.totalorder %v4656_v58, %v5119_v63  ;;  %254 = vperm.xlu1 %4385, %v46_v30   ;;  %8583 = vst [vmem:[#allocation18_spill] sm:$0xff] %v5166_v29  ;;  %v5181_v37 = vpop.permute.xlu2 %1193 }
 0x103   :  { %vm1572_vm13 = vmor %vm964_vm5, %vm1316_vm1  ;;  %vm358_vm1 = vcmp.eq.s32.totalorder %v4656_v58, %v4587_v43  ;;  %4386 = vset.pattern.permute.xlu2 %v8370_v9  ;;  %8585 = vst [vmem:[#allocation20_spill] sm:$0xff] %v5181_v37 }
 0x104   :  { %vm2180_vm15 = vmor %vm1572_vm13, %vm1924_vm7  ;;  %vm711_vm7 = vcmp.eq.s32.totalorder %v4664_v11, %v4955_v35  ;;  %606 = vperm.xlu2 %4386, %v46_v30   ;;  %8587 = vst [vmem:[#allocation22_spill] sm:$0xff] %v5214_v0 }
 0x105   :  { %4089 = vmatmul.msk.f32.gmra.mxu0 %vm2180_vm15, %v8390_v3  ;;  %vm965_vm11 = vmor %vm357_vm0, %vm709_vm8  ;;  %vm1319_vm8 = vcmp.eq.s32.totalorder %v4664_v11, %v4699_v2  ;;  %vm1927_vm15 = vcmp.eq.s32.totalorder %v4664_v11, %v5119_v63  ;;  %v154_v63 = vld [vmem:[#allocation2 + $0x2f8] sm:$0xff] }
 0x106   :  { %vm1573_vm14 = vmor %vm965_vm11, %vm1317_vm3  ;;  %vm359_vm3 = vcmp.eq.s32.totalorder %v4664_v11, %v4587_v43  ;;  %vm716_vm11 = vcmp.eq.s32.totalorder %v4640_v17, %v5003_v40  ;;  %v8596_v43 = vmov 1.0   ;;  %3449 = vmatpush.msrb.mxu1 %v154_v63  ;;  %v169_v63 = vld [vmem:[#allocation2 + $0x370] sm:$0xff] }
 0x107   :  { %vm2181_vm2 = vmor %vm1573_vm14, %vm1925_vm12  ;;  %vm364_vm12 = vcmp.eq.s32.totalorder %v4640_v17, %v5071_v46  ;;  %vm1324_vm14 = vcmp.eq.s32.totalorder %v4640_v17, %v5166_v29 }
 0x108   :  { %4121 = vmatmul.msk.f32.gmra.mxu1 %vm2181_vm2, %v8390_v3  ;;  %vm966_vm9 = vmor %vm358_vm1, %vm710_vm4  ;;  %vm1932_vm2 = vcmp.eq.s32.totalorder %v4640_v17, %v5054_v45 }
 0x109   :  { %vm1574_vm5 = vmor %vm966_vm9, %vm1318_vm10  ;;  %vm717_vm9 = vcmp.eq.s32.totalorder %v4649_v55, %v5003_v40  ;;  %v5200_v60 = vpop.permute.xlu1 %1187 }
 0x10a   :  { %vm2182_vm13 = vmor %vm1574_vm5, %vm1926_vm6  ;;  %vm365_vm6 = vcmp.eq.s32.totalorder %v4649_v55, %v5071_v46  ;;  %vm1325_vm5 = vcmp.eq.s32.totalorder %v4649_v55, %v5166_v29  ;;  %4387 = vset.pattern.permute.xlu1 %v8368_v14  ;;  %8586 = vst [vmem:[#allocation21_spill] sm:$0xff] %v5200_v60 }
 0x10b   :  { %4153 = vmatmul.msk.f32.gmra.mxu2 %vm2182_vm13, %v8390_v3  ;;  %vm967_vm0 = vmor %vm359_vm3, %vm711_vm7  ;;  %vm1933_vm13 = vcmp.eq.s32.totalorder %v4649_v55, %v5054_v45  ;;  %1214 = vperm.xlu1 %4387, %v46_v30   ;;  %v5221_v14 = vpop.permute.xlu2 %588 }
 0x10c   :  { %vm1575_vm4 = vmor %vm967_vm0, %vm1319_vm8  ;;  %vm718_vm0 = vcmp.eq.s32.totalorder %v4656_v58, %v5003_v40  ;;  %4388 = vset.pattern.permute.xlu2 %v8372_v15  ;;  %8588 = vst [vmem:[#allocation23_spill] sm:$0xff] %v5221_v14 }
 0x10d   :  { %vm2183_vm10 = vmor %vm1575_vm4, %vm1927_vm15  ;;  %vm366_vm15 = vcmp.eq.s32.totalorder %v4656_v58, %v5071_v46  ;;  %1822 = vperm.xlu2 %4388, %v46_v30  }
 0x10e   :  { %4185 = vmatmul.msk.f32.gmra.mxu3 %vm2183_vm10, %v8390_v3  ;;  %vm972_vm1 = vmor %vm364_vm12, %vm716_vm11  ;;  %vm1326_vm11 = vcmp.eq.s32.totalorder %v4656_v58, %v5166_v29 }
 0x10f   :  { %vm1580_vm7 = vmor %vm972_vm1, %vm1324_vm14  ;;  %vm1934_vm14 = vcmp.eq.s32.totalorder %v4656_v58, %v5054_v45  ;;  %vm719_vm1 = vcmp.eq.s32.totalorder %v4664_v11, %v5003_v40  ;;  %v170_v40 = vld [vmem:[#allocation2 + $0x378] sm:$0xff] }
 0x110   :  { %vm2188_vm8 = vmor %vm1580_vm7, %vm1932_vm2  ;;  %vm367_vm2 = vcmp.eq.s32.totalorder %v4664_v11, %v5071_v46  ;;  %v138_v46 = vld [vmem:[#allocation2 + $0x278] sm:$0xff]  ;;  %3562 = vmatpush.msrb.mxu2 %v170_v40 }
 0x111   :  { %4090 = vmatmul.msk.f32.gmra.mxu0 %vm2188_vm8, %v8390_v3  ;;  %vm973_vm3 = vmor %vm365_vm6, %vm717_vm9  ;;  %vm1327_vm9 = vcmp.eq.s32.totalorder %v4664_v11, %v5166_v29  ;;  %v8591_v29 = vmov 3  }
 0x112   :  { %vm1581_vm12 = vmor %vm973_vm3, %vm1325_vm5  ;;  %vm1935_vm5 = vcmp.eq.s32.totalorder %v4664_v11, %v5054_v45  ;;  %v5233_v30 = vpop.permute.xlu1 %582  ;;  %3336 = vmatpush.msrb.mxu0 %v138_v46  ;;  %3563 = vmatpush.msrb.mxu2 %v169_v63  ;;  %v8601_v63 = vmov 1  }
 0x113   :  { %vm2189_vm4 = vmor %vm1581_vm12, %vm1933_vm13  ;;  %vm724_vm13 = vcmp.eq.s32.totalorder %v4640_v17, %v5214_v0  ;;  %4389 = vset.pattern.permute.xlu1 %v8370_v9  ;;  %vm372_vm12 = vcmp.eq.s32.totalorder %v4640_v17, %v4632_v48  ;;  %v8589_v9 = vmov 2   ;;  %v5256_v15 = vpop.permute.xlu2 %591 }
 0x114   :  { %4122 = vmatmul.msk.f32.gmra.mxu1 %vm2189_vm4, %v8390_v3  ;;  %vm974_vm10 = vmor %vm366_vm15, %vm718_vm0  ;;  %vm1332_vm15 = vcmp.eq.s32.totalorder %v4640_v17, %v5200_v60  ;;  %609 = vperm.xlu1 %4389, %v5160_v31   ;;  %vm725_vm4 = vcmp.eq.s32.totalorder %v4649_v55, %v5214_v0 }
 0x115   :  { %vm1582_vm6 = vmor %vm974_vm10, %vm1326_vm11  ;;  %vm1940_vm10 = vcmp.eq.s32.totalorder %v4640_v17, %v5080_v51  ;;  %4390 = vset.pattern.permute.xlu2 %v8589_v9 }
 0x116   :  { %vm2190_vm7 = vmor %vm1582_vm6, %vm1934_vm14  ;;  %vm373_vm6 = vcmp.eq.s32.totalorder %v4649_v55, %v4632_v48  ;;  %1217 = vperm.xlu2 %4390, %v5160_v31  }
 0x117   :  { %4154 = vmatmul.msk.f32.gmra.mxu2 %vm2190_vm7, %v8390_v3  ;;  %vm975_vm8 = vmor %vm367_vm2, %vm719_vm1  ;;  %vm1333_vm2 = vcmp.eq.s32.totalorder %v4649_v55, %v5200_v60  ;;  %vm726_vm7 = vcmp.eq.s32.totalorder %v4656_v58, %v5214_v0 }
 0x118   :  { %vm1583_vm3 = vmor %vm975_vm8, %vm1327_vm9  ;;  %vm1941_vm8 = vcmp.eq.s32.totalorder %v4649_v55, %v5080_v51 }
 0x119   :  { %vm2191_vm0 = vmor %vm1583_vm3, %vm1935_vm5 }
 0x11a   :  { %4186 = vmatmul.msk.f32.gmra.mxu3 %vm2191_vm0, %v8390_v3  ;;  %vm980_vm11 = vmor %vm372_vm12, %vm724_vm13  ;;  %vm1334_vm13 = vcmp.eq.s32.totalorder %v4656_v58, %v5200_v60  ;;  %vm727_vm12 = vcmp.eq.s32.totalorder %v4664_v11, %v5214_v0  ;;  %v5263_v45 = vpop.permute.xlu1 %585  ;;  %v5281_v0 = vpop.permute.xlu0 %597 }
 0x11b   :  { %vm1588_vm14 = vmor %vm980_vm11, %vm1332_vm15  ;;  %vm374_vm15 = vcmp.eq.s32.totalorder %v4656_v58, %v4632_v48  ;;  %8590 = vst [vmem:[#allocation24_spill] sm:$0xff] %v5263_v45 }
 0x11c   :  { %vm2196_vm1 = vmor %vm1588_vm14, %vm1940_vm10  ;;  %vm1335_vm14 = vcmp.eq.s32.totalorder %v4664_v11, %v5200_v60  ;;  %4391 = vset.pattern.permute.xlu1 %v8591_v29  ;;  %v8592_v60 = vmov 0   ;;  %8593 = vst [vmem:[#allocation25_spill] sm:$0xff] %v5281_v0 }
 0x11d   :  { %4091 = vmatmul.msk.f32.gmra.mxu0 %vm2196_vm1, %v8390_v3  ;;  %vm981_vm9 = vmor %vm373_vm6, %vm725_vm4  ;;  %vm1942_vm4 = vcmp.eq.s32.totalorder %v4656_v58, %v5080_v51  ;;  %1825 = vperm.xlu1 %4391, %v5160_v31   ;;  %vm732_vm6 = vcmp.eq.s32.totalorder %v4640_v17, %v5233_v30  ;;  %v4436_v31 = vld [vmem:[%s8363_s0 + $0xa8] sm:$0xff] }
 0x11e   :  { %vm1589_vm5 = vmor %vm981_vm9, %vm1333_vm2  ;;  %vm375_vm2 = vcmp.eq.s32.totalorder %v4664_v11, %v4632_v48  ;;  %4392 = vset.pattern.permute.xlu2 %v8592_v60 }
 0x11f   :  { %vm2197_vm3 = vmor %vm1589_vm5, %vm1941_vm8  ;;  %vm1340_vm5 = vcmp.eq.s32.totalorder %v4640_v17, %v5129_v21  ;;  %260 = vperm.xlu2 %4392, %v4436_v31  }
 0x120   :  { %4123 = vmatmul.msk.f32.gmra.mxu1 %vm2197_vm3, %v8390_v3  ;;  %vm982_vm0 = vmor %vm374_vm15, %vm726_vm7  ;;  %vm1943_vm7 = vcmp.eq.s32.totalorder %v4664_v11, %v5080_v51  ;;  %vm1948_vm3 = vcmp.eq.s32.totalorder %v4640_v17, %v4933_v33  ;;  %v5293_v51 = vpop.permute.xlu2 %1807 }
 0x121   :  { %vm1590_vm11 = vmor %vm982_vm0, %vm1334_vm13  ;;  %vm380_vm13 = vcmp.eq.s32.totalorder %v4640_v17, %v4593_v56  ;;  %vm733_vm0 = vcmp.eq.s32.totalorder %v4649_v55, %v5233_v30  ;;  %8594 = vst [vmem:[#allocation26_spill] sm:$0xff] %v5293_v51 }
 0x122   :  { %vm2198_vm10 = vmor %vm1590_vm11, %vm1942_vm4  ;;  %vm1341_vm11 = vcmp.eq.s32.totalorder %v4649_v55, %v5129_v21  ;;  %v5329_v40 = vpop.permute.xlu0 %612 }
 0x123   :  { %4155 = vmatmul.msk.f32.gmra.mxu2 %vm2198_vm10, %v8390_v3  ;;  %vm983_vm1 = vmor %vm375_vm2, %vm727_vm12  ;;  %vm1949_vm10 = vcmp.eq.s32.totalorder %v4649_v55, %v4933_v33  ;;  %v5304_v48 = vpop.permute.xlu1 %1801  ;;  %8597 = vst [vmem:[#allocation28_spill] sm:$0xff] %v5329_v40 }
 0x124   :  { %vm1591_vm9 = vmor %vm983_vm1, %vm1335_vm14  ;;  %vm381_vm14 = vcmp.eq.s32.totalorder %v4649_v55, %v4593_v56  ;;  %vm734_vm1 = vcmp.eq.s32.totalorder %v4656_v58, %v5233_v30  ;;  %8595 = vst [vmem:[#allocation27_spill] sm:$0xff] %v5304_v48 }
 0x125   :  { %vm2199_vm8 = vmor %vm1591_vm9, %vm1943_vm7  ;;  %vm1342_vm9 = vcmp.eq.s32.totalorder %v4656_v58, %v5129_v21  ;;  %4394 = vset.pattern.permute.xlu1 %v8589_v9 }
 0x126   :  { %4187 = vmatmul.msk.f32.gmra.mxu3 %vm2199_vm8, %v8390_v3  ;;  %vm988_vm15 = vmor %vm380_vm13, %vm732_vm6  ;;  %vm1950_vm8 = vcmp.eq.s32.totalorder %v4656_v58, %v4933_v33  ;;  %1220 = vperm.xlu1 %4394, %v4436_v31  }
 0x127   :  { %vm1596_vm12 = vmor %vm988_vm15, %vm1340_vm5  ;;  %vm382_vm5 = vcmp.eq.s32.totalorder %v4656_v58, %v4593_v56  ;;  %4395 = vset.pattern.permute.xlu2 %v8591_v29 }
 0x128   :  { %vm2204_vm4 = vmor %vm1596_vm12, %vm1948_vm3  ;;  %vm735_vm3 = vcmp.eq.s32.totalorder %v4664_v11, %v5233_v30  ;;  %1828 = vperm.xlu2 %4395, %v4436_v31   ;;  %v137_v31 = vld [vmem:[#allocation2 + $0x270] sm:$0xff] }
 0x129   :  { %4092 = vmatmul.msk.f32.gmra.mxu0 %vm2204_vm4, %v8390_v3  ;;  %vm989_vm2 = vmor %vm381_vm14, %vm733_vm0  ;;  %v186_v3 = vld [vmem:[#allocation2 + $0x3f8] sm:$0xff]  ;;  %vm1343_vm0 = vcmp.eq.s32.totalorder %v4664_v11, %v5129_v21  ;;  %vm1951_vm4 = vcmp.eq.s32.totalorder %v4664_v11, %v4933_v33  ;;  %v185_v33 = vld [vmem:[#allocation2 + $0x3f0] sm:$0xff] }
 0x12a   :  { %vm1597_vm6 = vmor %vm989_vm2, %vm1341_vm11  ;;  %3675 = vmatpush.msrb.mxu3 %v186_v3  ;;  %vm383_vm11 = vcmp.eq.s32.totalorder %v4664_v11, %v4593_v56  ;;  %vm740_vm2 = vcmp.eq.s32.totalorder %v4640_v17, %v5263_v45  ;;  %v5336_v3 = vpop.permute.xlu2 %1202  ;;  %3337 = vmatpush.msrb.mxu0 %v137_v31  ;;  %v153_v56 = vld [vmem:[#allocation2 + $0x2f0] sm:$0xff]  ;;  %v5369_v21 = vpop.permute.xlu0 %1196 }
 0x12b   :  { %vm2205_vm7 = vmor %vm1597_vm6, %vm1949_vm10  ;;  %vm388_vm10 = vcmp.eq.s32.totalorder %v4640_v17, %v5127_v10  ;;  %8598 = vst [vmem:[#allocation29_spill] sm:$0xff] %v5336_v3  ;;  %v5340_v46 = vpop.permute.xlu1 %1804  ;;  %3450 = vmatpush.msrb.mxu1 %v153_v56 }
 0x12c   :  { %4124 = vmatmul.msk.f32.gmra.mxu1 %vm2205_vm7, %v8596_v43  ;;  %vm990_vm13 = vmor %vm382_vm5, %vm734_vm1  ;;  %8599 = vst [vmem:[#allocation30_spill] sm:$0xff] %v5340_v46  ;;  %vm1348_vm5 = vcmp.eq.s32.totalorder %v4640_v17, %v5181_v37  ;;  %3676 = vmatpush.msrb.mxu3 %v185_v33 }
 0x12d   :  { %vm1598_vm15 = vmor %vm990_vm13, %vm1342_vm9  ;;  %vm1956_vm9 = vcmp.eq.s32.totalorder %v4640_v17, %v5304_v48  ;;  %vm741_vm13 = vcmp.eq.s32.totalorder %v4649_v55, %v5263_v45  ;;  %8600 = vst [vmem:[#allocation31_spill] sm:$0xff] %v5369_v21 }
 0x12e   :  { %vm2206_vm12 = vmor %vm1598_vm15, %vm1950_vm8  ;;  %vm389_vm8 = vcmp.eq.s32.totalorder %v4649_v55, %v5127_v10  ;;  %4396 = vset.pattern.permute.xlu1 %v8592_v60 }
 0x12f   :  { %4156 = vmatmul.msk.f32.gmra.mxu2 %vm2206_vm12, %v8596_v43  ;;  %vm991_vm14 = vmor %vm383_vm11, %vm735_vm3  ;;  %263 = vperm.xlu1 %4396, %v4948_v34   ;;  %vm1349_vm11 = vcmp.eq.s32.totalorder %v4649_v55, %v5181_v37 }
 0x130   :  { %vm1599_vm1 = vmor %vm991_vm14, %vm1343_vm0  ;;  %vm1957_vm0 = vcmp.eq.s32.totalorder %v4649_v55, %v5304_v48  ;;  %vm742_vm14 = vcmp.eq.s32.totalorder %v4656_v58, %v5263_v45  ;;  %4397 = vset.pattern.permute.xlu2 %v8601_v63 }
 0x131   :  { %vm2207_vm6 = vmor %vm1599_vm1, %vm1951_vm4  ;;  %vm390_vm4 = vcmp.eq.s32.totalorder %v4656_v58, %v5127_v10  ;;  %vm1958_vm1 = vcmp.eq.s32.totalorder %v4656_v58, %v5304_v48  ;;  %615 = vperm.xlu2 %4397, %v4948_v34  }
 0x132   :  { %4188 = vmatmul.msk.f32.gmra.mxu3 %vm2207_vm6, %v8596_v43  ;;  %vm996_vm7 = vmor %vm388_vm10, %vm740_vm2 }
 0x133   :  { %vm1604_vm3 = vmor %vm996_vm7, %vm1348_vm5  ;;  %vm391_vm7 = vcmp.eq.s32.totalorder %v4664_v11, %v5127_v10  ;;  %vm743_vm5 = vcmp.eq.s32.totalorder %v4664_v11, %v5263_v45  ;;  %v5379_v10 = vpop.permute.xlu2 %245  ;;  %v167_v45 = vld [vmem:[#allocation2 + $0x360] sm:$0xff] }
 0x134   :  { %vm2212_vm15 = vmor %vm1604_vm3, %vm1956_vm9  ;;  %vm1350_vm9 = vcmp.eq.s32.totalorder %v4656_v58, %v5181_v37  ;;  %vm1959_vm3 = vcmp.eq.s32.totalorder %v4664_v11, %v5304_v48  ;;  %8602 = vst [vmem:[#allocation32_spill] sm:$0xff] %v5379_v10  ;;  %v5479_v48 = vld [vmem:[%s8363_s0 + $0xc8] sm:$0xff] }
 0x135   :  { %4093 = vmatmul.msk.f32.gmra.mxu0 %vm2212_vm15, %v8596_v43  ;;  %vm997_vm12 = vmor %vm389_vm8, %vm741_vm13  ;;  %v5377_v31 = vpop.permute.xlu1 %1199  ;;  %272 = vperm.xlu0 %4403, %v5479_v48  }
 0x136   :  { %vm1605_vm10 = vmor %vm997_vm12, %vm1349_vm11  ;;  %vm748_vm12 = vcmp.eq.s32.totalorder %v4640_v17, %v5221_v14 }
 0x137   :  { %vm2213_vm2 = vmor %vm1605_vm10, %vm1957_vm0  ;;  %vm1351_vm0 = vcmp.eq.s32.totalorder %v4664_v11, %v5181_v37  ;;  %4399 = vset.pattern.permute.xlu1 %v8591_v29  ;;  %vm396_vm10 = vcmp.eq.s32.totalorder %v4640_v17, %v4642_v52  ;;  %v152_v37 = vld [vmem:[#allocation2 + $0x2e8] sm:$0xff] }
 0x138   :  { %4125 = vmatmul.msk.f32.gmra.mxu1 %vm2213_vm2, %v8596_v43  ;;  %vm998_vm6 = vmor %vm390_vm4, %vm742_vm14  ;;  %vm1356_vm4 = vcmp.eq.s32.totalorder %v4640_v17, %v5369_v21  ;;  %vm1964_vm2 = vcmp.eq.s32.totalorder %v4640_v17, %v5340_v46  ;;  %1831 = vperm.xlu1 %4399, %v4948_v34  }
 0x139   :  { %vm1606_vm8 = vmor %vm998_vm6, %vm1350_vm9  ;;  %vm749_vm6 = vcmp.eq.s32.totalorder %v4649_v55, %v5221_v14  ;;  %4400 = vset.pattern.permute.xlu2 %v8592_v60  ;;  %3451 = vmatpush.msrb.mxu1 %v152_v37  ;;  %v183_v37 = vld [vmem:[#allocation2 + $0x3e0] sm:$0xff] }
 0x13a   :  { %vm2214_vm13 = vmor %vm1606_vm8, %vm1958_vm1  ;;  %vm397_vm8 = vcmp.eq.s32.totalorder %v4649_v55, %v4642_v52  ;;  %266 = vperm.xlu2 %4400, %v5101_v61  }
 0x13b   :  { %4157 = vmatmul.msk.f32.gmra.mxu2 %vm2214_vm13, %v8596_v43  ;;  %vm999_vm15 = vmor %vm391_vm7, %vm743_vm5  ;;  %vm1357_vm7 = vcmp.eq.s32.totalorder %v4649_v55, %v5369_v21  ;;  %vm1965_vm13 = vcmp.eq.s32.totalorder %v4649_v55, %v5340_v46  ;;  %v5420_v33 = vpop.permute.xlu2 %1813 }
 0x13c   :  { %vm1607_vm11 = vmor %vm999_vm15, %vm1351_vm0  ;;  %vm750_vm15 = vcmp.eq.s32.totalorder %v4656_v58, %v5221_v14  ;;  %8604 = vst [vmem:[#allocation34_spill] sm:$0xff] %v5420_v33 }
 0x13d   :  { %vm2215_vm14 = vmor %vm1607_vm11, %vm1959_vm3  ;;  %4412 = vset.pattern.permute.xlu0 %v8601_v63 }
 0x13e   :  { %4189 = vmatmul.msk.f32.gmra.mxu3 %vm2215_vm14, %v8596_v43  ;;  %vm1004_vm1 = vmor %vm396_vm10, %vm748_vm12  ;;  %vm1358_vm12 = vcmp.eq.s32.totalorder %v4656_v58, %v5369_v21  ;;  %vm1966_vm14 = vcmp.eq.s32.totalorder %v4656_v58, %v5340_v46  ;;  %v5414_v56 = vpop.permute.xlu1 %594 }
 0x13f   :  { %vm1612_vm9 = vmor %vm1004_vm1, %vm1356_vm4  ;;  %vm398_vm4 = vcmp.eq.s32.totalorder %v4656_v58, %v4642_v52  ;;  %8603 = vst [vmem:[#allocation33_spill] sm:$0xff] %v5414_v56 }
 0x140   :  { %vm2220_vm5 = vmor %vm1612_vm9, %vm1964_vm2  ;;  %vm751_vm2 = vcmp.eq.s32.totalorder %v4664_v11, %v5221_v14  ;;  %4401 = vset.pattern.permute.xlu1 %v8601_v63  ;;  %v136_v14 = vld [vmem:[#allocation2 + $0x268] sm:$0xff] }
 0x141   :  { %4094 = vmatmul.msk.f32.gmra.mxu0 %vm2220_vm5, %v8596_v43  ;;  %vm1005_vm3 = vmor %vm397_vm8, %vm749_vm6  ;;  %vm1359_vm6 = vcmp.eq.s32.totalorder %v4664_v11, %v5369_v21  ;;  %vm1967_vm5 = vcmp.eq.s32.totalorder %v4664_v11, %v5340_v46  ;;  %618 = vperm.xlu1 %4401, %v5101_v61   ;;  %v5454_v46 = vld [vmem:[%s8363_s0 + $0xc0] sm:$0xff]  ;;  %v168_v21 = vld [vmem:[#allocation2 + $0x368] sm:$0xff] }
 0x142   :  { %vm1613_vm0 = vmor %vm1005_vm3, %vm1357_vm7  ;;  %vm399_vm7 = vcmp.eq.s32.totalorder %v4664_v11, %v4642_v52  ;;  %4402 = vset.pattern.permute.xlu2 %v8589_v9  ;;  %3564 = vmatpush.msrb.mxu2 %v168_v21  ;;  %v135_v21 = vld [vmem:[#allocation2 + $0x260] sm:$0xff] }
 0x143   :  { %vm2221_vm11 = vmor %vm1613_vm0, %vm1965_vm13  ;;  %vm756_vm13 = vcmp.eq.s32.totalorder %v4640_v17, %v5256_v15  ;;  %1226 = vperm.xlu2 %4402, %v5101_v61   ;;  %v5463_v52 = vpop.permute.xlu2 %600  ;;  %v184_v61 = vld [vmem:[#allocation2 + $0x3e8] sm:$0xff]  ;;  %3338 = vmatpush.msrb.mxu0 %v136_v14 }
 0x144   :  { %4126 = vmatmul.msk.f32.gmra.mxu1 %vm2221_vm11, %v8596_v43  ;;  %vm1006_vm10 = vmor %vm398_vm4, %vm750_vm15  ;;  %vm1364_vm15 = vcmp.eq.s32.totalorder %v4640_v17, %v5377_v31  ;;  %vm1972_vm11 = vcmp.eq.s32.totalorder %v4640_v17, %v5293_v51  ;;  %8606 = vst [vmem:[#allocation36_spill] sm:$0xff] %v5463_v52  ;;  %3677 = vmatpush.msrb.mxu3 %v184_v61  ;;  %v5533_v61 = vld [vmem:[%s8363_s0 + $0xd0] sm:$0xff] }
 0x145   :  { %vm1614_vm1 = vmor %vm1006_vm10, %vm1358_vm12  ;;  %vm404_vm12 = vcmp.eq.s32.totalorder %v4640_v17, %v4611_v23  ;;  %3565 = vmatpush.msrb.mxu2 %v167_v45  ;;  %3339 = vmatpush.msrb.mxu0 %v135_v21 }
 0x146   :  { %vm2222_vm9 = vmor %vm1614_vm1, %vm1966_vm14  ;;  %vm757_vm14 = vcmp.eq.s32.totalorder %v4649_v55, %v5256_v15  ;;  %3678 = vmatpush.msrb.mxu3 %v183_v37  ;;  %627 = vperm.xlu0 %4412, %v5533_v61   ;;  %v166_v37 = vld [vmem:[#allocation2 + $0x358] sm:$0xff] }
 0x147   :  { %4158 = vmatmul.msk.f32.gmra.mxu2 %vm2222_vm9, %v8596_v43  ;;  %vm1007_vm8 = vmor %vm399_vm7, %vm751_vm2  ;;  %vm1365_vm2 = vcmp.eq.s32.totalorder %v4649_v55, %v5377_v31  ;;  %vm1973_vm9 = vcmp.eq.s32.totalorder %v4649_v55, %v5293_v51  ;;  %v5449_v34 = vpop.permute.xlu1 %1810 }
 0x148   :  { %vm1615_vm3 = vmor %vm1007_vm8, %vm1359_vm6  ;;  %vm405_vm6 = vcmp.eq.s32.totalorder %v4649_v55, %v4611_v23  ;;  %8605 = vst [vmem:[#allocation35_spill] sm:$0xff] %v5449_v34  ;;  %3566 = vmatpush.msrb.mxu2 %v166_v37  ;;  %v5604_v37 = vld [vmem:[%s8363_s0 + $0xd8] sm:$0xff] }
 0x149   :  { %vm2223_vm0 = vmor %vm1615_vm3, %vm1967_vm5  ;;  %vm758_vm5 = vcmp.eq.s32.totalorder %v4656_v58, %v5256_v15  ;;  %4404 = vset.pattern.permute.xlu1 %v8592_v60 }
 0x14a   :  { %4190 = vmatmul.msk.f32.gmra.mxu3 %vm2223_vm0, %v8596_v43  ;;  %vm1012_vm4 = vmor %vm404_vm12, %vm756_vm13  ;;  %vm1366_vm13 = vcmp.eq.s32.totalorder %v4656_v58, %v5377_v31  ;;  %vm1974_vm0 = vcmp.eq.s32.totalorder %v4656_v58, %v5293_v51  ;;  %269 = vperm.xlu1 %4404, %v5454_v46  }
 0x14b   :  { %vm1620_vm10 = vmor %vm1012_vm4, %vm1364_vm15  ;;  %vm406_vm15 = vcmp.eq.s32.totalorder %v4656_v58, %v4611_v23  ;;  %4405 = vset.pattern.permute.xlu2 %v8601_v63 }
 0x14c   :  { %vm2228_vm1 = vmor %vm1620_vm10, %vm1972_vm11  ;;  %vm759_vm11 = vcmp.eq.s32.totalorder %v4664_v11, %v5256_v15  ;;  %621 = vperm.xlu2 %4405, %v5454_v46   ;;  %v5518_v45 = vpop.permute.xlu2 %251 }
 0x14d   :  { %4095 = vmatmul.msk.f32.gmra.mxu0 %vm2228_vm1, %v8596_v43  ;;  %vm1013_vm7 = vmor %vm405_vm6, %vm757_vm14  ;;  %vm1367_vm14 = vcmp.eq.s32.totalorder %v4664_v11, %v5377_v31  ;;  %vm1975_vm1 = vcmp.eq.s32.totalorder %v4664_v11, %v5293_v51  ;;  %8608 = vst [vmem:[#allocation38_spill] sm:$0xff] %v5518_v45  ;;  %v151_v51 = vld [vmem:[#allocation2 + $0x2e0] sm:$0xff] }
 0x14e   :  { %vm1621_vm8 = vmor %vm1013_vm7, %vm1365_vm2  ;;  %vm407_vm2 = vcmp.eq.s32.totalorder %v4664_v11, %v4611_v23  ;;  %vm764_vm7 = vcmp.eq.s32.totalorder %v4640_v17, %v5414_v56  ;;  %3452 = vmatpush.msrb.mxu1 %v151_v51  ;;  %4417 = vset.pattern.permute.xlu0 %v8589_v9 }
 0x14f   :  { %vm2229_vm3 = vmor %vm1621_vm8, %vm1973_vm9  ;;  %vm412_vm9 = vcmp.eq.s32.totalorder %v4640_v17, %v5175_v36  ;;  %vm1372_vm8 = vcmp.eq.s32.totalorder %v4640_v17, %v5336_v3  ;;  %1238 = vperm.xlu0 %4417, %v5604_v37  }
 0x150   :  { %4127 = vmatmul.msk.f32.gmra.mxu1 %vm2229_vm3, %v8596_v43  ;;  %vm1014_vm12 = vmor %vm406_vm15, %vm758_vm5  ;;  %vm1980_vm3 = vcmp.eq.s32.totalorder %v4640_v17, %v5449_v34  ;;  %v5504_v14 = vpop.permute.xlu1 %1205 }
 0x151   :  { %vm1622_vm4 = vmor %vm1014_vm12, %vm1366_vm13  ;;  %8607 = vst [vmem:[#allocation37_spill] sm:$0xff] %v5504_v14  ;;  %vm765_vm12 = vcmp.eq.s32.totalorder %v4649_v55, %v5414_v56 }
 0x152   :  { %vm2230_vm10 = vmor %vm1622_vm4, %vm1974_vm0  ;;  %vm413_vm0 = vcmp.eq.s32.totalorder %v4649_v55, %v5175_v36  ;;  %vm1373_vm4 = vcmp.eq.s32.totalorder %v4649_v55, %v5336_v3  ;;  %4406 = vset.pattern.permute.xlu1 %v8589_v9 }
 0x153   :  { %4159 = vmatmul.msk.f32.gmra.mxu2 %vm2230_vm10, %v8596_v43  ;;  %vm1015_vm6 = vmor %vm407_vm2, %vm759_vm11  ;;  %vm1981_vm10 = vcmp.eq.s32.totalorder %v4649_v55, %v5449_v34  ;;  %1229 = vperm.xlu1 %4406, %v5454_v46  }
 0x154   :  { %vm1623_vm5 = vmor %vm1015_vm6, %vm1367_vm14  ;;  %vm766_vm6 = vcmp.eq.s32.totalorder %v4656_v58, %v5414_v56  ;;  %4407 = vset.pattern.permute.xlu2 %v8591_v29 }
 0x155   :  { %vm2231_vm13 = vmor %vm1623_vm5, %vm1975_vm1  ;;  %vm414_vm1 = vcmp.eq.s32.totalorder %v4656_v58, %v5175_v36  ;;  %1837 = vperm.xlu2 %4407, %v5454_v46   ;;  %v5568_v51 = vpop.permute.xlu2 %1211  ;;  %v5574_v46 = vpop.permute.xlu0 %1208 }
 0x156   :  { %4191 = vmatmul.msk.f32.gmra.mxu3 %vm2231_vm13, %v8596_v43  ;;  %vm1020_vm15 = vmor %vm412_vm9, %vm764_vm7  ;;  %vm1374_vm7 = vcmp.eq.s32.totalorder %v4656_v58, %v5336_v3  ;;  %8610 = vst [vmem:[#allocation40_spill] sm:$0xff] %v5568_v51 }
 0x157   :  { %vm1628_vm11 = vmor %vm1020_vm15, %vm1372_vm8  ;;  %vm1982_vm8 = vcmp.eq.s32.totalorder %v4656_v58, %v5449_v34  ;;  %vm767_vm15 = vcmp.eq.s32.totalorder %v4664_v11, %v5414_v56  ;;  %8611 = vst [vmem:[#allocation41_spill] sm:$0xff] %v5574_v46  ;;  %v182_v56 = vld [vmem:[#allocation2 + $0x3d8] sm:$0xff]  ;;  %4422 = vset.pattern.permute.xlu0 %v8591_v29 }
 0x158   :  { %vm2236_vm14 = vmor %vm1628_vm11, %vm1980_vm3  ;;  %vm415_vm3 = vcmp.eq.s32.totalorder %v4664_v11, %v5175_v36  ;;  %v150_v36 = vld [vmem:[#allocation2 + $0x2d8] sm:$0xff]  ;;  %3679 = vmatpush.msrb.mxu3 %v182_v56  ;;  %v133_v56 = vld [vmem:[#allocation2 + $0x250] sm:$0xff] }
 0x159   :  { %4096 = vmatmul.msk.f32.gmra.mxu0 %vm2236_vm14, %v8596_v43  ;;  %vm1021_vm2 = vmor %vm413_vm0, %vm765_vm12  ;;  %vm1375_vm12 = vcmp.eq.s32.totalorder %v4664_v11, %v5336_v3  ;;  %v5549_v21 = vpop.permute.xlu1 %248  ;;  %3453 = vmatpush.msrb.mxu1 %v150_v36  ;;  %v165_v36 = vld [vmem:[#allocation2 + $0x350] sm:$0xff] }
 0x15a   :  { %vm1629_vm9 = vmor %vm1021_vm2, %vm1373_vm4  ;;  %vm1983_vm4 = vcmp.eq.s32.totalorder %v4664_v11, %v5449_v34  ;;  %8609 = vst [vmem:[#allocation39_spill] sm:$0xff] %v5549_v21  ;;  %vm772_vm2 = vcmp.eq.s32.totalorder %v4640_v17, %v5281_v0  ;;  %v134_v34 = vld [vmem:[#allocation2 + $0x258] sm:$0xff]  ;;  %3567 = vmatpush.msrb.mxu2 %v165_v36 }
 0x15b   :  { %vm2237_vm5 = vmor %vm1629_vm9, %vm1981_vm10  ;;  %vm420_vm10 = vcmp.eq.s32.totalorder %v4640_v17, %v5379_v10  ;;  %4408 = vset.pattern.permute.xlu1 %v8601_v63  ;;  %3340 = vmatpush.msrb.mxu0 %v134_v34 }
 0x15c   :  { %4128 = vmatmul.msk.f32.gmra.mxu1 %vm2237_vm5, %v8596_v43  ;;  %vm1022_vm13 = vmor %vm414_vm1, %vm766_vm6  ;;  %vm1380_vm6 = vcmp.eq.s32.totalorder %v4640_v17, %v5504_v14  ;;  %624 = vperm.xlu1 %4408, %v5479_v48  }
 0x15d   :  { %vm1630_vm0 = vmor %vm1022_vm13, %vm1374_vm7  ;;  %vm1988_vm7 = vcmp.eq.s32.totalorder %v4640_v17, %v5420_v33  ;;  %vm773_vm13 = vcmp.eq.s32.totalorder %v4649_v55, %v5281_v0  ;;  %4409 = vset.pattern.permute.xlu2 %v8589_v9  ;;  %v5619_v34 = vpop.permute.xlu0 %1223  ;;  %3341 = vmatpush.msrb.mxu0 %v133_v56  ;;  %v164_v56 = vld [vmem:[#allocation2 + $0x348] sm:$0xff] }
 0x15e   :  { %vm2238_vm11 = vmor %vm1630_vm0, %vm1982_vm8  ;;  %vm421_vm8 = vcmp.eq.s32.totalorder %v4649_v55, %v5379_v10  ;;  %1232 = vperm.xlu2 %4409, %v5479_v48   ;;  %8613 = vst [vmem:[#allocation43_spill] sm:$0xff] %v5619_v34  ;;  %3568 = vmatpush.msrb.mxu2 %v164_v56  ;;  %v163_v56 = vld [vmem:[#allocation2 + $0x340] sm:$0xff] }
 0x15f   :  { %4160 = vmatmul.msk.f32.gmra.mxu2 %vm2238_vm11, %v8596_v43  ;;  %vm1023_vm14 = vmor %vm415_vm3, %vm767_vm15  ;;  %vm1381_vm15 = vcmp.eq.s32.totalorder %v4649_v55, %v5504_v14 }
 0x160   :  { %vm1631_vm1 = vmor %vm1023_vm14, %vm1375_vm12  ;;  %vm1989_vm12 = vcmp.eq.s32.totalorder %v4649_v55, %v5420_v33  ;;  %vm774_vm14 = vcmp.eq.s32.totalorder %v4656_v58, %v5281_v0  ;;  %3569 = vmatpush.msrb.mxu2 %v163_v56 }
 0x161   :  { %vm2239_vm9 = vmor %vm1631_vm1, %vm1983_vm4  ;;  %vm422_vm4 = vcmp.eq.s32.totalorder %v4656_v58, %v5379_v10 }
 0x162   :  { %4192 = vmatmul.msk.f32.gmra.mxu3 %vm2239_vm9, %v8596_v43  ;;  %vm1028_vm5 = vmor %vm420_vm10, %vm772_vm2  ;;  %vm1382_vm2 = vcmp.eq.s32.totalorder %v4656_v58, %v5504_v14  ;;  %v5587_v3 = vpop.permute.xlu1 %1816 }
 0x163   :  { %vm1636_vm3 = vmor %vm1028_vm5, %vm1380_vm6  ;;  %vm1990_vm6 = vcmp.eq.s32.totalorder %v4656_v58, %v5420_v33  ;;  %8612 = vst [vmem:[#allocation42_spill] sm:$0xff] %v5587_v3  ;;  %vm775_vm5 = vcmp.eq.s32.totalorder %v4664_v11, %v5281_v0  ;;  %v149_v0 = vld [vmem:[#allocation2 + $0x2d0] sm:$0xff] }
 0x164   :  { %vm2244_vm0 = vmor %vm1636_vm3, %vm1988_vm7  ;;  %vm423_vm7 = vcmp.eq.s32.totalorder %v4664_v11, %v5379_v10  ;;  %4410 = vset.pattern.permute.xlu1 %v8591_v29  ;;  %3454 = vmatpush.msrb.mxu1 %v149_v0 }
 0x165   :  { %4097 = vmatmul.msk.f32.gmra.mxu0 %vm2244_vm0, %v8596_v43  ;;  %vm1029_vm11 = vmor %vm421_vm8, %vm773_vm13  ;;  %vm1383_vm13 = vcmp.eq.s32.totalorder %v4664_v11, %v5504_v14  ;;  %1840 = vperm.xlu1 %4410, %v5479_v48   ;;  %v181_v14 = vld [vmem:[#allocation2 + $0x3d0] sm:$0xff]  ;;  %v5659_v10 = vpop.permute.xlu0 %1819 }
 0x166   :  { %vm1637_vm10 = vmor %vm1029_vm11, %vm1381_vm15  ;;  %vm1991_vm15 = vcmp.eq.s32.totalorder %v4664_v11, %v5420_v33  ;;  %vm780_vm11 = vcmp.eq.s32.totalorder %v4640_v17, %v5463_v52  ;;  %v5621_v33 = vpop.permute.xlu2 %606  ;;  %4411 = vset.pattern.permute.xlu2 %v8592_v60  ;;  %3680 = vmatpush.msrb.mxu3 %v181_v14  ;;  %8616 = vst [vmem:[#allocation46_spill] sm:$0xff] %v5659_v10 }
 0x167   :  { %vm2245_vm1 = vmor %vm1637_vm10, %vm1989_vm12  ;;  %vm428_vm12 = vcmp.eq.s32.totalorder %v4640_v17, %v5549_v21  ;;  %8614 = vst [vmem:[#allocation44_spill] sm:$0xff] %v5621_v33  ;;  %275 = vperm.xlu2 %4411, %v5533_v61  }
 0x168   :  { %4129 = vmatmul.msk.f32.gmra.mxu1 %vm2245_vm1, %v8596_v43  ;;  %vm1030_vm9 = vmor %vm422_vm4, %vm774_vm14  ;;  %vm1388_vm14 = vcmp.eq.s32.totalorder %v4640_v17, %v5574_v46 }
 0x169   :  { %vm1638_vm8 = vmor %vm1030_vm9, %vm1382_vm2  ;;  %vm1996_vm2 = vcmp.eq.s32.totalorder %v4640_v17, %v5587_v3  ;;  %vm781_vm9 = vcmp.eq.s32.totalorder %v4649_v55, %v5463_v52 }
 0x16a   :  { %vm2246_vm3 = vmor %vm1638_vm8, %vm1990_vm6  ;;  %vm429_vm6 = vcmp.eq.s32.totalorder %v4649_v55, %v5549_v21 }
 0x16b   :  { %4161 = vmatmul.msk.f32.gmra.mxu2 %vm2246_vm3, %v8596_v43  ;;  %vm1031_vm0 = vmor %vm423_vm7, %vm775_vm5  ;;  %vm1389_vm5 = vcmp.eq.s32.totalorder %v4649_v55, %v5574_v46  ;;  %v5636_v48 = vpop.permute.xlu1 %603 }
 0x16c   :  { %vm1639_vm4 = vmor %vm1031_vm0, %vm1383_vm13  ;;  %vm1997_vm13 = vcmp.eq.s32.totalorder %v4649_v55, %v5587_v3  ;;  %8615 = vst [vmem:[#allocation45_spill] sm:$0xff] %v5636_v48  ;;  %vm782_vm0 = vcmp.eq.s32.totalorder %v4656_v58, %v5463_v52 }
 0x16d   :  { %vm2247_vm10 = vmor %vm1639_vm4, %vm1991_vm15  ;;  %vm430_vm15 = vcmp.eq.s32.totalorder %v4656_v58, %v5549_v21  ;;  %4413 = vset.pattern.permute.xlu1 %v8589_v9 }
 0x16e   :  { %4193 = vmatmul.msk.f32.gmra.mxu3 %vm2247_vm10, %v8596_v43  ;;  %vm1036_vm1 = vmor %vm428_vm12, %vm780_vm11  ;;  %vm1390_vm11 = vcmp.eq.s32.totalorder %v4656_v58, %v5574_v46  ;;  %1235 = vperm.xlu1 %4413, %v5533_v61   ;;  %v5661_v23 = vpop.permute.xlu2 %1822 }
 0x16f   :  { %vm1644_vm7 = vmor %vm1036_vm1, %vm1388_vm14  ;;  %vm1998_vm14 = vcmp.eq.s32.totalorder %v4656_v58, %v5587_v3  ;;  %vm783_vm1 = vcmp.eq.s32.totalorder %v4664_v11, %v5463_v52  ;;  %8617 = vst [vmem:[#allocation47_spill] sm:$0xff] %v5661_v23  ;;  %v5666_v52 = vld [vmem:[%s8363_s0 + $0xe0] sm:$0xff]  ;;  %4414 = vset.pattern.permute.xlu2 %v8591_v29 }
 0x170   :  { %vm2252_vm8 = vmor %vm1644_vm7, %vm1996_vm2  ;;  %vm431_vm2 = vcmp.eq.s32.totalorder %v4664_v11, %v5549_v21  ;;  %1849 = vperm.xlu0 %4422, %v5666_v52   ;;  %1843 = vperm.xlu2 %4414, %v5533_v61   ;;  %v5719_v61 = vpop.permute.xlu0 %1834  ;;  %v175_v21 = vld [vmem:[#allocation2 + $0x3a0] sm:$0xff] }
 0x171   :  { %4098 = vmatmul.msk.f32.gmra.mxu0 %vm2252_vm8, %v8596_v43  ;;  %vm1037_vm3 = vmor %vm429_vm6, %vm781_vm9  ;;  %vm1391_vm9 = vcmp.eq.s32.totalorder %v4664_v11, %v5574_v46  ;;  %8620 = vst [vmem:[#allocation50_spill] sm:$0xff] %v5719_v61 }
 0x172   :  { %vm1645_vm12 = vmor %vm1037_vm3, %vm1389_vm5  ;;  %vm1999_vm5 = vcmp.eq.s32.totalorder %v4664_v11, %v5587_v3  ;;  %v148_v3 = vld [vmem:[#allocation2 + $0x2c8] sm:$0xff] }
 0x173   :  { %vm2253_vm4 = vmor %vm1645_vm12, %vm1997_vm13  ;;  %vm788_vm13 = vcmp.eq.s32.totalorder %v4640_v17, %v5636_v48  ;;  %vm436_vm12 = vcmp.eq.s32.totalorder %v4640_v17, %v5518_v45  ;;  %3455 = vmatpush.msrb.mxu1 %v148_v3 }
 0x174   :  { %4130 = vmatmul.msk.f32.gmra.mxu1 %vm2253_vm4, %v8596_v43  ;;  %vm1038_vm10 = vmor %vm430_vm15, %vm782_vm0  ;;  %vm1396_vm15 = vcmp.eq.s32.totalorder %v4640_v17, %v5568_v51  ;;  %v5687_v0 = vpop.permute.xlu1 %254 }
 0x175   :  { %vm1646_vm6 = vmor %vm1038_vm10, %vm1390_vm11  ;;  %vm2004_vm11 = vcmp.eq.s32.totalorder %v4640_v17, %v5659_v10  ;;  %8618 = vst [vmem:[#allocation48_spill] sm:$0xff] %v5687_v0 }
 0x176   :  { %vm2254_vm7 = vmor %vm1646_vm6, %vm1998_vm14  ;;  %vm789_vm14 = vcmp.eq.s32.totalorder %v4649_v55, %v5636_v48  ;;  %4415 = vset.pattern.permute.xlu1 %v8592_v60  ;;  %vm437_vm6 = vcmp.eq.s32.totalorder %v4649_v55, %v5518_v45  ;;  %v5710_v14 = vpop.permute.xlu2 %1217 }
 0x177   :  { %4162 = vmatmul.msk.f32.gmra.mxu2 %vm2254_vm7, %v8596_v43  ;;  %vm1039_vm8 = vmor %vm431_vm2, %vm783_vm1  ;;  %vm1397_vm2 = vcmp.eq.s32.totalorder %v4649_v55, %v5568_v51  ;;  %278 = vperm.xlu1 %4415, %v5604_v37   ;;  %8619 = vst [vmem:[#allocation49_spill] sm:$0xff] %v5710_v14 }
 0x178   :  { %vm1647_vm3 = vmor %vm1039_vm8, %vm1391_vm9  ;;  %vm2005_vm9 = vcmp.eq.s32.totalorder %v4649_v55, %v5659_v10  ;;  %4427 = vset.pattern.permute.xlu0 %v8592_v60  ;;  %4416 = vset.pattern.permute.xlu2 %v8601_v63 }
 0x179   :  { %vm2255_vm0 = vmor %vm1647_vm3, %vm1999_vm5  ;;  %vm790_vm5 = vcmp.eq.s32.totalorder %v4656_v58, %v5636_v48  ;;  %630 = vperm.xlu2 %4416, %v5604_v37  }
 0x17a   :  { %4194 = vmatmul.msk.f32.gmra.mxu3 %vm2255_vm0, %v8596_v43  ;;  %vm1044_vm4 = vmor %vm436_vm12, %vm788_vm13  ;;  %vm1398_vm13 = vcmp.eq.s32.totalorder %v4656_v58, %v5568_v51  ;;  %vm2006_vm0 = vcmp.eq.s32.totalorder %v4656_v58, %v5659_v10 }
 0x17b   :  { %vm1652_vm10 = vmor %vm1044_vm4, %vm1396_vm15  ;;  %vm438_vm15 = vcmp.eq.s32.totalorder %v4656_v58, %v5518_v45 }
 0x17c   :  { %vm2260_vm1 = vmor %vm1652_vm10, %vm2004_vm11  ;;  %vm791_vm11 = vcmp.eq.s32.totalorder %v4664_v11, %v5636_v48  ;;  %v5763_v48 = vpop.permute.xlu0 %257 }
 0x17d   :  { %4099 = vmatmul.msk.f32.gmra.mxu0 %vm2260_vm1, %v8596_v43  ;;  %vm1045_vm7 = vmor %vm437_vm6, %vm789_vm14  ;;  %vm1399_vm14 = vcmp.eq.s32.totalorder %v4664_v11, %v5568_v51  ;;  %vm2007_vm1 = vcmp.eq.s32.totalorder %v4664_v11, %v5659_v10  ;;  %v5723_v36 = vpop.permute.xlu1 %1214  ;;  %v180_v51 = vld [vmem:[#allocation2 + $0x3c8] sm:$0xff]  ;;  %8624 = vst [vmem:[#allocation54_spill] sm:$0xff] %v5763_v48 }
 0x17e   :  { %vm1653_vm8 = vmor %vm1045_vm7, %vm1397_vm2  ;;  %vm439_vm2 = vcmp.eq.s32.totalorder %v4664_v11, %v5518_v45  ;;  %8621 = vst [vmem:[#allocation51_spill] sm:$0xff] %v5723_v36  ;;  %vm796_vm7 = vcmp.eq.s32.totalorder %v4640_v17, %v5621_v33  ;;  %v132_v45 = vld [vmem:[#allocation2 + $0x248] sm:$0xff]  ;;  %3681 = vmatpush.msrb.mxu3 %v180_v51 }
 0x17f   :  { %vm2261_vm3 = vmor %vm1653_vm8, %vm2005_vm9  ;;  %vm444_vm9 = vcmp.eq.s32.totalorder %v4640_v17, %v5687_v0  ;;  %4418 = vset.pattern.permute.xlu1 %v8591_v29  ;;  %vm1404_vm8 = vcmp.eq.s32.totalorder %v4640_v17, %v5723_v36  ;;  %3342 = vmatpush.msrb.mxu0 %v132_v45  ;;  %v5799_v51 = vld [vmem:[%s8363_s0 + $0xe8] sm:$0xff] }
 0x180   :  { %4131 = vmatmul.msk.f32.gmra.mxu1 %vm2261_vm3, %v8596_v43  ;;  %vm1046_vm12 = vmor %vm438_vm15, %vm790_vm5  ;;  %1846 = vperm.xlu1 %4418, %v5604_v37   ;;  %vm2012_vm3 = vcmp.eq.s32.totalorder %v4640_v17, %v5661_v23  ;;  %v5749_v37 = vpop.permute.xlu2 %260 }
 0x181   :  { %vm1654_vm4 = vmor %vm1046_vm12, %vm1398_vm13  ;;  %vm797_vm12 = vcmp.eq.s32.totalorder %v4649_v55, %v5621_v33  ;;  %8622 = vst [vmem:[#allocation52_spill] sm:$0xff] %v5749_v37  ;;  %4419 = vset.pattern.permute.xlu2 %v8592_v60 }
 0x182   :  { %vm2262_vm10 = vmor %vm1654_vm4, %vm2006_vm0  ;;  %vm445_vm0 = vcmp.eq.s32.totalorder %v4649_v55, %v5687_v0  ;;  %vm1405_vm4 = vcmp.eq.s32.totalorder %v4649_v55, %v5723_v36  ;;  %281 = vperm.xlu2 %4419, %v5666_v52  }
 0x183   :  { %4163 = vmatmul.msk.f32.gmra.mxu2 %vm2262_vm10, %v8596_v43  ;;  %vm1047_vm6 = vmor %vm439_vm2, %vm791_vm11  ;;  %vm2013_vm10 = vcmp.eq.s32.totalorder %v4649_v55, %v5661_v23 }
 0x184   :  { %vm1655_vm5 = vmor %vm1047_vm6, %vm1399_vm14  ;;  %vm798_vm6 = vcmp.eq.s32.totalorder %v4656_v58, %v5621_v33 }
 0x185   :  { %vm2263_vm13 = vmor %vm1655_vm5, %vm2007_vm1  ;;  %vm446_vm1 = vcmp.eq.s32.totalorder %v4656_v58, %v5687_v0 }
 0x186   :  { %4195 = vmatmul.msk.f32.gmra.mxu3 %vm2263_vm13, %v8596_v43  ;;  %vm1052_vm15 = vmor %vm444_vm9, %vm796_vm7  ;;  %vm1406_vm7 = vcmp.eq.s32.totalorder %v4656_v58, %v5723_v36  ;;  %v5756_v10 = vpop.permute.xlu1 %609 }
 0x187   :  { %vm1660_vm11 = vmor %vm1052_vm15, %vm1404_vm8  ;;  %vm2014_vm8 = vcmp.eq.s32.totalorder %v4656_v58, %v5661_v23  ;;  %8623 = vst [vmem:[#allocation53_spill] sm:$0xff] %v5756_v10  ;;  %vm799_vm15 = vcmp.eq.s32.totalorder %v4664_v11, %v5621_v33  ;;  %v179_v33 = vld [vmem:[#allocation2 + $0x3c0] sm:$0xff] }
 0x188   :  { %vm2268_vm14 = vmor %vm1660_vm11, %vm2012_vm3  ;;  %vm447_vm3 = vcmp.eq.s32.totalorder %v4664_v11, %v5687_v0  ;;  %4420 = vset.pattern.permute.xlu1 %v8601_v63  ;;  %v5792_v3 = vpop.permute.xlu2 %1828  ;;  %v147_v0 = vld [vmem:[#allocation2 + $0x2c0] sm:$0xff]  ;;  %3682 = vmatpush.msrb.mxu3 %v179_v33  ;;  %v5868_v33 = vld [vmem:[%s8363_s0 + $0xf8] sm:$0xff] }
 0x189   :  { %4100 = vmatmul.msk.f32.gmra.mxu0 %vm2268_vm14, %v8596_v43  ;;  %vm1053_vm2 = vmor %vm445_vm0, %vm797_vm12  ;;  %vm1407_vm12 = vcmp.eq.s32.totalorder %v4664_v11, %v5723_v36  ;;  %633 = vperm.xlu1 %4420, %v5666_v52   ;;  %8625 = vst [vmem:[#allocation55_spill] sm:$0xff] %v5792_v3  ;;  %v131_v36 = vld [vmem:[#allocation2 + $0x240] sm:$0xff] }
 0x18a   :  { %vm1661_vm9 = vmor %vm1053_vm2, %vm1405_vm4  ;;  %vm2015_vm4 = vcmp.eq.s32.totalorder %v4664_v11, %v5661_v23  ;;  %vm804_vm2 = vcmp.eq.s32.totalorder %v4640_v17, %v5756_v10  ;;  %v5819_v23 = vld [vmem:[%s8363_s0 + $0xf0] sm:$0xff]  ;;  %4421 = vset.pattern.permute.xlu2 %v8589_v9  ;;  %3343 = vmatpush.msrb.mxu0 %v131_v36 }
 0x18b   :  { %vm2269_vm5 = vmor %vm1661_vm9, %vm2013_vm10  ;;  %vm452_vm10 = vcmp.eq.s32.totalorder %v4640_v17, %v5763_v48  ;;  %1241 = vperm.xlu2 %4421, %v5666_v52   ;;  %287 = vperm.xlu0 %4427, %v5819_v23  }
 0x18c   :  { %4132 = vmatmul.msk.f32.gmra.mxu1 %vm2269_vm5, %v8596_v43  ;;  %vm1054_vm13 = vmor %vm446_vm1, %vm798_vm6  ;;  %vm1412_vm6 = vcmp.eq.s32.totalorder %v4640_v17, %v5710_v14  ;;  %vm805_vm5 = vcmp.eq.s32.totalorder %v4649_v55, %v5756_v10 }
 0x18d   :  { %vm1662_vm0 = vmor %vm1054_vm13, %vm1406_vm7  ;;  %vm453_vm7 = vcmp.eq.s32.totalorder %v4649_v55, %v5763_v48  ;;  %vm1413_vm13 = vcmp.eq.s32.totalorder %v4649_v55, %v5710_v14  ;;  %3456 = vmatpush.msrb.mxu1 %v147_v0 }
 0x18e   :  { %vm2270_vm11 = vmor %vm1662_vm0, %vm2014_vm8 }
 0x18f   :  { %4164 = vmatmul.msk.f32.gmra.mxu2 %vm2270_vm11, %v8596_v43  ;;  %vm1055_vm14 = vmor %vm447_vm3, %vm799_vm15  ;;  %v5794_v45 = vpop.permute.xlu1 %1825 }
 0x190   :  { %vm1663_vm1 = vmor %vm1055_vm14, %vm1407_vm12  ;;  %8626 = vst [vmem:[#allocation56_spill] sm:$0xff] %v5794_v45  ;;  %vm2020_vm0 = vcmp.eq.s32.totalorder %v4640_v17, %v5794_v45  ;;  %vm2021_vm11 = vcmp.eq.s32.totalorder %v4649_v55, %v5794_v45  ;;  %vm806_vm14 = vcmp.eq.s32.totalorder %v4656_v58, %v5756_v10  ;;  %v5842_v52 = vpop.permute.xlu2 %615 }
 0x191   :  { %vm2271_vm9 = vmor %vm1663_vm1, %vm2015_vm4  ;;  %vm454_vm4 = vcmp.eq.s32.totalorder %v4656_v58, %v5763_v48  ;;  %4423 = vset.pattern.permute.xlu1 %v8592_v60  ;;  %8627 = vst [vmem:[#allocation57_spill] sm:$0xff] %v5842_v52 }
 0x192   :  { %4196 = vmatmul.msk.f32.gmra.mxu3 %vm2271_vm9, %v8596_v43  ;;  %vm1060_vm8 = vmor %vm452_vm10, %vm804_vm2  ;;  %vm1414_vm2 = vcmp.eq.s32.totalorder %v4656_v58, %v5710_v14  ;;  %284 = vperm.xlu1 %4423, %v5799_v51  }
 0x193   :  { %vm1668_vm3 = vmor %vm1060_vm8, %vm1412_vm6  ;;  %vm2022_vm6 = vcmp.eq.s32.totalorder %v4656_v58, %v5794_v45  ;;  %4424 = vset.pattern.permute.xlu2 %v8601_v63  ;;  %4432 = vset.pattern.permute.xlu0 %v8601_v63 }
 0x194   :  { %vm1061_vm15 = vmor %vm453_vm7, %vm805_vm5  ;;  %vm455_vm7 = vcmp.eq.s32.totalorder %v4664_v11, %v5763_v48  ;;  %vm807_vm5 = vcmp.eq.s32.totalorder %v4664_v11, %v5756_v10  ;;  %636 = vperm.xlu2 %4424, %v5799_v51   ;;  %642 = vperm.xlu0 %4432, %v5868_v33   ;;  %v144_v10 = vld [vmem:[#allocation2 + $0x2a8] sm:$0xff]  ;;  %v159_v48 = vld [vmem:[#allocation2 + $0x320] sm:$0xff] }
 0x195   :  { %vm1669_vm12 = vmor %vm1061_vm15, %vm1413_vm13  ;;  %vm1415_vm13 = vcmp.eq.s32.totalorder %v4664_v11, %v5710_v14  ;;  %vm2023_vm15 = vcmp.eq.s32.totalorder %v4664_v11, %v5794_v45  ;;  %v178_v14 = vld [vmem:[#allocation2 + $0x3b8] sm:$0xff] }
 0x196   :  { %vm2276_vm10 = vmor %vm1668_vm3, %vm2020_vm0  ;;  %3683 = vmatpush.msrb.mxu3 %v178_v14  ;;  %v5960_v14 = vpop.f32.mrf.mxu0 }
 0x197   :  { %4101 = vmatmul.msk.f32.gmra.mxu0 %vm2276_vm10, %v8596_v43  ;;  %vm2277_vm1 = vmor %vm1669_vm12, %vm2021_vm11  ;;  %vm460_vm12 = vcmp.eq.s32.totalorder %v4640_v17, %v5749_v37  ;;  %vm812_vm11 = vcmp.eq.s32.totalorder %v4640_v17, %v5329_v40  ;;  %vm813_vm10 = vcmp.eq.s32.totalorder %v4649_v55, %v5329_v40 }
 0x198   :  { %4133 = vmatmul.msk.f32.gmra.mxu1 %vm2277_vm1, %v8596_v43  ;;  %vm1062_vm9 = vmor %vm454_vm4, %vm806_vm14  ;;  %vm461_vm14 = vcmp.eq.s32.totalorder %v4649_v55, %v5749_v37  ;;  %v5845_v56 = vpop.permute.xlu1 %1220  ;;  %v5879_v0 = vpop.permute.xlu2 %266 }
 0x199   :  { %vm1670_vm8 = vmor %vm1062_vm9, %vm1414_vm2  ;;  %8628 = vst [vmem:[#allocation58_spill] sm:$0xff] %v5845_v56  ;;  %vm1420_vm9 = vcmp.eq.s32.totalorder %v4640_v17, %v5845_v56 }
 0x19a   :  { %vm2278_vm3 = vmor %vm1670_vm8, %vm2022_vm6  ;;  %vm2028_vm6 = vcmp.eq.s32.totalorder %v4640_v17, %v5792_v3  ;;  %4425 = vset.pattern.permute.xlu1 %v8589_v9  ;;  %8629 = vst [vmem:[#allocation59_spill] sm:$0xff] %v5879_v0 }
 0x19b   :  { %4165 = vmatmul.msk.f32.gmra.mxu2 %vm2278_vm3, %v8596_v43  ;;  %vm1063_vm0 = vmor %vm455_vm7, %vm807_vm5  ;;  %vm1421_vm5 = vcmp.eq.s32.totalorder %v4649_v55, %v5845_v56  ;;  %1244 = vperm.xlu1 %4425, %v5799_v51  }
 0x19c   :  { %vm1671_vm4 = vmor %vm1063_vm0, %vm1415_vm13  ;;  %vm2029_vm13 = vcmp.eq.s32.totalorder %v4649_v55, %v5792_v3  ;;  %vm814_vm0 = vcmp.eq.s32.totalorder %v4656_v58, %v5329_v40  ;;  %4426 = vset.pattern.permute.xlu2 %v8591_v29  ;;  %4435 = vset.pattern.permute.xlu0 %v8591_v29 }
 0x19d   :  { %vm2279_vm2 = vmor %vm1671_vm4, %vm2023_vm15  ;;  %vm462_vm15 = vcmp.eq.s32.totalorder %v4656_v58, %v5749_v37  ;;  %1852 = vperm.xlu2 %4426, %v5799_v51   ;;  %v130_v51 = vld [vmem:[#allocation2 + $0x238] sm:$0xff] }
 0x19e   :  { %4197 = vmatmul.msk.f32.gmra.mxu3 %vm2279_vm2, %v8596_v43  ;;  %vm1068_vm1 = vmor %vm460_vm12, %vm812_vm11  ;;  %vm1422_vm11 = vcmp.eq.s32.totalorder %v4656_v58, %v5845_v56  ;;  %vm463_vm2 = vcmp.eq.s32.totalorder %v4664_v11, %v5749_v37  ;;  %3344 = vmatpush.msrb.mxu0 %v130_v51  ;;  %v177_v51 = vld [vmem:[#allocation2 + $0x3b0] sm:$0xff] }
 0x19f   :  { %vm1069_vm7 = vmor %vm461_vm14, %vm813_vm10  ;;  %vm2030_vm14 = vcmp.eq.s32.totalorder %v4656_v58, %v5792_v3  ;;  %3684 = vmatpush.msrb.mxu3 %v177_v51 }
 0x1a0   :  { %vm1676_vm8 = vmor %vm1068_vm1, %vm1420_vm9  ;;  %vm815_vm1 = vcmp.eq.s32.totalorder %v4664_v11, %v5329_v40  ;;  %vm1423_vm9 = vcmp.eq.s32.totalorder %v4664_v11, %v5845_v56  ;;  %v162_v56 = vld [vmem:[#allocation2 + $0x338] sm:$0xff]  ;;  %v5925_v40 = vpop.permute.xlu2 %1226 }
 0x1a1   :  { %vm2284_vm3 = vmor %vm1676_vm8, %vm2028_vm6  ;;  %v5887_v36 = vpop.permute.xlu1 %263  ;;  %8635 = vst [vmem:[#allocation61_spill] sm:$0xff] %v5925_v40  ;;  %3570 = vmatpush.msrb.mxu2 %v162_v56  ;;  %v146_v56 = vld [vmem:[#allocation2 + $0x2b8] sm:$0xff] }
 0x1a2   :  { %4102 = vmatmul.msk.f32.gmra.mxu0 %vm2284_vm3, %v8596_v43  ;;  %vm1677_vm12 = vmor %vm1069_vm7, %vm1421_vm5  ;;  %vm2031_vm5 = vcmp.eq.s32.totalorder %v4664_v11, %v5792_v3  ;;  %8630 = vst [vmem:[#allocation60_spill] sm:$0xff] %v5887_v36  ;;  %3457 = vmatpush.msrb.mxu1 %v146_v56  ;;  %v145_v56 = vld [vmem:[#allocation2 + $0x2b0] sm:$0xff] }
 0x1a3   :  { %vm2285_vm4 = vmor %vm1677_vm12, %vm2029_vm13  ;;  %vm820_vm13 = vcmp.eq.s32.totalorder %v4640_v17, %v5842_v52  ;;  %4428 = vset.pattern.permute.xlu1 %v8601_v63  ;;  %vm469_vm12 = vcmp.eq.s32.totalorder %v4649_v55, %v5887_v36  ;;  %v129_v63 = vld [vmem:[#allocation2 + $0x230] sm:$0xff] }
 0x1a4   :  { %4134 = vmatmul.msk.f32.gmra.mxu1 %vm2285_vm4, %v8596_v43  ;;  %vm1070_vm10 = vmor %vm462_vm15, %vm814_vm0  ;;  %vm468_vm15 = vcmp.eq.s32.totalorder %v4640_v17, %v5887_v36  ;;  %639 = vperm.xlu1 %4428, %v5819_v23  }
 0x1a5   :  { %vm1678_vm6 = vmor %vm1070_vm10, %vm1422_vm11  ;;  %vm821_vm11 = vcmp.eq.s32.totalorder %v4649_v55, %v5842_v52  ;;  %4429 = vset.pattern.permute.xlu2 %v8589_v9  ;;  %3345 = vmatpush.msrb.mxu0 %v129_v63  ;;  %v6009_v63 = vpop.f32.mrf.mxu2 }
 0x1a6   :  { %vm2286_vm7 = vmor %vm1678_vm6, %vm2030_vm14  ;;  %vm1428_vm14 = vcmp.eq.s32.totalorder %v4640_v17, %v5619_v34  ;;  %1247 = vperm.xlu2 %4429, %v5819_v23   ;;  %3458 = vmatpush.msrb.mxu1 %v145_v56  ;;  %v6017_v56 = vpop.f32.mrf.mxu3 }
 0x1a7   :  { %4166 = vmatmul.msk.f32.gmra.mxu2 %vm2286_vm7, %v8596_v43  ;;  %vm1071_vm8 = vmor %vm463_vm2, %vm815_vm1  ;;  %vm470_vm2 = vcmp.eq.s32.totalorder %v4656_v58, %v5887_v36  ;;  %vm822_vm1 = vcmp.eq.s32.totalorder %v4656_v58, %v5842_v52 }
 0x1a8   :  { %vm1679_vm3 = vmor %vm1071_vm8, %vm1423_vm9  ;;  %vm1429_vm9 = vcmp.eq.s32.totalorder %v4649_v55, %v5619_v34  ;;  %vm823_vm8 = vcmp.eq.s32.totalorder %v4664_v11, %v5842_v52  ;;  %v5966_v45 = vpop.permute.xlu2 %621  ;;  %3459 = vmatpush.msrb.mxu1 %v144_v10 }
 0x1a9   :  { %vm2287_vm0 = vmor %vm1679_vm3, %vm2031_vm5  ;;  %vm471_vm5 = vcmp.eq.s32.totalorder %v4664_v11, %v5887_v36  ;;  %vm1430_vm3 = vcmp.eq.s32.totalorder %v4656_v58, %v5619_v34  ;;  %8640 = vst [vmem:[#allocation64_spill] sm:$0xff] %v5966_v45 }
 0x1aa   :  { %4198 = vmatmul.msk.f32.gmra.mxu3 %vm2287_vm0, %v8596_v43  ;;  %vm1076_vm4 = vmor %vm468_vm15, %vm820_vm13  ;;  %v5927_v37 = vpop.permute.xlu1 %1831 }
 0x1ab   :  { %vm5902_vm10 = vmor %vm1076_vm4, %vm1428_vm14  ;;  %8636 = vst [vmem:[#allocation62_spill] sm:$0xff] %v5927_v37  ;;  %vm2036_vm0 = vcmp.eq.s32.totalorder %v4640_v17, %v5927_v37 }
 0x1ac   :  { %vm1077_vm6 = vmor %vm469_vm12, %vm821_vm11  ;;  %vm2037_vm12 = vcmp.eq.s32.totalorder %v4649_v55, %v5927_v37  ;;  %vm2038_vm11 = vcmp.eq.s32.totalorder %v4656_v58, %v5927_v37  ;;  %4430 = vset.pattern.permute.xlu1 %v8591_v29 }
 0x1ad   :  { %vm5915_vm7 = vmor %vm1077_vm6, %vm1429_vm9  ;;  %1855 = vperm.xlu1 %4430, %v5819_v23   ;;  %vm1431_vm9 = vcmp.eq.s32.totalorder %v4664_v11, %v5619_v34  ;;  %v161_v23 = vld [vmem:[#allocation2 + $0x330] sm:$0xff] }
 0x1ae   :  { %vm1078_vm13 = vmor %vm470_vm2, %vm822_vm1  ;;  %vm2039_vm1 = vcmp.eq.s32.totalorder %v4664_v11, %v5927_v37  ;;  %3571 = vmatpush.msrb.mxu2 %v161_v23  ;;  %4431 = vset.pattern.permute.xlu2 %v8592_v60  ;;  %v6000_v23 = vpop.f32.mrf.mxu0 }
 0x1af   :  { %vm5929_vm15 = vmor %vm1078_vm13, %vm1430_vm3  ;;  %vm2044_vm3 = vcmp.eq.s32.totalorder %v4640_v17, %v5719_v61  ;;  %290 = vperm.xlu2 %4431, %v5868_v33  }
 0x1b0   :  { %vm1079_vm4 = vmor %vm471_vm5, %vm823_vm8  ;;  %vm476_vm8 = vcmp.eq.s32.totalorder %v4640_v17, %v5879_v0  ;;  %v6005_v60 = vpop.permute.xlu2 %1837 }
 0x1b1   :  { %vm2292_vm14 = vmor %vm5902_vm10, %vm2036_vm0  ;;  %8641 = vst [vmem:[#allocation65_spill] sm:$0xff] %v6005_v60 }
 0x1b2   :  { %4103 = vmatmul.msk.f32.gmra.mxu0 %vm2292_vm14, %v8596_v43  ;;  %vm2293_vm2 = vmor %vm5915_vm7, %vm2037_vm12  ;;  %vm1436_vm7 = vcmp.eq.s32.totalorder %v4640_v17, %v5925_v40  ;;  %vm477_vm14 = vcmp.eq.s32.totalorder %v4649_v55, %v5879_v0 }
 0x1b3   :  { %4135 = vmatmul.msk.f32.gmra.mxu1 %vm2293_vm2, %v8596_v43  ;;  %vm2294_vm6 = vmor %vm5929_vm15, %vm2038_vm11  ;;  %v5962_v3 = vpop.permute.xlu1 %618  ;;  %vm1437_vm11 = vcmp.eq.s32.totalorder %v4649_v55, %v5925_v40  ;;  %vm2045_vm2 = vcmp.eq.s32.totalorder %v4649_v55, %v5719_v61 }
 0x1b4   :  { %4167 = vmatmul.msk.f32.gmra.mxu2 %vm2294_vm6, %v8596_v43  ;;  %vm1687_vm10 = vmor %vm1079_vm4, %vm1431_vm9  ;;  %8639 = vst [vmem:[#allocation63_spill] sm:$0xff] %v5962_v3  ;;  %vm828_vm13 = vcmp.eq.s32.totalorder %v4640_v17, %v5962_v3  ;;  %vm829_vm0 = vcmp.eq.s32.totalorder %v4649_v55, %v5962_v3  ;;  %vm830_vm6 = vcmp.eq.s32.totalorder %v4656_v58, %v5962_v3 }
 0x1b5   :  { %vm2295_vm5 = vmor %vm1687_vm10, %vm2039_vm1  ;;  %4433 = vset.pattern.permute.xlu1 %v8589_v9  ;;  %vm1438_vm10 = vcmp.eq.s32.totalorder %v4656_v58, %v5925_v40  ;;  %v5993_v9 = vpop.f32.mrf.mxu1 }
 0x1b6   :  { %4199 = vmatmul.msk.f32.gmra.mxu3 %vm2295_vm5, %v8596_v43  ;;  %vm1084_vm15 = vmor %vm476_vm8, %vm828_vm13  ;;  %1250 = vperm.xlu1 %4433, %v5868_v33   ;;  %vm2046_vm8 = vcmp.eq.s32.totalorder %v4656_v58, %v5719_v61  ;;  %v6032_v34 = vpop.f32.mrf.mxu0 }
 0x1b7   :  { %vm1692_vm12 = vmor %vm1084_vm15, %vm1436_vm7  ;;  %vm478_vm7 = vcmp.eq.s32.totalorder %v4656_v58, %v5879_v0  ;;  %4434 = vset.pattern.permute.xlu2 %v8591_v29  ;;  %8643 = vst [vmem:[#allocation67_spill] sm:$0xff] %v6032_v34  ;;  %v6046_v29 = vpop.f32.mrf.mxu2 }
 0x1b8   :  { %vm2300_vm4 = vmor %vm1692_vm12, %vm2044_vm3  ;;  %vm831_vm3 = vcmp.eq.s32.totalorder %v4664_v11, %v5962_v3  ;;  %1858 = vperm.xlu2 %4434, %v5868_v33   ;;  %v6056_v33 = vpop.f32.mrf.mxu3 }
 0x1b9   :  { %vm1085_vm1 = vmor %vm477_vm14, %vm829_vm0  ;;  %vm1439_vm0 = vcmp.eq.s32.totalorder %v4664_v11, %v5925_v40  ;;  %v128_v40 = vld [vmem:[#allocation2 + $0x228] sm:$0xff]  ;;  %8645 = vst [vmem:[#allocation69_spill] sm:$0xff] %v6056_v33  ;;  %v8754_v33 = vmov 0 }
 0x1ba   :  { %4104 = vmatmul.msk.f32.gmra.mxu0 %vm2300_vm4, %v8596_v43  ;;  %vm1693_vm9 = vmor %vm1085_vm1, %vm1437_vm11  ;;  %vm479_vm11 = vcmp.eq.s32.totalorder %v4664_v11, %v5879_v0  ;;  %vm2047_vm4 = vcmp.eq.s32.totalorder %v4664_v11, %v5719_v61  ;;  %v160_v0 = vld [vmem:[#allocation2 + $0x328] sm:$0xff] }
 0x1bb   :  { %vm2301_vm5 = vmor %vm1693_vm9, %vm2045_vm2  ;;  %vm836_vm9 = vcmp.eq.s32.totalorder %v4640_v17, %v5966_v45  ;;  %3572 = vmatpush.msrb.mxu2 %v160_v0  ;;  %v176_v61 = vld [vmem:[#allocation2 + $0x3a8] sm:$0xff]  ;;  %3346 = vmatpush.msrb.mxu0 %v128_v40  ;;  %v6054_v40 = vpop.permute.xlu2 %1232 }
 0x1bc   :  { %4136 = vmatmul.msk.f32.gmra.mxu1 %vm2301_vm5, %v8596_v43  ;;  %vm1086_vm13 = vmor %vm478_vm7, %vm830_vm6  ;;  %v6015_v51 = vpop.permute.xlu1 %269  ;;  %vm837_vm5 = vcmp.eq.s32.totalorder %v4649_v55, %v5966_v45  ;;  %3685 = vmatpush.msrb.mxu3 %v176_v61  ;;  %8644 = vst [vmem:[#allocation68_spill] sm:$0xff] %v6054_v40 }
 0x1bd   :  { %vm1694_vm15 = vmor %vm1086_vm13, %vm1438_vm10  ;;  %8642 = vst [vmem:[#allocation66_spill] sm:$0xff] %v6015_v51  ;;  %vm484_vm6 = vcmp.eq.s32.totalorder %v4640_v17, %v6015_v51  ;;  %vm485_vm10 = vcmp.eq.s32.totalorder %v4649_v55, %v6015_v51  ;;  %v6030_v3 = vpop.f32.mrf.mxu1  ;;  %vm486_vm7 = vcmp.eq.s32.totalorder %v4656_v58, %v6015_v51  ;;  %3573 = vmatpush.msrb.mxu2 %v159_v48 }
 0x1be   :  { %vm2302_vm12 = vmor %vm1694_vm15, %vm2046_vm8  ;;  %vm838_vm8 = vcmp.eq.s32.totalorder %v4656_v58, %v5966_v45  ;;  %vm839_vm15 = vcmp.eq.s32.totalorder %v4664_v11, %v5966_v45  ;;  %v6094_v36 = vpop.f32.mrf.mxu0  ;;  %3686 = vmatpush.msrb.mxu3 %v175_v21 }
 0x1bf   :  { %4168 = vmatmul.msk.f32.gmra.mxu2 %vm2302_vm12, %v8596_v43  ;;  %vm1087_vm14 = vmor %vm479_vm11, %vm831_vm3  ;;  %vm487_vm3 = vcmp.eq.s32.totalorder %v4664_v11, %v6015_v51  ;;  %vm2052_vm12 = vcmp.eq.s32.totalorder %v4640_v17, %v6005_v60  ;;  %v6081_v51 = vpop.permute.xlu0 %272  ;;  %v6092_v52 = vpop.f32.mrf.mxu2  ;;  %8654 = vst [vmem:[#allocation74_spill] sm:$0xff] %v6094_v36 }
 0x1c0   :  { %vm1695_vm2 = vmor %vm1087_vm14, %vm1439_vm0  ;;  %8651 = vst [vmem:[#allocation71_spill] sm:$0xff] %v6081_v51  ;;  %v6098_v46 = vpop.f32.mrf.mxu3 }
 0x1c1   :  { %vm2303_vm1 = vmor %vm1695_vm2, %vm2047_vm4  ;;  %8653 = vst [vmem:[#allocation73_spill] sm:$0xff] %v6092_v52 }
 0x1c2   :  { %4200 = vmatmul.msk.f32.gmra.mxu3 %vm2303_vm1, %v8596_v43  ;;  %vm1092_vm13 = vmor %vm484_vm6, %vm836_vm9  ;;  %vm2053_vm6 = vcmp.eq.s32.totalorder %v4649_v55, %v6005_v60  ;;  %8655 = vst [vmem:[#allocation75_spill] sm:$0xff] %v6098_v46 }
 0x1c3   :  { %vm1093_vm0 = vmor %vm485_vm10, %vm837_vm5 }
 0x1c4   :  { %vm6062_vm11 = vmor %vm486_vm7, %vm838_vm8  ;;  %vm2054_vm7 = vcmp.eq.s32.totalorder %v4656_v58, %v6005_v60 }
 0x1c5   :  { %v6058_v0 = vpop.permute.xlu1 %1229  ;;  %vm6070_vm2 = vmor %vm487_vm3, %vm839_vm15  ;;  %v6083_v37 = vpop.f32.mrf.mxu1  ;;  %vm2055_vm15 = vcmp.eq.s32.totalorder %v4664_v11, %v6005_v60  ;;  %v127_v60 = vld [vmem:[#allocation2 + $0x220] sm:$0xff] }
 0x1c6   :  { %8646 = vst [vmem:[#allocation70_spill] sm:$0xff] %v6058_v0  ;;  %vm1444_vm4 = vcmp.eq.s32.totalorder %v4640_v17, %v6058_v0  ;;  %vm1445_vm14 = vcmp.eq.s32.totalorder %v4649_v55, %v6058_v0  ;;  %vm1446_vm10 = vcmp.eq.s32.totalorder %v4656_v58, %v6058_v0  ;;  %3347 = vmatpush.msrb.mxu0 %v127_v60  ;;  %v6143_v21 = vpop.f32.mrf.mxu0 }
 0x1c7   :  { %vm1700_vm1 = vmor %vm1092_vm13, %vm1444_vm4  ;;  %8652 = vst [vmem:[#allocation72_spill] sm:$0xff] %v6083_v37  ;;  %vm1447_vm13 = vcmp.eq.s32.totalorder %v4664_v11, %v6058_v0  ;;  %v6105_v0 = vpop.permute.xlu2 %275  ;;  %v6145_v60 = vpop.f32.mrf.mxu2  ;;  %v8745_v37 = vmov 0 }
 0x1c8   :  { %vm2308_vm9 = vmor %vm1700_vm1, %vm2052_vm12  ;;  %vm492_vm12 = vcmp.eq.s32.totalorder %v4640_v17, %v6081_v51  ;;  %8657 = vst [vmem:[#allocation77_spill] sm:$0xff] %v6105_v0  ;;  %vm493_vm1 = vcmp.eq.s32.totalorder %v4649_v55, %v6081_v51  ;;  %v6153_v36 = vpop.f32.mrf.mxu3 }
 0x1c9   :  { %4105 = vmatmul.msk.f32.gmra.mxu0 %vm2308_vm9, %v8596_v43  ;;  %vm1701_vm5 = vmor %vm1093_vm0, %vm1445_vm14  ;;  %vm1452_vm9 = vcmp.eq.s32.totalorder %v4640_v17, %v6054_v40  ;;  %8663 = vst [vmem:[#allocation79_spill] sm:$0xff] %v6143_v21 }
 0x1ca   :  { %vm2309_vm8 = vmor %vm1701_vm5, %vm2053_vm6  ;;  %8664 = vst [vmem:[#allocation80_spill] sm:$0xff] %v6145_v60  ;;  %v142_v60 = vld [vmem:[#allocation2 + $0x298] sm:$0xff] }
 0x1cb   :  { %4137 = vmatmul.msk.f32.gmra.mxu1 %vm2309_vm8, %v8596_v43  ;;  %vm1702_vm3 = vmor %vm6062_vm11, %vm1446_vm10  ;;  %vm494_vm10 = vcmp.eq.s32.totalorder %v4656_v58, %v6081_v51  ;;  %vm1453_vm8 = vcmp.eq.s32.totalorder %v4649_v55, %v6054_v40  ;;  %8668 = vst [vmem:[#allocation82_spill] sm:$0xff] %v6153_v36  ;;  %v143_v36 = vld [vmem:[#allocation2 + $0x2a0] sm:$0xff] }
 0x1cc   :  { %vm2310_vm0 = vmor %vm1702_vm3, %vm2054_vm7  ;;  %vm495_vm3 = vcmp.eq.s32.totalorder %v4664_v11, %v6081_v51  ;;  %3460 = vmatpush.msrb.mxu1 %v143_v36 }
 0x1cd   :  { %4169 = vmatmul.msk.f32.gmra.mxu2 %vm2310_vm0, %v8596_v43  ;;  %vm1703_vm11 = vmor %vm6070_vm2, %vm1447_vm13  ;;  %v6135_v48 = vpop.f32.mrf.mxu1 }
 0x1ce   :  { %v6103_v61 = vpop.permute.xlu1 %624  ;;  %vm2311_vm4 = vmor %vm1703_vm11, %vm2055_vm15  ;;  %8660 = vst [vmem:[#allocation78_spill] sm:$0xff] %v6135_v48  ;;  %3461 = vmatpush.msrb.mxu1 %v142_v60 }
 0x1cf   :  { %8656 = vst [vmem:[#allocation76_spill] sm:$0xff] %v6103_v61  ;;  %vm844_vm14 = vcmp.eq.s32.totalorder %v4640_v17, %v6103_v61  ;;  %vm845_vm6 = vcmp.eq.s32.totalorder %v4649_v55, %v6103_v61  ;;  %4201 = vmatmul.msk.f32.gmra.mxu3 %vm2311_vm4, %v8596_v43  ;;  %vm846_vm5 = vcmp.eq.s32.totalorder %v4656_v58, %v6103_v61  ;;  %v6167_v21 = vpop.permute.xlu2 %1843  ;;  %v6191_v36 = vpop.f32.mrf.mxu2 }
 0x1d0   :  { %vm1100_vm2 = vmor %vm492_vm12, %vm844_vm14  ;;  %vm847_vm15 = vcmp.eq.s32.totalorder %v4664_v11, %v6103_v61  ;;  %vm1454_vm12 = vcmp.eq.s32.totalorder %v4656_v58, %v6054_v40  ;;  %vm1455_vm4 = vcmp.eq.s32.totalorder %v4664_v11, %v6054_v40  ;;  %v6161_v40 = vpop.permute.xlu0 %627  ;;  %8670 = vst [vmem:[#allocation84_spill] sm:$0xff] %v6167_v21  ;;  %v6197_v61 = vpop.f32.mrf.mxu0 }
 0x1d1   :  { %vm1101_vm7 = vmor %vm493_vm1, %vm845_vm6  ;;  %8669 = vst [vmem:[#allocation83_spill] sm:$0xff] %v6161_v40  ;;  %v6199_v45 = vpop.f32.mrf.mxu3 }
 0x1d2   :  { %vm6125_vm13 = vmor %vm1100_vm2, %vm1452_vm9  ;;  %8672 = vst [vmem:[#allocation86_spill] sm:$0xff] %v6191_v36  ;;  %v174_v36 = vld [vmem:[#allocation2 + $0x398] sm:$0xff] }
 0x1d3   :  { %vm1102_vm0 = vmor %vm494_vm10, %vm846_vm5  ;;  %8673 = vst [vmem:[#allocation87_spill] sm:$0xff] %v6197_v61  ;;  %v158_v61 = vld [vmem:[#allocation2 + $0x318] sm:$0xff]  ;;  %3687 = vmatpush.msrb.mxu3 %v174_v36 }
 0x1d4   :  { %vm6137_vm11 = vmor %vm1101_vm7, %vm1453_vm8  ;;  %8674 = vst [vmem:[#allocation88_spill] sm:$0xff] %v6199_v45  ;;  %v126_v45 = vld [vmem:[#allocation2 + $0x218] sm:$0xff]  ;;  %3574 = vmatpush.msrb.mxu2 %v158_v61 }
 0x1d5   :  { %vm1103_vm14 = vmor %vm495_vm3, %vm847_vm15  ;;  %vm500_vm15 = vcmp.eq.s32.totalorder %v4640_v17, %v6105_v0  ;;  %v6180_v10 = vpop.f32.mrf.mxu1  ;;  %3348 = vmatpush.msrb.mxu0 %v126_v45 }
 0x1d6   :  { %vm6149_vm1 = vmor %vm1102_vm0, %vm1454_vm12  ;;  %vm852_vm0 = vcmp.eq.s32.totalorder %v4640_v17, %v6161_v40  ;;  %8671 = vst [vmem:[#allocation85_spill] sm:$0xff] %v6180_v10  ;;  %vm501_vm12 = vcmp.eq.s32.totalorder %v4649_v55, %v6105_v0  ;;  %v157_v10 = vld [vmem:[#allocation2 + $0x310] sm:$0xff] }
 0x1d7   :  { %v6147_v51 = vpop.permute.xlu1 %1840  ;;  %vm1711_vm10 = vmor %vm1103_vm14, %vm1455_vm4  ;;  %vm502_vm4 = vcmp.eq.s32.totalorder %v4656_v58, %v6105_v0  ;;  %vm854_vm14 = vcmp.eq.s32.totalorder %v4656_v58, %v6161_v40  ;;  %v6242_v61 = vpop.f32.mrf.mxu2  ;;  %3575 = vmatpush.msrb.mxu2 %v157_v10 }
 0x1d8   :  { %8665 = vst [vmem:[#allocation81_spill] sm:$0xff] %v6147_v51  ;;  %vm2060_vm6 = vcmp.eq.s32.totalorder %v4640_v17, %v6147_v51  ;;  %vm2061_vm2 = vcmp.eq.s32.totalorder %v4649_v55, %v6147_v51  ;;  %vm2062_vm9 = vcmp.eq.s32.totalorder %v4656_v58, %v6147_v51  ;;  %vm2063_vm7 = vcmp.eq.s32.totalorder %v4664_v11, %v6147_v51  ;;  %v6235_v46 = vpop.permute.xlu0 %1238  ;;  %v6237_v52 = vpop.f32.mrf.mxu0 }
 0x1d9   :  { %vm2316_vm5 = vmor %vm6125_vm13, %vm2060_vm6  ;;  %vm503_vm6 = vcmp.eq.s32.totalorder %v4664_v11, %v6105_v0  ;;  %v6219_v0 = vpop.permute.xlu2 %630  ;;  %8682 = vst [vmem:[#allocation92_spill] sm:$0xff] %v6235_v46  ;;  %v6256_v60 = vpop.f32.mrf.mxu3 }
 0x1da   :  { %4106 = vmatmul.msk.f32.gmra.mxu0 %vm2316_vm5, %v8596_v43  ;;  %vm2317_vm8 = vmor %vm6137_vm11, %vm2061_vm2  ;;  %vm853_vm11 = vcmp.eq.s32.totalorder %v4649_v55, %v6161_v40  ;;  %vm855_vm2 = vcmp.eq.s32.totalorder %v4664_v11, %v6161_v40  ;;  %8680 = vst [vmem:[#allocation90_spill] sm:$0xff] %v6219_v0 }
 0x1db   :  { %4138 = vmatmul.msk.f32.gmra.mxu1 %vm2317_vm8, %v8596_v43  ;;  %vm2318_vm3 = vmor %vm6149_vm1, %vm2062_vm9  ;;  %8683 = vst [vmem:[#allocation93_spill] sm:$0xff] %v6237_v52 }
 0x1dc   :  { %4170 = vmatmul.msk.f32.gmra.mxu2 %vm2318_vm3, %v8596_v43  ;;  %vm2319_vm13 = vmor %vm1711_vm10, %vm2063_vm7  ;;  %vm2068_vm10 = vcmp.eq.s32.totalorder %v4640_v17, %v6167_v21  ;;  %8684 = vst [vmem:[#allocation94_spill] sm:$0xff] %v6242_v61  ;;  %v173_v61 = vld [vmem:[#allocation2 + $0x390] sm:$0xff] }
 0x1dd   :  { %4202 = vmatmul.msk.f32.gmra.mxu3 %vm2319_vm13, %v8596_v43  ;;  %vm1108_vm1 = vmor %vm500_vm15, %vm852_vm0  ;;  %vm2069_vm15 = vcmp.eq.s32.totalorder %v4649_v55, %v6167_v21  ;;  %v6228_v48 = vpop.f32.mrf.mxu1  ;;  %8686 = vst [vmem:[#allocation96_spill] sm:$0xff] %v6256_v60  ;;  %v125_v60 = vld [vmem:[#allocation2 + $0x210] sm:$0xff] }
 0x1de   :  { %vm1109_vm9 = vmor %vm501_vm12, %vm853_vm11  ;;  %8681 = vst [vmem:[#allocation91_spill] sm:$0xff] %v6228_v48  ;;  %3349 = vmatpush.msrb.mxu0 %v125_v60  ;;  %3688 = vmatpush.msrb.mxu3 %v173_v61 }
 0x1df   :  { %vm6205_vm5 = vmor %vm502_vm4, %vm854_vm14  ;;  %vm2070_vm4 = vcmp.eq.s32.totalorder %v4656_v58, %v6167_v21  ;;  %v6293_v52 = vpop.f32.mrf.mxu2 }
 0x1e0   :  { %v6201_v51 = vpop.permute.xlu1 %1235  ;;  %vm6213_vm3 = vmor %vm503_vm6, %vm855_vm2  ;;  %vm2071_vm2 = vcmp.eq.s32.totalorder %v4664_v11, %v6167_v21  ;;  %8694 = vst [vmem:[#allocation100_spill] sm:$0xff] %v6293_v52  ;;  %v8737_v52 = vmov 0 }
 0x1e1   :  { %8675 = vst [vmem:[#allocation89_spill] sm:$0xff] %v6201_v51  ;;  %vm1460_vm7 = vcmp.eq.s32.totalorder %v4640_v17, %v6201_v51  ;;  %vm1461_vm8 = vcmp.eq.s32.totalorder %v4649_v55, %v6201_v51  ;;  %vm1462_vm12 = vcmp.eq.s32.totalorder %v4656_v58, %v6201_v51  ;;  %v6259_v36 = vpop.permute.xlu2 %281 }
 0x1e2   :  { %vm1716_vm13 = vmor %vm1108_vm1, %vm1460_vm7  ;;  %vm1463_vm1 = vcmp.eq.s32.totalorder %v4664_v11, %v6201_v51  ;;  %8687 = vst [vmem:[#allocation97_spill] sm:$0xff] %v6259_v36  ;;  %v6289_v51 = vpop.f32.mrf.mxu0  ;;  %v6327_v21 = vpop.permute.xlu0 %1849 }
 0x1e3   :  { %vm2324_vm0 = vmor %vm1716_vm13, %vm2068_vm10  ;;  %8693 = vst [vmem:[#allocation99_spill] sm:$0xff] %v6289_v51 }
 0x1e4   :  { %4107 = vmatmul.msk.f32.gmra.mxu0 %vm2324_vm0, %v8596_v43  ;;  %vm1717_vm11 = vmor %vm1109_vm9, %vm1461_vm8  ;;  %vm1468_vm8 = vcmp.eq.s32.totalorder %v4640_v17, %v6235_v46  ;;  %8702 = vst [vmem:[#allocation106_spill] sm:$0xff] %v6327_v21 }
 0x1e5   :  { %vm2325_vm14 = vmor %vm1717_vm11, %vm2069_vm15  ;;  %vm861_vm15 = vcmp.eq.s32.totalorder %v4649_v55, %v6219_v0  ;;  %v6279_v10 = vpop.f32.mrf.mxu1 }
 0x1e6   :  { %4139 = vmatmul.msk.f32.gmra.mxu1 %vm2325_vm14, %v8596_v43  ;;  %vm1718_vm6 = vmor %vm6205_vm5, %vm1462_vm12  ;;  %vm860_vm5 = vcmp.eq.s32.totalorder %v4640_v17, %v6219_v0  ;;  %vm1469_vm12 = vcmp.eq.s32.totalorder %v4649_v55, %v6235_v46  ;;  %vm862_vm14 = vcmp.eq.s32.totalorder %v4656_v58, %v6219_v0  ;;  %8690 = vst [vmem:[#allocation98_spill] sm:$0xff] %v6279_v10  ;;  %v124_v10 = vld [vmem:[#allocation2 + $0x208] sm:$0xff] }
 0x1e7   :  { %vm2326_vm9 = vmor %vm1718_vm6, %vm2070_vm4  ;;  %vm1470_vm6 = vcmp.eq.s32.totalorder %v4656_v58, %v6235_v46  ;;  %v6325_v40 = vpop.f32.mrf.mxu2  ;;  %3350 = vmatpush.msrb.mxu0 %v124_v10 }
 0x1e8   :  { %4171 = vmatmul.msk.f32.gmra.mxu2 %vm2326_vm9, %v8596_v43  ;;  %vm1719_vm10 = vmor %vm6213_vm3, %vm1463_vm1  ;;  %8701 = vst [vmem:[#allocation105_spill] sm:$0xff] %v6325_v40 }
 0x1e9   :  { %vm2327_vm7 = vmor %vm1719_vm10, %vm2071_vm2  ;;  %v6252_v45 = vpop.permute.xlu1 %278  ;;  %vm863_vm10 = vcmp.eq.s32.totalorder %v4664_v11, %v6219_v0  ;;  %v141_v0 = vld [vmem:[#allocation2 + $0x290] sm:$0xff]  ;;  %v6316_v61 = vpop.permute.xlu2 %1241 }
 0x1ea   :  { %8685 = vst [vmem:[#allocation95_spill] sm:$0xff] %v6252_v45  ;;  %4203 = vmatmul.msk.f32.gmra.mxu3 %vm2327_vm7, %v8596_v43  ;;  %vm508_vm3 = vcmp.eq.s32.totalorder %v4640_v17, %v6252_v45  ;;  %vm509_vm13 = vcmp.eq.s32.totalorder %v4649_v55, %v6252_v45  ;;  %vm510_vm4 = vcmp.eq.s32.totalorder %v4656_v58, %v6252_v45 }
 0x1eb   :  { %vm1116_vm0 = vmor %vm508_vm3, %vm860_vm5  ;;  %vm511_vm9 = vcmp.eq.s32.totalorder %v4664_v11, %v6252_v45  ;;  %vm1471_vm7 = vcmp.eq.s32.totalorder %v4664_v11, %v6235_v46  ;;  %v6301_v45 = vpop.f32.mrf.mxu3  ;;  %3462 = vmatpush.msrb.mxu1 %v141_v0  ;;  %8699 = vst [vmem:[#allocation103_spill] sm:$0xff] %v6316_v61  ;;  %v156_v0 = vld [vmem:[#allocation2 + $0x308] sm:$0xff] }
 0x1ec   :  { %vm6269_vm11 = vmor %vm1116_vm0, %vm1468_vm8  ;;  %8698 = vst [vmem:[#allocation102_spill] sm:$0xff] %v6301_v45  ;;  %3576 = vmatpush.msrb.mxu2 %v156_v0  ;;  %v172_v0 = vld [vmem:[#allocation2 + $0x388] sm:$0xff] }
 0x1ed   :  { %vm1117_vm1 = vmor %vm509_vm13, %vm861_vm15  ;;  %v6321_v60 = vpop.f32.mrf.mxu1  ;;  %3689 = vmatpush.msrb.mxu3 %v172_v0 }
 0x1ee   :  { %vm6281_vm2 = vmor %vm1117_vm1, %vm1469_vm12  ;;  %8700 = vst [vmem:[#allocation104_spill] sm:$0xff] %v6321_v60  ;;  %v6475_v60 = vadd.s32 768, %v4640_v17 }
 0x1ef   :  { %vm1118_vm5 = vmor %vm510_vm4, %vm862_vm14 }
 0x1f0   :  { %vm6295_vm8 = vmor %vm1118_vm5, %vm1470_vm6  ;;  %vm2084_vm5 = vcmp.eq.s32.totalorder %v4640_v17, %v6327_v21 }
 0x1f1   :  { %vm1119_vm3 = vmor %vm511_vm9, %vm863_vm10  ;;  %vm516_vm9 = vcmp.eq.s32.totalorder %v4640_v17, %v6259_v36 }
 0x1f2   :  { %v6299_v48 = vpop.permute.xlu1 %1846  ;;  %vm1727_vm12 = vmor %vm1119_vm3, %vm1471_vm7 }
 0x1f3   :  { %8697 = vst [vmem:[#allocation101_spill] sm:$0xff] %v6299_v48  ;;  %vm2076_vm13 = vcmp.eq.s32.totalorder %v4640_v17, %v6299_v48  ;;  %vm2077_vm15 = vcmp.eq.s32.totalorder %v4649_v55, %v6299_v48  ;;  %vm2078_vm0 = vcmp.eq.s32.totalorder %v4656_v58, %v6299_v48  ;;  %vm2079_vm14 = vcmp.eq.s32.totalorder %v4664_v11, %v6299_v48  ;;  %v6329_v48 = vpop.f32.mrf.mxu0  ;;  %v6331_v46 = vpop.f32.mrf.mxu3 }
 0x1f4   :  { %vm2332_vm4 = vmor %vm6269_vm11, %vm2076_vm13  ;;  %8703 = vst [vmem:[#allocation107_spill] sm:$0xff] %v6329_v48  ;;  %vm1477_vm13 = vcmp.eq.s32.totalorder %v4649_v55, %v6316_v61  ;;  %v140_v48 = vld [vmem:[#allocation2 + $0x288] sm:$0xff] }
 0x1f5   :  { %4108 = vmatmul.msk.f32.gmra.mxu0 %vm2332_vm4, %v8596_v43  ;;  %vm2333_vm1 = vmor %vm6281_vm2, %vm2077_vm15  ;;  %8704 = vst [vmem:[#allocation108_spill] sm:$0xff] %v6331_v46  ;;  %vm1476_vm2 = vcmp.eq.s32.totalorder %v4640_v17, %v6316_v61  ;;  %v6351_v46 = vpop.permute.xlu2 %636  ;;  %3463 = vmatpush.msrb.mxu1 %v140_v48  ;;  %v6356_v40 = vpop.f32.mrf.mxu1 }
 0x1f6   :  { %4140 = vmatmul.msk.f32.gmra.mxu1 %vm2333_vm1, %v8596_v43  ;;  %vm2334_vm6 = vmor %vm6295_vm8, %vm2078_vm0  ;;  %vm517_vm0 = vcmp.eq.s32.totalorder %v4649_v55, %v6259_v36  ;;  %8706 = vst [vmem:[#allocation110_spill] sm:$0xff] %v6351_v46  ;;  %v6366_v48 = vpop.f32.mrf.mxu2 }
 0x1f7   :  { %4172 = vmatmul.msk.f32.gmra.mxu2 %vm2334_vm6, %v8596_v43  ;;  %vm2335_vm11 = vmor %vm1727_vm12, %vm2079_vm14  ;;  %vm2085_vm12 = vcmp.eq.s32.totalorder %v4649_v55, %v6327_v21  ;;  %8707 = vst [vmem:[#allocation111_spill] sm:$0xff] %v6356_v40  ;;  %vm1478_vm6 = vcmp.eq.s32.totalorder %v4656_v58, %v6316_v61 }
 0x1f8   :  { %4204 = vmatmul.msk.f32.gmra.mxu3 %vm2335_vm11, %v8596_v43  ;;  %8709 = vst [vmem:[#allocation113_spill] sm:$0xff] %v6366_v48 }
 0x1fb   :  { %v6333_v51 = vpop.permute.xlu1 %633  ;;  %v6360_v10 = vpop.f32.mrf.mxu0 }
 0x1fc   :  { %8705 = vst [vmem:[#allocation109_spill] sm:$0xff] %v6333_v51  ;;  %vm868_vm10 = vcmp.eq.s32.totalorder %v4640_v17, %v6333_v51  ;;  %vm869_vm8 = vcmp.eq.s32.totalorder %v4649_v55, %v6333_v51  ;;  %vm870_vm14 = vcmp.eq.s32.totalorder %v4656_v58, %v6333_v51  ;;  %v6373_v0 = vpop.f32.mrf.mxu3 }
 0x1fd   :  { %vm1124_vm7 = vmor %vm516_vm9, %vm868_vm10  ;;  %8708 = vst [vmem:[#allocation112_spill] sm:$0xff] %v6360_v10  ;;  %vm2086_vm9 = vcmp.eq.s32.totalorder %v4656_v58, %v6327_v21 }
 0x1fe   :  { %vm1732_vm3 = vmor %vm1124_vm7, %vm1476_vm2  ;;  %vm518_vm2 = vcmp.eq.s32.totalorder %v4656_v58, %v6259_v36  ;;  %8710 = vst [vmem:[#allocation114_spill] sm:$0xff] %v6373_v0  ;;  %v171_v0 = vld [vmem:[#allocation2 + $0x380] sm:$0xff]  ;;  %v6399_v48 = vpop.f32.mrf.mxu2 }
 0x1ff   :  { %vm2340_vm15 = vmor %vm1732_vm3, %vm2084_vm5  ;;  %vm871_vm5 = vcmp.eq.s32.totalorder %v4664_v11, %v6333_v51  ;;  %v6382_v51 = vpop.permute.xlu2 %1852  ;;  %8714 = vst [vmem:[#allocation118_spill] sm:$0xff] %v6399_v48  ;;  %3690 = vmatpush.msrb.mxu3 %v171_v0  ;;  %v6506_v0 = vadd.s32 896, %v4640_v17 }
 0x200   :  { %4109 = vmatmul.msk.f32.gmra.mxu0 %vm2340_vm15, %v8596_v43  ;;  %vm1125_vm4 = vmor %vm517_vm0, %vm869_vm8  ;;  %vm1479_vm8 = vcmp.eq.s32.totalorder %v4664_v11, %v6316_v61  ;;  %vm2087_vm15 = vcmp.eq.s32.totalorder %v4664_v11, %v6327_v21  ;;  %8712 = vst [vmem:[#allocation116_spill] sm:$0xff] %v6382_v51  ;;  %v6388_v61 = vpop.f32.mrf.mxu1  ;;  %v155_v21 = vld [vmem:[#allocation2 + $0x300] sm:$0xff] }
 0x201   :  { %vm1733_vm1 = vmor %vm1125_vm4, %vm1477_vm13  ;;  %vm519_vm13 = vcmp.eq.s32.totalorder %v4664_v11, %v6259_v36  ;;  %8713 = vst [vmem:[#allocation117_spill] sm:$0xff] %v6388_v61  ;;  %v123_v36 = vld [vmem:[#allocation2 + $0x200] sm:$0xff]  ;;  %3577 = vmatpush.msrb.mxu2 %v155_v21 }
 0x202   :  { %vm2341_vm11 = vmor %vm1733_vm1, %vm2085_vm12  ;;  %vm876_vm1 = vcmp.eq.s32.totalorder %v4640_v17, %v6351_v46  ;;  %3351 = vmatpush.msrb.mxu0 %v123_v36  ;;  %v139_v61 = vld [vmem:[#allocation2 + $0x280] sm:$0xff] }
 0x203   :  { %4141 = vmatmul.msk.f32.gmra.mxu1 %vm2341_vm11, %v8596_v43  ;;  %vm1126_vm10 = vmor %vm518_vm2, %vm870_vm14  ;;  %vm877_vm11 = vcmp.eq.s32.totalorder %v4649_v55, %v6351_v46  ;;  %v6408_v40 = vpop.f32.mrf.mxu0 }
 0x204   :  { %vm1734_vm7 = vmor %vm1126_vm10, %vm1478_vm6  ;;  %v6379_v10 = vpop.permute.xlu1 %284  ;;  %3464 = vmatpush.msrb.mxu1 %v139_v61  ;;  %8715 = vst [vmem:[#allocation119_spill] sm:$0xff] %v6408_v40  ;;  %v6416_v36 = vpop.f32.mrf.mxu3  ;;  %v8758_v61 = vmov 0 }
 0x205   :  { %vm2342_vm3 = vmor %vm1734_vm7, %vm2086_vm9  ;;  %8711 = vst [vmem:[#allocation115_spill] sm:$0xff] %v6379_v10  ;;  %vm524_vm14 = vcmp.eq.s32.totalorder %v4640_v17, %v6379_v10  ;;  %vm525_vm6 = vcmp.eq.s32.totalorder %v4649_v55, %v6379_v10  ;;  %vm526_vm2 = vcmp.eq.s32.totalorder %v4656_v58, %v6379_v10  ;;  %vm878_vm9 = vcmp.eq.s32.totalorder %v4656_v58, %v6351_v46  ;;  %v6454_v40 = vpop.permute.xlu0 %287 }
 0x206   :  { %4173 = vmatmul.msk.f32.gmra.mxu2 %vm2342_vm3, %v8596_v43  ;;  %vm1127_vm0 = vmor %vm519_vm13, %vm871_vm5  ;;  %vm527_vm5 = vcmp.eq.s32.totalorder %v4664_v11, %v6379_v10  ;;  %vm879_vm7 = vcmp.eq.s32.totalorder %v4664_v11, %v6351_v46  ;;  %8716 = vst [vmem:[#allocation120_spill] sm:$0xff] %v6416_v36  ;;  %vm2092_vm3 = vcmp.eq.s32.totalorder %v4640_v17, %v6382_v51  ;;  %v6445_v46 = vadd.s32 512, %v4640_v17  ;;  %v6477_v45 = vpop.f32.mrf.mxu2 }
 0x207   :  { %vm1735_vm12 = vmor %vm1127_vm0, %vm1479_vm8  ;;  %v6450_v10 = vpop.permute.xlu2 %1247  ;;  %8723 = vst [vmem:[#allocation123_spill] sm:$0xff] %v6454_v40  ;;  %v6461_v36 = vadd.s32 640, %v4640_v17 }
 0x208   :  { %vm2343_vm4 = vmor %vm1735_vm12, %vm2087_vm15  ;;  %8722 = vst [vmem:[#allocation122_spill] sm:$0xff] %v6450_v10  ;;  %v6463_v48 = vpop.f32.mrf.mxu1 }
 0x209   :  { %4205 = vmatmul.msk.f32.gmra.mxu3 %vm2343_vm4, %v8596_v43  ;;  %vm1132_vm10 = vmor %vm524_vm14, %vm876_vm1  ;;  %vm2093_vm14 = vcmp.eq.s32.totalorder %v4649_v55, %v6382_v51  ;;  %8724 = vst [vmem:[#allocation124_spill] sm:$0xff] %v6463_v48 }
 0x20a   :  { %vm1133_vm8 = vmor %vm525_vm6, %vm877_vm11  ;;  %8725 = vst [vmem:[#allocation125_spill] sm:$0xff] %v6477_v45 }
 0x20b   :  { %vm6428_vm13 = vmor %vm526_vm2, %vm878_vm9  ;;  %vm2094_vm2 = vcmp.eq.s32.totalorder %v4656_v58, %v6382_v51  ;;  %v6479_v48 = vpop.f32.mrf.mxu0 }
 0x20c   :  { %vm6436_vm12 = vmor %vm527_vm5, %vm879_vm7  ;;  %vm296_vm5 = vcmp.eq.s32.totalorder %v6445_v46, %v4597_v59  ;;  %vm648_vm7 = vcmp.eq.s32.totalorder %v6445_v46, %v4624_v42  ;;  %8726 = vst [vmem:[#allocation126_spill] sm:$0xff] %v6479_v48  ;;  %v8731_v48 = vmov 0 }
 0x20d   :  { %v6418_v21 = vpop.permute.xlu1 %1244 }
 0x20e   :  { %8717 = vst [vmem:[#allocation121_spill] sm:$0xff] %v6418_v21  ;;  %vm1484_vm15 = vcmp.eq.s32.totalorder %v4640_v17, %v6418_v21  ;;  %vm1485_vm0 = vcmp.eq.s32.totalorder %v4649_v55, %v6418_v21  ;;  %vm1486_vm6 = vcmp.eq.s32.totalorder %v4656_v58, %v6418_v21 }
 0x20f   :  { %vm1740_vm4 = vmor %vm1132_vm10, %vm1484_vm15  ;;  %vm1487_vm10 = vcmp.eq.s32.totalorder %v4664_v11, %v6418_v21  ;;  %v6508_v21 = vpop.f32.mrf.mxu3 }
 0x210   :  { %vm2348_vm1 = vmor %vm1740_vm4, %vm2092_vm3  ;;  %vm2095_vm3 = vcmp.eq.s32.totalorder %v4664_v11, %v6382_v51  ;;  %vm649_vm4 = vcmp.eq.s32.totalorder %v6461_v36, %v4624_v42  ;;  %8730 = vst [vmem:[#allocation128_spill] sm:$0xff] %v6508_v21  ;;  %v8733_v21 = vmov 0  ;;  %v6546_v45 = vpop.f32.mrf.mxu1 }
 0x211   :  { %4110 = vmatmul.msk.f32.gmra.mxu0 %vm2348_vm1, %v8596_v43  ;;  %vm1741_vm11 = vmor %vm1133_vm8, %vm1485_vm0  ;;  %vm297_vm0 = vcmp.eq.s32.totalorder %v6461_v36, %v4597_v59  ;;  %8735 = vst [vmem:[#allocation129_spill] sm:$0xff] %v6546_v45  ;;  %v6568_v45 = vpop.f32.mrf.mxu2 }
 0x212   :  { %vm2349_vm9 = vmor %vm1741_vm11, %vm2093_vm14  ;;  %vm532_vm14 = vcmp.eq.s32.totalorder %v4640_v17, %v6454_v40  ;;  %vm298_vm11 = vcmp.eq.s32.totalorder %v6475_v60, %v4597_v59  ;;  %8741 = vst [vmem:[#allocation131_spill] sm:$0xff] %v6568_v45 }
 0x213   :  { %4142 = vmatmul.msk.f32.gmra.mxu1 %vm2349_vm9, %v8596_v43  ;;  %vm1742_vm8 = vmor %vm6428_vm13, %vm1486_vm6  ;;  %vm533_vm9 = vcmp.eq.s32.totalorder %v4649_v55, %v6454_v40 }
 0x214   :  { %vm2350_vm15 = vmor %vm1742_vm8, %vm2094_vm2  ;;  %vm1492_vm8 = vcmp.eq.s32.totalorder %v4640_v17, %v6450_v10 }
 0x215   :  { %4174 = vmatmul.msk.f32.gmra.mxu2 %vm2350_vm15, %v8596_v43  ;;  %vm1743_vm13 = vmor %vm6436_vm12, %vm1487_vm10  ;;  %vm650_vm12 = vcmp.eq.s32.totalorder %v6475_v60, %v4624_v42  ;;  %vm651_vm15 = vcmp.eq.s32.totalorder %v6506_v0, %v4624_v42  ;;  %v6548_v42 = vpop.permute.xlu2 %290 }
 0x216   :  { %vm6495_vm1 = vmor %vm296_vm5, %vm648_vm7  ;;  %v6499_v51 = vpop.permute.xlu1 %639  ;;  %8736 = vst [vmem:[#allocation130_spill] sm:$0xff] %v6548_v42 }
 0x217   :  { %vm2351_vm6 = vmor %vm1743_vm13, %vm2095_vm3  ;;  %8729 = vst [vmem:[#allocation127_spill] sm:$0xff] %v6499_v51  ;;  %vm884_vm2 = vcmp.eq.s32.totalorder %v4640_v17, %v6499_v51  ;;  %vm885_vm10 = vcmp.eq.s32.totalorder %v4649_v55, %v6499_v51  ;;  %vm299_vm3 = vcmp.eq.s32.totalorder %v6506_v0, %v4597_v59  ;;  %vm534_vm13 = vcmp.eq.s32.totalorder %v4656_v58, %v6454_v40  ;;  %v6584_v34 = vpop.f32.mrf.mxu3 }
 0x218   :  { %4206 = vmatmul.msk.f32.gmra.mxu3 %vm2351_vm6, %v8596_v43  ;;  %vm6523_vm5 = vmor %vm297_vm0, %vm649_vm4  ;;  %vm886_vm6 = vcmp.eq.s32.totalorder %v4656_v58, %v6499_v51  ;;  %v8739_v59 = vmov 0  ;;  %8747 = vst [vmem:[#allocation133_spill] sm:$0xff] %v6584_v34 }
 0x219   :  { %v8732_v48 = vsel %vm6523_vm5, 4294967295, %v8731_v48  ;;  %vm1140_vm7 = vmor %vm532_vm14, %vm884_vm2  ;;  %vm1493_vm14 = vcmp.eq.s32.totalorder %v4649_v55, %v6450_v10  ;;  %vm535_vm5 = vcmp.eq.s32.totalorder %v4664_v11, %v6454_v40  ;;  %v6570_v40 = vpop.f32.mrf.mxu0 }
 0x21a   :  { %vm6540_vm0 = vmor %vm298_vm11, %vm650_vm12  ;;  %vm887_vm11 = vcmp.eq.s32.totalorder %v4664_v11, %v6499_v51  ;;  %8742 = vst [vmem:[#allocation132_spill] sm:$0xff] %v6570_v40  ;;  %v8762_v51 = vmov 0  ;;  %v6658_v40 = vpop.f32.mrf.mxu2 }
 0x21b   :  { %v8734_v21 = vsel %vm6540_vm0, 4294967295, %v8733_v21  ;;  %vm1141_vm4 = vmor %vm533_vm9, %vm885_vm10  ;;  %vm304_vm9 = vcmp.eq.s32.totalorder %v6445_v46, %v4613_v8  ;;  %vm656_vm10 = vcmp.eq.s32.totalorder %v6445_v46, %v4724_v4  ;;  %8764 = vst [vmem:[#allocation137_spill] sm:$0xff] %v6658_v40 }
 0x21c   :  { %vm6550_vm2 = vmor %vm1140_vm7, %vm1492_vm8  ;;  %vm1494_vm8 = vcmp.eq.s32.totalorder %v4656_v58, %v6450_v10 }
 0x21d   :  { %v8738_v52 = vsel %vm6550_vm2, 4294967295, %v8737_v52  ;;  %vm6558_vm12 = vmor %vm299_vm3, %vm651_vm15  ;;  %vm1495_vm3 = vcmp.eq.s32.totalorder %v4664_v11, %v6450_v10  ;;  %vm1256_vm15 = vcmp.eq.s32.totalorder %v6445_v46, %v4681_v62  ;;  %v6594_v10 = vpop.permute.xlu0 %642  ;;  %v6661_v34 = vpop.permute.xlu2 %1858 }
 0x21e   :  { %v8740_v59 = vsel %vm6558_vm12, 4294967295, %v8739_v59  ;;  %vm1142_vm7 = vmor %vm534_vm13, %vm886_vm6  ;;  %vm1257_vm6 = vcmp.eq.s32.totalorder %v6461_v36, %v4681_v62  ;;  %8751 = vst [vmem:[#allocation135_spill] sm:$0xff] %v6594_v10 }
 0x21f   :  { %vm6572_vm0 = vmor %vm1141_vm4, %vm1493_vm14  ;;  %v6586_v45 = vpop.permute.xlu1 %1855  ;;  %v6696_v40 = vpop.f32.mrf.mxu3 }
 0x220   :  { %vm1143_vm12 = vmor %vm535_vm5, %vm887_vm11  ;;  %8748 = vst [vmem:[#allocation134_spill] sm:$0xff] %v6586_v45  ;;  %vm2100_vm5 = vcmp.eq.s32.totalorder %v4640_v17, %v6586_v45  ;;  %vm2101_vm4 = vcmp.eq.s32.totalorder %v4649_v55, %v6586_v45  ;;  %vm2102_vm14 = vcmp.eq.s32.totalorder %v4656_v58, %v6586_v45 }
 0x221   :  { %vm6580_vm2 = vmor %vm304_vm9, %vm656_vm10  ;;  %vm8756_vm10 = vnez %v8738_v52  ;;  %v6631_v52 = vpop.f32.mrf.mxu1 }
 0x222   :  { %v8746_v37 = vsel %vm6580_vm2, 4294967295, %v8745_v37  ;;  %vm6588_vm13 = vmor %vm1142_vm7, %vm1494_vm8  ;;  %vm2103_vm8 = vcmp.eq.s32.totalorder %v4664_v11, %v6586_v45  ;;  %vm1258_vm2 = vcmp.eq.s32.totalorder %v6475_v60, %v4681_v62  ;;  %8760 = vst [vmem:[#allocation136_spill] sm:$0xff] %v6631_v52  ;;  %v8770_v45 = vmov 0  ;;  %v6698_v52 = vpop.f32.mrf.mxu0 }
 0x223   :  { %vm6602_vm11 = vmor %vm1143_vm12, %vm1495_vm3  ;;  %vm8757_vm3 = vnez %v8732_v48  ;;  %8772 = vst [vmem:[#allocation138_spill] sm:$0xff] %v6698_v52  ;;  %v8777_v52 = vmov 0 }
 0x224   :  { %vm6608_vm9 = vmor %vm6495_vm1, %vm1256_vm15  ;;  %vm305_vm15 = vcmp.eq.s32.totalorder %v6461_v36, %v4613_v8 }
 0x225   :  { %v8755_v33 = vsel %vm6608_vm9, 4294967295, %v8754_v33  ;;  %vm2356_vm7 = vmor %vm8756_vm10, %vm2100_vm5  ;;  %vm657_vm5 = vcmp.eq.s32.totalorder %v6461_v36, %v4724_v4 }
 0x226   :  { %4111 = vmatmul.msk.f32.gmra.mxu0 %vm2356_vm7, %v8596_v43  ;;  %vm2357_vm12 = vmor %vm6572_vm0, %vm2101_vm4  ;;  %vm540_vm0 = vcmp.eq.s32.totalorder %v4640_v17, %v6548_v42  ;;  %vm1259_vm4 = vcmp.eq.s32.totalorder %v6506_v0, %v4681_v62  ;;  %v8775_v62 = vmov 0 }
 0x227   :  { %vm6623_vm1 = vmor %vm8757_vm3, %vm1257_vm6  ;;  %4143 = vmatmul.msk.f32.gmra.mxu1 %vm2357_vm12, %v8596_v43  ;;  %vm892_vm6 = vcmp.eq.s32.totalorder %v4640_v17, %v6594_v10  ;;  %vm8769_vm12 = vnez %v8740_v59 }
 0x228   :  { %v8759_v61 = vsel %vm6623_vm1, 4294967295, %v8758_v61  ;;  %vm2358_vm10 = vmor %vm6588_vm13, %vm2102_vm14  ;;  %vm8761_vm14 = vnez %v8734_v21  ;;  %v6712_v59 = vpop.permute.xlu1 %1250 }
 0x229   :  { %4175 = vmatmul.msk.f32.gmra.mxu2 %vm2358_vm10, %v8596_v43  ;;  %vm2359_vm7 = vmor %vm6602_vm11, %vm2103_vm8  ;;  %vm542_vm11 = vcmp.eq.s32.totalorder %v4656_v58, %v6548_v42  ;;  %vm894_vm8 = vcmp.eq.s32.totalorder %v4656_v58, %v6594_v10 }
 0x22a   :  { %vm6654_vm3 = vmor %vm8761_vm14, %vm1258_vm2  ;;  %4207 = vmatmul.msk.f32.gmra.mxu3 %vm2359_vm7, %v8596_v43  ;;  %vm543_vm7 = vcmp.eq.s32.totalorder %v4664_v11, %v6548_v42  ;;  %vm895_vm14 = vcmp.eq.s32.totalorder %v4664_v11, %v6594_v10  ;;  %v6782_v48 = vpop.f32.mrf.mxu0 }
 0x22b   :  { %v8763_v51 = vsel %vm6654_vm3, 4294967295, %v8762_v51  ;;  %vm6673_vm2 = vmor %vm305_vm15, %vm657_vm5  ;;  %vm1264_vm15 = vcmp.eq.s32.totalorder %v6445_v46, %v4634_v49  ;;  %vm8773_vm5 = vcmp.eq.s32.totalorder %v4649_v55, %v6594_v10  ;;  %vm1864_vm3 = vcmp.eq.s32.totalorder %v6445_v46, %v4622_v41 }
 0x22c   :  { %vm6677_vm10 = vmor %vm540_vm0, %vm892_vm6  ;;  %vm8774_vm0 = vcmp.eq.s32.totalorder %v4649_v55, %v6548_v42  ;;  %v8782_v42 = vmov 0 }
 0x22d   :  { %vm6690_vm13 = vmor %vm8769_vm12, %vm1259_vm4  ;;  %vm1265_vm4 = vcmp.eq.s32.totalorder %v6461_v36, %v4634_v49  ;;  %vm2108_vm12 = vcmp.eq.s32.totalorder %v4640_v17, %v6661_v34 }
 0x22e   :  { %v8771_v45 = vsel %vm6690_vm13, 4294967295, %v8770_v45  ;;  %vm6706_vm6 = vmor %vm8774_vm0, %vm8773_vm5  ;;  %vm1500_vm5 = vcmp.eq.s32.totalorder %v4640_v17, %v6712_v59  ;;  %vm1501_vm0 = vcmp.eq.s32.totalorder %v4649_v55, %v6712_v59  ;;  %v8784_v17 = vmov 0 }
 0x22f   :  { %v8776_v62 = vsel %vm6706_vm6, 4294967295, %v8775_v62  ;;  %vm6716_vm13 = vmor %vm542_vm11, %vm894_vm8  ;;  %vm8781_vm6 = vnez %v8746_v37  ;;  %vm2109_vm8 = vcmp.eq.s32.totalorder %v4649_v55, %v6661_v34  ;;  %v6763_v55 = vpop.f32.mrf.mxu1 }
 0x230   :  { %v8778_v52 = vsel %vm6716_vm13, 4294967295, %v8777_v52  ;;  %vm6726_vm1 = vmor %vm543_vm7, %vm895_vm14  ;;  %vm1865_vm13 = vcmp.eq.s32.totalorder %v6461_v36, %v4622_v41 }
 0x231   :  { %vm6732_vm9 = vmor %vm8781_vm6, %vm1264_vm15  ;;  %vm1502_vm15 = vcmp.eq.s32.totalorder %v4656_v58, %v6712_v59  ;;  %vm8786_vm6 = vnez %v8755_v33  ;;  %v8791_v33 = vmov 0 }
 0x232   :  { %v8783_v42 = vsel %vm6732_vm9, 4294967295, %v8782_v42  ;;  %vm1756_vm11 = vmor %vm6677_vm10, %vm1500_vm5  ;;  %vm8789_vm10 = vnez %v8776_v62  ;;  %v6850_v10 = vpop.f32.mrf.mxu0 }
 0x233   :  { %vm6744_vm7 = vmor %vm6673_vm2, %vm1265_vm4  ;;  %vm2110_vm2 = vcmp.eq.s32.totalorder %v4656_v58, %v6661_v34  ;;  %vm1866_vm4 = vcmp.eq.s32.totalorder %v6475_v60, %v4622_v41  ;;  %v6780_v58 = vpop.f32.mrf.mxu2 }
 0x234   :  { %v8785_v17 = vsel %vm6744_vm7, 4294967295, %v8784_v17  ;;  %vm2364_vm14 = vmor %vm1756_vm11, %vm2108_vm12  ;;  %vm8790_vm11 = vnez %v8759_v61  ;;  %v8795_v61 = vmov 0 }
 0x235   :  { %vm6752_vm9 = vmor %vm8786_vm6, %vm1864_vm3  ;;  %4112 = vmatmul.msk.f32.gmra.mxu0 %vm2364_vm14, %v8596_v43  ;;  %vm1503_vm3 = vcmp.eq.s32.totalorder %v4664_v11, %v6712_v59 }
 0x236   :  { %vm1757_vm5 = vmor %vm8789_vm10, %vm1501_vm0  ;;  %vm8793_vm0 = vnez %v8778_v52  ;;  %vm2111_vm10 = vcmp.eq.s32.totalorder %v4664_v11, %v6661_v34 }
 0x237   :  { %vm2365_vm12 = vmor %vm1757_vm5, %vm2109_vm8  ;;  %vm1867_vm8 = vcmp.eq.s32.totalorder %v6506_v0, %v4622_v41  ;;  %v6801_v41 = vpop.f32.mrf.mxu3 }
 0x238   :  { %vm6769_vm6 = vmor %vm8790_vm11, %vm1865_vm13  ;;  %4144 = vmatmul.msk.f32.gmra.mxu1 %vm2365_vm12, %v8596_v43  ;;  %vm8794_vm13 = vnez %v8763_v51  ;;  %vm658_vm12 = vcmp.eq.s32.totalorder %v6475_v60, %v4724_v4 }
 0x239   :  { %v8792_v33 = vsel %vm6769_vm6, 4294967295, %v8791_v33  ;;  %vm1758_vm14 = vmor %vm8793_vm0, %vm1502_vm15  ;;  %vm306_vm15 = vcmp.eq.s32.totalorder %v6475_v60, %v4613_v8  ;;  %vm1266_vm6 = vcmp.eq.s32.totalorder %v6475_v60, %v4634_v49 }
 0x23a   :  { %vm2366_vm5 = vmor %vm1758_vm14, %vm2110_vm2  ;;  %vm307_vm2 = vcmp.eq.s32.totalorder %v6506_v0, %v4613_v8 }
 0x23b   :  { %vm6786_vm11 = vmor %vm8794_vm13, %vm1866_vm4  ;;  %4176 = vmatmul.msk.f32.gmra.mxu2 %vm2366_vm5, %v8596_v43  ;;  %vm659_vm4 = vcmp.eq.s32.totalorder %v6506_v0, %v4724_v4  ;;  %vm8797_vm13 = vnez %v8771_v45  ;;  %vm1872_vm5 = vcmp.eq.s32.totalorder %v6445_v46, %v4733_v6  ;;  %v6829_v4 = vpop.f32.mrf.mxu1  ;;  %v8804_v45 = vmov 0 }
 0x23c   :  { %v8796_v61 = vsel %vm6786_vm11, 4294967295, %v8795_v61  ;;  %vm1759_vm0 = vmor %vm6726_vm1, %vm1503_vm3  ;;  %vm1873_vm1 = vcmp.eq.s32.totalorder %v6461_v36, %v4733_v6 }
 0x23d   :  { %vm2367_vm14 = vmor %vm1759_vm0, %vm2111_vm10  ;;  %vm1267_vm10 = vcmp.eq.s32.totalorder %v6506_v0, %v4634_v49  ;;  %4209 = vmatmul.msk.f32.vlgmr.msrb.gmra.mxu0 %vm6752_vm9, %v8596_v43  ;;  %vm1874_vm9 = vcmp.eq.s32.totalorder %v6475_v60, %v4733_v6  ;;  %v6848_v49 = vpop.f32.mrf.mxu2 }
 0x23e   :  { %vm6805_vm11 = vmor %vm8797_vm13, %vm1867_vm8  ;;  %4208 = vmatmul.msk.f32.gmra.mxu3 %vm2367_vm14, %v8596_v43  ;;  %vm8800_vm8 = vnez %v8783_v42  ;;  %vm8806_vm14 = vnez %v8792_v33  ;;  %v8808_v42 = vmov 0 }
 0x23f   :  { %vm914_vm3 = vmor %vm306_vm15, %vm658_vm12  ;;  %vm664_vm15 = vcmp.eq.s32.totalorder %v6445_v46, %v4763_v19  ;;  %vm8803_vm12 = vnez %v8785_v17  ;;  %v6912_v17 = vpop.f32.mrf.mxu0 }
 0x240   :  { %vm915_vm7 = vmor %vm307_vm2, %vm659_vm4  ;;  %4241 = vmatmul.msk.f32.vlgmr.msrb.gmra.mxu1 %vm8806_vm14, %v8596_v43  ;;  %vm666_vm14 = vcmp.eq.s32.totalorder %v6475_v60, %v4763_v19 }
 0x241   :  { %vm6823_vm0 = vmor %vm8800_vm8, %vm1872_vm5  ;;  %vm1875_vm5 = vcmp.eq.s32.totalorder %v6506_v0, %v4733_v6  ;;  %vm312_vm8 = vcmp.eq.s32.totalorder %v6445_v46, %v4595_v57  ;;  %v6865_v6 = vpop.f32.mrf.mxu3 }
 0x242   :  { %vm6833_vm2 = vmor %vm8803_vm12, %vm1873_vm1  ;;  %vm665_vm1 = vcmp.eq.s32.totalorder %v6461_v36, %v4763_v19 }
 0x243   :  { %v8805_v45 = vsel %vm6833_vm2, 4294967295, %v8804_v45  ;;  %vm1522_vm4 = vmor %vm914_vm3, %vm1266_vm6  ;;  %vm8807_vm3 = vnez %v8796_v61  ;;  %v6895_v21 = vpop.f32.mrf.mxu1 }
 0x244   :  { %vm1523_vm13 = vmor %vm915_vm7, %vm1267_vm10  ;;  %4273 = vmatmul.msk.f32.vlgmr.msrb.gmra.mxu2 %vm8807_vm3, %v8596_v43  ;;  %vm1880_vm7 = vcmp.eq.s32.totalorder %v6445_v46, %v4797_v13  ;;  %vm313_vm10 = vcmp.eq.s32.totalorder %v6461_v36, %v4595_v57  ;;  %vm1881_vm3 = vcmp.eq.s32.totalorder %v6461_v36, %v4797_v13 }
 0x245   :  { %vm920_vm6 = vmor %vm312_vm8, %vm664_vm15  ;;  %4210 = vmatmul.msk.f32.gmra.mxu0 %vm6823_vm0, %v8596_v43  ;;  %vm8816_vm0 = vnez %v8805_v45 }
 0x246   :  { %vm6855_vm12 = vmor %vm1522_vm4, %vm1874_vm9  ;;  %vm1272_vm4 = vcmp.eq.s32.totalorder %v6445_v46, %v4644_v53  ;;  %4305 = vmatmul.msk.f32.vlgmr.msrb.gmra.mxu3 %vm6805_vm11, %v8596_v43 }
 0x247   :  { %v8809_v42 = vsel %vm6855_vm12, 4294967295, %v8808_v42  ;;  %vm6867_vm15 = vmor %vm1523_vm13, %vm1875_vm5  ;;  %vm314_vm12 = vcmp.eq.s32.totalorder %v6475_v60, %v4595_v57  ;;  %vm1273_vm13 = vcmp.eq.s32.totalorder %v6461_v36, %v4644_v53  ;;  %v6972_v8 = vpop.f32.mrf.mxu0 }
 0x248   :  { %vm921_vm9 = vmor %vm313_vm10, %vm665_vm1  ;;  %vm667_vm1 = vcmp.eq.s32.totalorder %v6506_v0, %v4763_v19  ;;  %4242 = vmatmul.msk.f32.gmra.mxu1 %vm8816_vm0, %v8596_v43  ;;  %v6910_v19 = vpop.f32.mrf.mxu2  ;;  %vm673_vm0 = vcmp.eq.s32.totalorder %v6461_v36, %v4697_v1 }
 0x249   :  { %vm1528_vm8 = vmor %vm920_vm6, %vm1272_vm4  ;;  %vm1274_vm6 = vcmp.eq.s32.totalorder %v6475_v60, %v4644_v53 }
 0x24a   :  { %vm6880_vm2 = vmor %vm1528_vm8, %vm1880_vm7  ;;  %vm1882_vm7 = vcmp.eq.s32.totalorder %v6475_v60, %v4797_v13  ;;  %vm672_vm8 = vcmp.eq.s32.totalorder %v6445_v46, %v4697_v1 }
 0x24b   :  { %vm922_vm5 = vmor %vm314_vm12, %vm666_vm14  ;;  %vm315_vm14 = vcmp.eq.s32.totalorder %v6506_v0, %v4595_v57  ;;  %v6929_v57 = vpop.f32.mrf.mxu3  ;;  %v6955_v33 = vpop.f32.mrf.mxu1 }
 0x24c   :  { %vm1529_vm11 = vmor %vm921_vm9, %vm1273_vm13  ;;  %vm1883_vm9 = vcmp.eq.s32.totalorder %v6506_v0, %v4797_v13  ;;  %vm1275_vm13 = vcmp.eq.s32.totalorder %v6506_v0, %v4644_v53 }
 0x24d   :  { %vm6897_vm10 = vmor %vm1529_vm11, %vm1881_vm3  ;;  %4211 = vmatmul.msk.f32.gmra.mxu0 %vm6880_vm2, %v8596_v43  ;;  %vm322_vm2 = vcmp.eq.s32.totalorder %v6475_v60, %v4609_v20 }
 0x24e   :  { %vm1530_vm12 = vmor %vm922_vm5, %vm1274_vm6  ;;  %vm1280_vm5 = vcmp.eq.s32.totalorder %v6445_v46, %v4646_v54  ;;  %vm320_vm6 = vcmp.eq.s32.totalorder %v6445_v46, %v4609_v20  ;;  %4306 = vmatmul.msk.f32.gmra.mxu3 %vm6867_vm15, %v8596_v43  ;;  %vm674_vm15 = vcmp.eq.s32.totalorder %v6475_v60, %v4697_v1 }
 0x24f   :  { %vm923_vm4 = vmor %vm315_vm14, %vm667_vm1  ;;  %vm8819_vm1 = vnez %v8809_v42 }
 0x250   :  { %vm6914_vm3 = vmor %vm1530_vm12, %vm1882_vm7  ;;  %4274 = vmatmul.msk.f32.gmra.mxu2 %vm8819_vm1, %v8596_v43  ;;  %vm1888_vm7 = vcmp.eq.s32.totalorder %v6445_v46, %v4828_v24  ;;  %4243 = vmatmul.msk.f32.gmra.mxu1 %vm6897_vm10, %v8596_v43  ;;  %v6970_v11 = vpop.f32.mrf.mxu2 }
 0x251   :  { %vm1531_vm11 = vmor %vm923_vm4, %vm1275_vm13  ;;  %vm1281_vm13 = vcmp.eq.s32.totalorder %v6461_v36, %v4646_v54 }
 0x252   :  { %vm6931_vm12 = vmor %vm1531_vm11, %vm1883_vm9  ;;  %vm321_vm9 = vcmp.eq.s32.totalorder %v6461_v36, %v4609_v20 }
 0x253   :  { %vm928_vm14 = vmor %vm320_vm6, %vm672_vm8  ;;  %vm1889_vm8 = vcmp.eq.s32.totalorder %v6461_v36, %v4828_v24  ;;  %vm1282_vm6 = vcmp.eq.s32.totalorder %v6475_v60, %v4646_v54  ;;  %v6981_v45 = vpop.f32.mrf.mxu3 }
 0x254   :  { %vm1536_vm4 = vmor %vm928_vm14, %vm1280_vm5  ;;  %vm1890_vm14 = vcmp.eq.s32.totalorder %v6475_v60, %v4828_v24 }
 0x255   :  { %vm6942_vm1 = vmor %vm1536_vm4, %vm1888_vm7  ;;  %vm675_vm4 = vcmp.eq.s32.totalorder %v6506_v0, %v4697_v1 }
 0x256   :  { %vm929_vm11 = vmor %vm321_vm9, %vm673_vm0  ;;  %4307 = vmatmul.msk.f32.gmra.mxu3 %vm6931_vm12, %v8596_v43  ;;  %4212 = vmatmul.msk.f32.gmra.mxu0 %vm6942_vm1, %v8596_v43  ;;  %vm1896_vm12 = vcmp.eq.s32.totalorder %v6445_v46, %v4769_v16 }
 0x257   :  { %vm1537_vm5 = vmor %vm929_vm11, %vm1281_vm13  ;;  %vm1283_vm13 = vcmp.eq.s32.totalorder %v6506_v0, %v4646_v54  ;;  %vm1891_vm11 = vcmp.eq.s32.totalorder %v6506_v0, %v4828_v24  ;;  %v7009_v54 = vpop.f32.mrf.mxu1  ;;  %v7020_v24 = vpop.f32.mrf.mxu0 }
 0x258   :  { %vm6962_vm7 = vmor %vm1537_vm5, %vm1889_vm8  ;;  %4275 = vmatmul.msk.f32.gmra.mxu2 %vm6914_vm3, %v8596_v43  ;;  %vm323_vm8 = vcmp.eq.s32.totalorder %v6506_v0, %v4609_v20  ;;  %v7018_v1 = vpop.f32.mrf.mxu2 }
 0x259   :  { %vm930_vm0 = vmor %vm322_vm2, %vm674_vm15  ;;  %vm680_vm15 = vcmp.eq.s32.totalorder %v6445_v46, %v4731_v5  ;;  %4244 = vmatmul.msk.f32.gmra.mxu1 %vm6962_vm7, %v8596_v43 }
 0x25a   :  { %vm1538_vm10 = vmor %vm930_vm0, %vm1282_vm6  ;;  %vm1288_vm6 = vcmp.eq.s32.totalorder %v6445_v46, %v4870_v26 }
 0x25b   :  { %vm6983_vm9 = vmor %vm1538_vm10, %vm1890_vm14  ;;  %vm328_vm14 = vcmp.eq.s32.totalorder %v6445_v46, %v4569_v18  ;;  %vm1289_vm10 = vcmp.eq.s32.totalorder %v6461_v36, %v4870_v26  ;;  %v7031_v52 = vpop.f32.mrf.mxu3 }
 0x25c   :  { %vm931_vm3 = vmor %vm323_vm8, %vm675_vm4  ;;  %vm681_vm4 = vcmp.eq.s32.totalorder %v6461_v36, %v4731_v5  ;;  %vm329_vm8 = vcmp.eq.s32.totalorder %v6461_v36, %v4569_v18 }
 0x25d   :  { %vm1539_vm5 = vmor %vm931_vm3, %vm1283_vm13  ;;  %vm682_vm3 = vcmp.eq.s32.totalorder %v6475_v60, %v4731_v5 }
 0x25e   :  { %vm7001_vm2 = vmor %vm1539_vm5, %vm1891_vm11  ;;  %vm1897_vm11 = vcmp.eq.s32.totalorder %v6461_v36, %v4769_v16  ;;  %vm1290_vm5 = vcmp.eq.s32.totalorder %v6475_v60, %v4870_v26 }
 0x25f   :  { %vm936_vm0 = vmor %vm328_vm14, %vm680_vm15  ;;  %4308 = vmatmul.msk.f32.gmra.mxu3 %vm7001_vm2, %v8596_v43  ;;  %vm330_vm14 = vcmp.eq.s32.totalorder %v6475_v60, %v4569_v18  ;;  %v7047_v51 = vpop.f32.mrf.mxu1  ;;  %v7058_v62 = vpop.f32.mrf.mxu0 }
 0x260   :  { %vm1544_vm1 = vmor %vm936_vm0, %vm1288_vm6  ;;  %4276 = vmatmul.msk.f32.gmra.mxu2 %vm6983_vm9, %v8596_v43  ;;  %vm1898_vm9 = vcmp.eq.s32.totalorder %v6475_v60, %v4769_v16  ;;  %vm683_vm0 = vcmp.eq.s32.totalorder %v6506_v0, %v4731_v5  ;;  %v7056_v5 = vpop.f32.mrf.mxu2 }
 0x261   :  { %vm2152_vm13 = vmor %vm1544_vm1, %vm1896_vm12  ;;  %vm1291_vm1 = vcmp.eq.s32.totalorder %v6506_v0, %v4870_v26 }
 0x262   :  { %vm937_vm7 = vmor %vm329_vm8, %vm681_vm4  ;;  %4213 = vmatmul.msk.f32.gmra.mxu0 %vm2152_vm13, %v8596_v43  ;;  %vm1899_vm8 = vcmp.eq.s32.totalorder %v6506_v0, %v4769_v16 }
 0x263   :  { %vm1545_vm15 = vmor %vm937_vm7, %vm1289_vm10  ;;  %vm331_vm10 = vcmp.eq.s32.totalorder %v6506_v0, %v4569_v18  ;;  %vm688_vm7 = vcmp.eq.s32.totalorder %v6445_v46, %v4636_v50  ;;  %v7065_v18 = vpop.f32.mrf.mxu3 }
 0x264   :  { %vm2153_vm6 = vmor %vm1545_vm15, %vm1897_vm11 }
 0x265   :  { %vm938_vm12 = vmor %vm330_vm14, %vm682_vm3  ;;  %4245 = vmatmul.msk.f32.gmra.mxu1 %vm2153_vm6, %v8596_v43  ;;  %vm1296_vm3 = vcmp.eq.s32.totalorder %v6445_v46, %v4923_v32  ;;  %vm689_vm14 = vcmp.eq.s32.totalorder %v6461_v36, %v4636_v50 }
 0x266   :  { %vm1546_vm4 = vmor %vm938_vm12, %vm1290_vm5  ;;  %vm336_vm5 = vcmp.eq.s32.totalorder %v6445_v46, %v4577_v28  ;;  %vm1904_vm12 = vcmp.eq.s32.totalorder %v6445_v46, %v4801_v22 }
 0x267   :  { %vm2154_vm2 = vmor %vm1546_vm4, %vm1898_vm9  ;;  %v7079_v16 = vpop.f32.mrf.mxu1  ;;  %v7089_v37 = vpop.f32.mrf.mxu0 }
 0x268   :  { %vm939_vm11 = vmor %vm331_vm10, %vm683_vm0  ;;  %4277 = vmatmul.msk.f32.gmra.mxu2 %vm2154_vm2, %v8596_v43  ;;  %vm1297_vm0 = vcmp.eq.s32.totalorder %v6461_v36, %v4923_v32  ;;  %vm690_vm10 = vcmp.eq.s32.totalorder %v6475_v60, %v4636_v50  ;;  %v7087_v26 = vpop.f32.mrf.mxu2 }
 0x269   :  { %vm1547_vm13 = vmor %vm939_vm11, %vm1291_vm1  ;;  %vm337_vm1 = vcmp.eq.s32.totalorder %v6461_v36, %v4577_v28  ;;  %vm1905_vm11 = vcmp.eq.s32.totalorder %v6461_v36, %v4801_v22 }
 0x26a   :  { %vm2155_vm15 = vmor %vm1547_vm13, %vm1899_vm8 }
 0x26b   :  { %vm944_vm6 = vmor %vm336_vm5, %vm688_vm7  ;;  %4309 = vmatmul.msk.f32.gmra.mxu3 %vm2155_vm15, %v8596_v43  ;;  %vm1298_vm7 = vcmp.eq.s32.totalorder %v6475_v60, %v4923_v32  ;;  %vm691_vm5 = vcmp.eq.s32.totalorder %v6506_v0, %v4636_v50  ;;  %v7098_v13 = vpop.f32.mrf.mxu3 }
 0x26c   :  { %vm1552_vm9 = vmor %vm944_vm6, %vm1296_vm3  ;;  %vm338_vm3 = vcmp.eq.s32.totalorder %v6475_v60, %v4577_v28 }
 0x26d   :  { %vm2160_vm4 = vmor %vm1552_vm9, %vm1904_vm12  ;;  %vm1299_vm9 = vcmp.eq.s32.totalorder %v6506_v0, %v4923_v32 }
 0x26e   :  { %4214 = vmatmul.msk.f32.gmra.mxu0 %vm2160_vm4, %v8596_v43  ;;  %vm945_vm2 = vmor %vm337_vm1, %vm689_vm14  ;;  %vm1906_vm14 = vcmp.eq.s32.totalorder %v6475_v60, %v4801_v22  ;;  %vm344_vm1 = vcmp.eq.s32.totalorder %v6445_v46, %v5005_v7 }
 0x26f   :  { %vm1553_vm8 = vmor %vm945_vm2, %vm1297_vm0  ;;  %vm339_vm0 = vcmp.eq.s32.totalorder %v6506_v0, %v4577_v28  ;;  %vm696_vm2 = vcmp.eq.s32.totalorder %v6445_v46, %v5001_v39  ;;  %v7113_v28 = vpop.f32.mrf.mxu1 }
 0x270   :  { %vm2161_vm13 = vmor %vm1553_vm8, %vm1905_vm11  ;;  %vm1907_vm8 = vcmp.eq.s32.totalorder %v6506_v0, %v4801_v22  ;;  %vm1304_vm11 = vcmp.eq.s32.totalorder %v6445_v46, %v4839_v12  ;;  %v7122_v50 = vpop.f32.mrf.mxu2  ;;  %v7124_v22 = vpop.f32.mrf.mxu0 }
 0x271   :  { %4246 = vmatmul.msk.f32.gmra.mxu1 %vm2161_vm13, %v8596_v43  ;;  %vm946_vm15 = vmor %vm338_vm3, %vm690_vm10  ;;  %vm1912_vm13 = vcmp.eq.s32.totalorder %v6445_v46, %v4863_v25 }
 0x272   :  { %vm1554_vm6 = vmor %vm946_vm15, %vm1298_vm7  ;;  %vm345_vm15 = vcmp.eq.s32.totalorder %v6461_v36, %v5005_v7 }
 0x273   :  { %vm2162_vm12 = vmor %vm1554_vm6, %vm1906_vm14  ;;  %vm1305_vm14 = vcmp.eq.s32.totalorder %v6461_v36, %v4839_v12  ;;  %v7133_v32 = vpop.f32.mrf.mxu3 }
 0x274   :  { %4278 = vmatmul.msk.f32.gmra.mxu2 %vm2162_vm12, %v8596_v43  ;;  %vm947_vm4 = vmor %vm339_vm0, %vm691_vm5  ;;  %vm697_vm5 = vcmp.eq.s32.totalorder %v6461_v36, %v5001_v39  ;;  %vm1913_vm12 = vcmp.eq.s32.totalorder %v6461_v36, %v4863_v25 }
 0x275   :  { %vm1555_vm10 = vmor %vm947_vm4, %vm1299_vm9  ;;  %vm346_vm4 = vcmp.eq.s32.totalorder %v6475_v60, %v5005_v7 }
 0x276   :  { %vm2163_vm7 = vmor %vm1555_vm10, %vm1907_vm8  ;;  %vm1306_vm10 = vcmp.eq.s32.totalorder %v6475_v60, %v4839_v12 }
 0x277   :  { %4310 = vmatmul.msk.f32.gmra.mxu3 %vm2163_vm7, %v8596_v43  ;;  %vm952_vm3 = vmor %vm344_vm1, %vm696_vm2  ;;  %vm698_vm1 = vcmp.eq.s32.totalorder %v6475_v60, %v5001_v39  ;;  %v7146_v53 = vpop.f32.mrf.mxu1 }
 0x278   :  { %vm1560_vm6 = vmor %vm952_vm3, %vm1304_vm11  ;;  %vm1914_vm11 = vcmp.eq.s32.totalorder %v6475_v60, %v4863_v25  ;;  %vm699_vm3 = vcmp.eq.s32.totalorder %v6506_v0, %v5001_v39  ;;  %v7155_v61 = vpop.f32.mrf.mxu0 }
 0x279   :  { %vm2168_vm9 = vmor %vm1560_vm6, %vm1912_vm13  ;;  %vm347_vm13 = vcmp.eq.s32.totalorder %v6506_v0, %v5005_v7  ;;  %v7153_v7 = vpop.f32.mrf.mxu2 }
 0x27a   :  { %4215 = vmatmul.msk.f32.gmra.mxu0 %vm2168_vm9, %v8596_v43  ;;  %vm953_vm0 = vmor %vm345_vm15, %vm697_vm5  ;;  %vm1307_vm5 = vcmp.eq.s32.totalorder %v6506_v0, %v4839_v12 }
 0x27b   :  { %vm1561_vm2 = vmor %vm953_vm0, %vm1305_vm14  ;;  %vm1915_vm14 = vcmp.eq.s32.totalorder %v6506_v0, %v4863_v25  ;;  %v7161_v12 = vpop.f32.mrf.mxu3 }
 0x27c   :  { %vm2169_vm8 = vmor %vm1561_vm2, %vm1913_vm12  ;;  %vm704_vm12 = vcmp.eq.s32.totalorder %v6445_v46, %v5049_v44  ;;  %vm1920_vm2 = vcmp.eq.s32.totalorder %v6445_v46, %v5078_v47 }
 0x27d   :  { %4247 = vmatmul.msk.f32.gmra.mxu1 %vm2169_vm8, %v8596_v43  ;;  %vm954_vm7 = vmor %vm346_vm4, %vm698_vm1  ;;  %vm352_vm1 = vcmp.eq.s32.totalorder %v6445_v46, %v4620_v38  ;;  %vm1312_vm8 = vcmp.eq.s32.totalorder %v6445_v46, %v4874_v27 }
 0x27e   :  { %vm1562_vm15 = vmor %vm954_vm7, %vm1306_vm10 }
 0x27f   :  { %vm2170_vm6 = vmor %vm1562_vm15, %vm1914_vm11  ;;  %vm705_vm11 = vcmp.eq.s32.totalorder %v6461_v36, %v5049_v44  ;;  %vm1921_vm15 = vcmp.eq.s32.totalorder %v6461_v36, %v5078_v47  ;;  %v7177_v25 = vpop.f32.mrf.mxu1 }
 0x280   :  { %4279 = vmatmul.msk.f32.gmra.mxu2 %vm2170_vm6, %v8596_v43  ;;  %vm955_vm9 = vmor %vm347_vm13, %vm699_vm3  ;;  %vm353_vm3 = vcmp.eq.s32.totalorder %v6461_v36, %v4620_v38  ;;  %vm1313_vm6 = vcmp.eq.s32.totalorder %v6461_v36, %v4874_v27  ;;  %v7185_v42 = vpop.f32.mrf.mxu0 }
 0x281   :  { %vm1563_vm0 = vmor %vm955_vm9, %vm1307_vm5  ;;  %v7183_v39 = vpop.f32.mrf.mxu2  ;;  %8830 = vst [vmem:[#allocation139_spill] sm:$0xff] %v7185_v42 }
 0x282   :  { %vm2171_vm4 = vmor %vm1563_vm0, %vm1915_vm14  ;;  %vm706_vm14 = vcmp.eq.s32.totalorder %v6475_v60, %v5049_v44  ;;  %vm354_vm0 = vcmp.eq.s32.totalorder %v6475_v60, %v4620_v38 }
 0x283   :  { %4311 = vmatmul.msk.f32.gmra.mxu3 %vm2171_vm4, %v8596_v43  ;;  %vm960_vm10 = vmor %vm352_vm1, %vm704_vm12  ;;  %vm1922_vm4 = vcmp.eq.s32.totalorder %v6475_v60, %v5078_v47  ;;  %v7192_v20 = vpop.f32.mrf.mxu3 }
 0x284   :  { %vm1568_vm7 = vmor %vm960_vm10, %vm1312_vm8  ;;  %vm707_vm10 = vcmp.eq.s32.totalorder %v6506_v0, %v5049_v44  ;;  %v8831_v44 = vld [vmem:[#allocation5_spill] sm:$0xff] }
 0x285   :  { %vm2176_vm13 = vmor %vm1568_vm7, %vm1920_vm2  ;;  %vm1314_vm2 = vcmp.eq.s32.totalorder %v6475_v60, %v4874_v27  ;;  %vm355_vm7 = vcmp.eq.s32.totalorder %v6506_v0, %v4620_v38  ;;  %v8832_v38 = vld [vmem:[#allocation15_spill] sm:$0xff] }
 0x286   :  { %4216 = vmatmul.msk.f32.gmra.mxu0 %vm2176_vm13, %v8596_v43  ;;  %vm961_vm5 = vmor %vm353_vm3, %vm705_vm11  ;;  %vm1923_vm13 = vcmp.eq.s32.totalorder %v6506_v0, %v5078_v47 }
 0x287   :  { %vm1569_vm9 = vmor %vm961_vm5, %vm1313_vm6  ;;  %vm712_vm5 = vcmp.eq.s32.totalorder %v6445_v46, %v4955_v35  ;;  %v7209_v47 = vpop.f32.mrf.mxu1 }
 0x288   :  { %vm2177_vm12 = vmor %vm1569_vm9, %vm1921_vm15  ;;  %vm1315_vm15 = vcmp.eq.s32.totalorder %v6506_v0, %v4874_v27  ;;  %8833 = vst [vmem:[#allocation5_spill] sm:$0xff] %v7209_v47  ;;  %v7218_v42 = vpop.f32.mrf.mxu0 }
 0x289   :  { %4248 = vmatmul.msk.f32.gmra.mxu1 %vm2177_vm12, %v8596_v43  ;;  %vm962_vm1 = vmor %vm354_vm0, %vm706_vm14  ;;  %vm1320_vm14 = vcmp.eq.s32.totalorder %v6445_v46, %v4699_v2  ;;  %vm360_vm12 = vcmp.eq.s32.totalorder %v6445_v46, %v8831_v44  ;;  %vm1928_vm0 = vcmp.eq.s32.totalorder %v6445_v46, %v8832_v38  ;;  %v7216_v27 = vpop.f32.mrf.mxu2  ;;  %8835 = vst [vmem:[#allocation140_spill] sm:$0xff] %v7218_v42 }
 0x28a   :  { %vm1570_vm8 = vmor %vm962_vm1, %vm1314_vm2  ;;  %vm713_vm1 = vcmp.eq.s32.totalorder %v6461_v36, %v4955_v35  ;;  %8834 = vst [vmem:[#allocation15_spill] sm:$0xff] %v7216_v27 }
 0x28b   :  { %vm2178_vm11 = vmor %vm1570_vm8, %vm1922_vm4  ;;  %v7227_v47 = vpop.f32.mrf.mxu3 }
 0x28c   :  { %4280 = vmatmul.msk.f32.gmra.mxu2 %vm2178_vm11, %v8596_v43  ;;  %vm963_vm3 = vmor %vm355_vm7, %vm707_vm10  ;;  %vm1321_vm10 = vcmp.eq.s32.totalorder %v6461_v36, %v4699_v2  ;;  %vm361_vm11 = vcmp.eq.s32.totalorder %v6461_v36, %v8831_v44  ;;  %vm1929_vm7 = vcmp.eq.s32.totalorder %v6461_v36, %v8832_v38  ;;  %8836 = vst [vmem:[#allocation141_spill] sm:$0xff] %v7227_v47  ;;  %v8838_v47 = vld [vmem:[#allocation13_spill] sm:$0xff] }
 0x28d   :  { %vm1571_vm6 = vmor %vm963_vm3, %vm1315_vm15  ;;  %vm714_vm3 = vcmp.eq.s32.totalorder %v6475_v60, %v4955_v35 }
 0x28e   :  { %vm2179_vm9 = vmor %vm1571_vm6, %vm1923_vm13 }
 0x28f   :  { %4312 = vmatmul.msk.f32.gmra.mxu3 %vm2179_vm9, %v8596_v43  ;;  %vm968_vm4 = vmor %vm360_vm12, %vm712_vm5  ;;  %vm1322_vm5 = vcmp.eq.s32.totalorder %v6475_v60, %v4699_v2  ;;  %vm1930_vm9 = vcmp.eq.s32.totalorder %v6475_v60, %v8832_v38  ;;  %v7240_v42 = vpop.f32.mrf.mxu1 }
 0x290   :  { %vm1576_vm2 = vmor %vm968_vm4, %vm1320_vm14  ;;  %vm362_vm14 = vcmp.eq.s32.totalorder %v6475_v60, %v8831_v44  ;;  %8837 = vst [vmem:[#allocation142_spill] sm:$0xff] %v7240_v42  ;;  %v8842_v42 = vld [vmem:[#allocation18_spill] sm:$0xff] }
 0x291   :  { %vm2184_vm8 = vmor %vm1576_vm2, %vm1928_vm0  ;;  %vm715_vm0 = vcmp.eq.s32.totalorder %v6506_v0, %v4955_v35  ;;  %v8839_v35 = vld [vmem:[#allocation11_spill] sm:$0xff]  ;;  %v7251_v27 = vpop.f32.mrf.mxu2 }
 0x292   :  { %4217 = vmatmul.msk.f32.gmra.mxu0 %vm2184_vm8, %v8596_v43  ;;  %vm969_vm13 = vmor %vm361_vm11, %vm713_vm1  ;;  %vm1323_vm1 = vcmp.eq.s32.totalorder %v6506_v0, %v4699_v2  ;;  %vm1931_vm8 = vcmp.eq.s32.totalorder %v6506_v0, %v8832_v38  ;;  %8840 = vst [vmem:[#allocation13_spill] sm:$0xff] %v7251_v27  ;;  %v7253_v2 = vpop.f32.mrf.mxu0 }
 0x293   :  { %vm1577_vm15 = vmor %vm969_vm13, %vm1321_vm10  ;;  %vm363_vm10 = vcmp.eq.s32.totalorder %v6506_v0, %v8831_v44  ;;  %vm720_vm13 = vcmp.eq.s32.totalorder %v6445_v46, %v8839_v35  ;;  %8841 = vst [vmem:[#allocation11_spill] sm:$0xff] %v7253_v2  ;;  %v8843_v44 = vld [vmem:[#allocation12_spill] sm:$0xff]  ;;  %v7259_v38 = vpop.f32.mrf.mxu3 }
 0x294   :  { %vm2185_vm6 = vmor %vm1577_vm15, %vm1929_vm7  ;;  %vm368_vm7 = vcmp.eq.s32.totalorder %v6445_v46, %v8838_v47  ;;  %vm1328_vm15 = vcmp.eq.s32.totalorder %v6445_v46, %v8842_v42  ;;  %8844 = vst [vmem:[#allocation18_spill] sm:$0xff] %v7259_v38 }
 0x295   :  { %4249 = vmatmul.msk.f32.gmra.mxu1 %vm2185_vm6, %v8596_v43  ;;  %vm970_vm12 = vmor %vm362_vm14, %vm714_vm3  ;;  %vm1936_vm6 = vcmp.eq.s32.totalorder %v6445_v46, %v8843_v44 }
 0x296   :  { %vm1578_vm4 = vmor %vm970_vm12, %vm1322_vm5  ;;  %vm721_vm12 = vcmp.eq.s32.totalorder %v6461_v36, %v8839_v35 }
 0x297   :  { %vm2186_vm2 = vmor %vm1578_vm4, %vm1930_vm9  ;;  %vm369_vm9 = vcmp.eq.s32.totalorder %v6461_v36, %v8838_v47  ;;  %vm1329_vm4 = vcmp.eq.s32.totalorder %v6461_v36, %v8842_v42  ;;  %v7275_v2 = vpop.f32.mrf.mxu1 }
 0x298   :  { %4281 = vmatmul.msk.f32.gmra.mxu2 %vm2186_vm2, %v8596_v43  ;;  %vm971_vm11 = vmor %vm363_vm10, %vm715_vm0  ;;  %vm1937_vm2 = vcmp.eq.s32.totalorder %v6461_v36, %v8843_v44  ;;  %8845 = vst [vmem:[#allocation12_spill] sm:$0xff] %v7275_v2 }
 0x299   :  { %vm1579_vm3 = vmor %vm971_vm11, %vm1323_vm1  ;;  %vm722_vm11 = vcmp.eq.s32.totalorder %v6475_v60, %v8839_v35  ;;  %v7281_v38 = vpop.f32.mrf.mxu2 }
 0x29a   :  { %vm2187_vm5 = vmor %vm1579_vm3, %vm1931_vm8  ;;  %vm370_vm8 = vcmp.eq.s32.totalorder %v6475_v60, %v8838_v47  ;;  %8846 = vst [vmem:[#allocation143_spill] sm:$0xff] %v7281_v38  ;;  %v7283_v27 = vpop.f32.mrf.mxu0 }
 0x29b   :  { %4313 = vmatmul.msk.f32.gmra.mxu3 %vm2187_vm5, %v8596_v43  ;;  %vm976_vm14 = vmor %vm368_vm7, %vm720_vm13  ;;  %vm1330_vm13 = vcmp.eq.s32.totalorder %v6475_v60, %v8842_v42  ;;  %8847 = vst [vmem:[#allocation144_spill] sm:$0xff] %v7283_v27  ;;  %v7292_v2 = vpop.f32.mrf.mxu3  ;;  %v8849_v27 = vld [vmem:[#allocation22_spill] sm:$0xff] }
 0x29c   :  { %vm1584_vm0 = vmor %vm976_vm14, %vm1328_vm15  ;;  %vm1938_vm15 = vcmp.eq.s32.totalorder %v6475_v60, %v8843_v44  ;;  %vm723_vm14 = vcmp.eq.s32.totalorder %v6506_v0, %v8839_v35  ;;  %8848 = vst [vmem:[#allocation145_spill] sm:$0xff] %v7292_v2  ;;  %v8851_v35 = vld [vmem:[#allocation8_spill] sm:$0xff] }
 0x29d   :  { %vm2192_vm1 = vmor %vm1584_vm0, %vm1936_vm6  ;;  %vm371_vm6 = vcmp.eq.s32.totalorder %v6506_v0, %v8838_v47  ;;  %v8850_v47 = vld [vmem:[#allocation21_spill] sm:$0xff] }
 0x29e   :  { %4218 = vmatmul.msk.f32.gmra.mxu0 %vm2192_vm1, %v8596_v43  ;;  %vm977_vm10 = vmor %vm369_vm9, %vm721_vm12  ;;  %vm1331_vm12 = vcmp.eq.s32.totalorder %v6506_v0, %v8842_v42 }
 0x29f   :  { %vm1585_vm7 = vmor %vm977_vm10, %vm1329_vm4  ;;  %vm1939_vm4 = vcmp.eq.s32.totalorder %v6506_v0, %v8843_v44  ;;  %v7303_v42 = vpop.f32.mrf.mxu1  ;;  %v8853_v44 = vld [vmem:[#allocation14_spill] sm:$0xff] }
 0x2a0   :  { %vm2193_vm3 = vmor %vm1585_vm7, %vm1937_vm2  ;;  %vm728_vm2 = vcmp.eq.s32.totalorder %v6445_v46, %v8849_v27  ;;  %vm376_vm7 = vcmp.eq.s32.totalorder %v6445_v46, %v8851_v35  ;;  %8852 = vst [vmem:[#allocation22_spill] sm:$0xff] %v7303_v42 }
 0x2a1   :  { %4250 = vmatmul.msk.f32.gmra.mxu1 %vm2193_vm3, %v8596_v43  ;;  %vm978_vm5 = vmor %vm370_vm8, %vm722_vm11  ;;  %vm1336_vm8 = vcmp.eq.s32.totalorder %v6445_v46, %v8850_v47  ;;  %vm729_vm3 = vcmp.eq.s32.totalorder %v6461_v36, %v8849_v27  ;;  %v7312_v2 = vpop.f32.mrf.mxu2 }
 0x2a2   :  { %vm1586_vm9 = vmor %vm978_vm5, %vm1330_vm13  ;;  %vm1944_vm5 = vcmp.eq.s32.totalorder %v6445_v46, %v8853_v44  ;;  %8854 = vst [vmem:[#allocation21_spill] sm:$0xff] %v7312_v2  ;;  %v7314_v38 = vpop.f32.mrf.mxu0 }
 0x2a3   :  { %vm2194_vm0 = vmor %vm1586_vm9, %vm1938_vm15  ;;  %8855 = vst [vmem:[#allocation8_spill] sm:$0xff] %v7314_v38  ;;  %vm377_vm9 = vcmp.eq.s32.totalorder %v6461_v36, %v8851_v35  ;;  %v7321_v42 = vpop.f32.mrf.mxu3 }
 0x2a4   :  { %4282 = vmatmul.msk.f32.gmra.mxu2 %vm2194_vm0, %v8596_v43  ;;  %vm979_vm1 = vmor %vm371_vm6, %vm723_vm14  ;;  %vm1337_vm6 = vcmp.eq.s32.totalorder %v6461_v36, %v8850_v47  ;;  %vm730_vm0 = vcmp.eq.s32.totalorder %v6475_v60, %v8849_v27  ;;  %8856 = vst [vmem:[#allocation14_spill] sm:$0xff] %v7321_v42 }
 0x2a5   :  { %vm1587_vm10 = vmor %vm979_vm1, %vm1331_vm12  ;;  %vm1945_vm1 = vcmp.eq.s32.totalorder %v6461_v36, %v8853_v44 }
 0x2a6   :  { %vm2195_vm11 = vmor %vm1587_vm10, %vm1939_vm4 }
 0x2a7   :  { %4314 = vmatmul.msk.f32.gmra.mxu3 %vm2195_vm11, %v8596_v43  ;;  %vm984_vm13 = vmor %vm376_vm7, %vm728_vm2  ;;  %vm1338_vm2 = vcmp.eq.s32.totalorder %v6475_v60, %v8850_v47  ;;  %vm731_vm7 = vcmp.eq.s32.totalorder %v6506_v0, %v8849_v27  ;;  %v7336_v38 = vpop.f32.mrf.mxu1 }
 0x2a8   :  { %vm1592_vm15 = vmor %vm984_vm13, %vm1336_vm8  ;;  %vm378_vm8 = vcmp.eq.s32.totalorder %v6475_v60, %v8851_v35  ;;  %8857 = vst [vmem:[#allocation146_spill] sm:$0xff] %v7336_v38  ;;  %v8860_v38 = vld [vmem:[#allocation6_spill] sm:$0xff] }
 0x2a9   :  { %vm2200_vm14 = vmor %vm1592_vm15, %vm1944_vm5  ;;  %vm1339_vm15 = vcmp.eq.s32.totalorder %v6506_v0, %v8850_v47  ;;  %v7343_v27 = vpop.f32.mrf.mxu2  ;;  %v8859_v47 = vld [vmem:[#allocation17_spill] sm:$0xff] }
 0x2aa   :  { %4219 = vmatmul.msk.f32.gmra.mxu0 %vm2200_vm14, %v8596_v43  ;;  %vm985_vm12 = vmor %vm377_vm9, %vm729_vm3  ;;  %vm1946_vm3 = vcmp.eq.s32.totalorder %v6475_v60, %v8853_v44  ;;  %vm736_vm9 = vcmp.eq.s32.totalorder %v6445_v46, %v5233_v30  ;;  %v7345_v42 = vpop.f32.mrf.mxu0 }
 0x2ab   :  { %vm1593_vm4 = vmor %vm985_vm12, %vm1337_vm6  ;;  %vm379_vm6 = vcmp.eq.s32.totalorder %v6506_v0, %v8851_v35  ;;  %8858 = vst [vmem:[#allocation147_spill] sm:$0xff] %v7345_v42  ;;  %v8861_v35 = vld [vmem:[#allocation10_spill] sm:$0xff]  ;;  %v7355_v2 = vpop.f32.mrf.mxu3 }
 0x2ac   :  { %vm2201_vm10 = vmor %vm1593_vm4, %vm1945_vm1  ;;  %vm1344_vm4 = vcmp.eq.s32.totalorder %v6445_v46, %v8859_v47  ;;  %8862 = vst [vmem:[#allocation17_spill] sm:$0xff] %v7355_v2 }
 0x2ad   :  { %4251 = vmatmul.msk.f32.gmra.mxu1 %vm2201_vm10, %v8596_v43  ;;  %vm986_vm11 = vmor %vm378_vm8, %vm730_vm0  ;;  %vm1947_vm0 = vcmp.eq.s32.totalorder %v6506_v0, %v8853_v44  ;;  %vm1952_vm10 = vcmp.eq.s32.totalorder %v6445_v46, %v8861_v35 }
 0x2ae   :  { %vm1594_vm13 = vmor %vm986_vm11, %vm1338_vm2  ;;  %vm384_vm2 = vcmp.eq.s32.totalorder %v6445_v46, %v8860_v38  ;;  %vm737_vm11 = vcmp.eq.s32.totalorder %v6461_v36, %v5233_v30 }
 0x2af   :  { %vm2202_vm5 = vmor %vm1594_vm13, %vm1946_vm3  ;;  %vm1345_vm13 = vcmp.eq.s32.totalorder %v6461_v36, %v8859_v47  ;;  %v7369_v44 = vpop.f32.mrf.mxu1 }
 0x2b0   :  { %4283 = vmatmul.msk.f32.gmra.mxu2 %vm2202_vm5, %v8596_v43  ;;  %vm987_vm14 = vmor %vm379_vm6, %vm731_vm7  ;;  %vm1953_vm5 = vcmp.eq.s32.totalorder %v6461_v36, %v8861_v35  ;;  %8863 = vst [vmem:[#allocation6_spill] sm:$0xff] %v7369_v44 }
 0x2b1   :  { %vm1595_vm12 = vmor %vm987_vm14, %vm1339_vm15  ;;  %vm385_vm15 = vcmp.eq.s32.totalorder %v6461_v36, %v8860_v38  ;;  %vm738_vm14 = vcmp.eq.s32.totalorder %v6475_v60, %v5233_v30  ;;  %v7377_v42 = vpop.f32.mrf.mxu2 }
 0x2b2   :  { %vm2203_vm1 = vmor %vm1595_vm12, %vm1947_vm0  ;;  %vm1346_vm12 = vcmp.eq.s32.totalorder %v6475_v60, %v8859_v47  ;;  %8864 = vst [vmem:[#allocation10_spill] sm:$0xff] %v7377_v42  ;;  %v7382_v44 = vpop.f32.mrf.mxu0  ;;  %v8867_v42 = vld [vmem:[#allocation16_spill] sm:$0xff] }
 0x2b3   :  { %4315 = vmatmul.msk.f32.gmra.mxu3 %vm2203_vm1, %v8596_v43  ;;  %vm992_vm8 = vmor %vm384_vm2, %vm736_vm9  ;;  %vm1954_vm1 = vcmp.eq.s32.totalorder %v6475_v60, %v8861_v35  ;;  %8865 = vst [vmem:[#allocation148_spill] sm:$0xff] %v7382_v44  ;;  %v7386_v2 = vpop.f32.mrf.mxu3 }
 0x2b4   :  { %vm1600_vm7 = vmor %vm992_vm8, %vm1344_vm4  ;;  %vm386_vm4 = vcmp.eq.s32.totalorder %v6475_v60, %v8860_v38  ;;  %8866 = vst [vmem:[#allocation149_spill] sm:$0xff] %v7386_v2 }
 0x2b5   :  { %vm2208_vm3 = vmor %vm1600_vm7, %vm1952_vm10  ;;  %vm739_vm10 = vcmp.eq.s32.totalorder %v6506_v0, %v5233_v30  ;;  %v8868_v30 = vld [vmem:[#allocation24_spill] sm:$0xff] }
 0x2b6   :  { %4220 = vmatmul.msk.f32.gmra.mxu0 %vm2208_vm3, %v8596_v43  ;;  %vm993_vm6 = vmor %vm385_vm15, %vm737_vm11  ;;  %vm1347_vm11 = vcmp.eq.s32.totalorder %v6506_v0, %v8859_v47  ;;  %vm1955_vm3 = vcmp.eq.s32.totalorder %v6506_v0, %v8861_v35  ;;  %v8869_v47 = vld [vmem:[#allocation27_spill] sm:$0xff]  ;;  %v8871_v35 = vld [vmem:[#allocation20_spill] sm:$0xff] }
 0x2b7   :  { %vm1601_vm9 = vmor %vm993_vm6, %vm1345_vm13  ;;  %vm387_vm13 = vcmp.eq.s32.totalorder %v6506_v0, %v8860_v38  ;;  %vm744_vm6 = vcmp.eq.s32.totalorder %v6445_v46, %v8868_v30  ;;  %v7400_v38 = vpop.f32.mrf.mxu1 }
 0x2b8   :  { %vm2209_vm0 = vmor %vm1601_vm9, %vm1953_vm5  ;;  %vm392_vm5 = vcmp.eq.s32.totalorder %v6445_v46, %v8867_v42  ;;  %8870 = vst [vmem:[#allocation16_spill] sm:$0xff] %v7400_v38 }
 0x2b9   :  { %4252 = vmatmul.msk.f32.gmra.mxu1 %vm2209_vm0, %v8596_v43  ;;  %vm994_vm2 = vmor %vm386_vm4, %vm738_vm14  ;;  %vm1352_vm4 = vcmp.eq.s32.totalorder %v6445_v46, %v8871_v35  ;;  %v7408_v44 = vpop.f32.mrf.mxu2 }
 0x2ba   :  { %vm1602_vm8 = vmor %vm994_vm2, %vm1346_vm12  ;;  %vm1960_vm12 = vcmp.eq.s32.totalorder %v6445_v46, %v8869_v47  ;;  %vm745_vm2 = vcmp.eq.s32.totalorder %v6461_v36, %v8868_v30  ;;  %8872 = vst [vmem:[#allocation24_spill] sm:$0xff] %v7408_v44  ;;  %v7412_v2 = vpop.f32.mrf.mxu0 }
 0x2bb   :  { %vm2210_vm7 = vmor %vm1602_vm8, %vm1954_vm1  ;;  %vm393_vm1 = vcmp.eq.s32.totalorder %v6461_v36, %v8867_v42  ;;  %8873 = vst [vmem:[#allocation27_spill] sm:$0xff] %v7412_v2  ;;  %v7421_v38 = vpop.f32.mrf.mxu3 }
 0x2bc   :  { %4284 = vmatmul.msk.f32.gmra.mxu2 %vm2210_vm7, %v8596_v43  ;;  %vm995_vm15 = vmor %vm387_vm13, %vm739_vm10  ;;  %vm1353_vm13 = vcmp.eq.s32.totalorder %v6461_v36, %v8871_v35  ;;  %8874 = vst [vmem:[#allocation20_spill] sm:$0xff] %v7421_v38  ;;  %v8876_v38 = vld [vmem:[#allocation23_spill] sm:$0xff] }
 0x2bd   :  { %vm1603_vm14 = vmor %vm995_vm15, %vm1347_vm11  ;;  %vm1961_vm11 = vcmp.eq.s32.totalorder %v6461_v36, %v8869_v47  ;;  %vm746_vm15 = vcmp.eq.s32.totalorder %v6475_v60, %v8868_v30 }
 0x2be   :  { %vm2211_vm9 = vmor %vm1603_vm14, %vm1955_vm3  ;;  %vm394_vm3 = vcmp.eq.s32.totalorder %v6475_v60, %v8867_v42  ;;  %vm1962_vm14 = vcmp.eq.s32.totalorder %v6475_v60, %v8869_v47 }
 0x2bf   :  { %4316 = vmatmul.msk.f32.gmra.mxu3 %vm2211_vm9, %v8596_v43  ;;  %vm1000_vm0 = vmor %vm392_vm5, %vm744_vm6  ;;  %v7434_v2 = vpop.f32.mrf.mxu1 }
 0x2c0   :  { %vm1608_vm10 = vmor %vm1000_vm0, %vm1352_vm4  ;;  %vm395_vm0 = vcmp.eq.s32.totalorder %v6506_v0, %v8867_v42  ;;  %vm747_vm4 = vcmp.eq.s32.totalorder %v6506_v0, %v8868_v30  ;;  %8875 = vst [vmem:[#allocation150_spill] sm:$0xff] %v7434_v2  ;;  %v8877_v42 = vld [vmem:[#allocation31_spill] sm:$0xff]  ;;  %v8881_v2 = vld [vmem:[#allocation30_spill] sm:$0xff] }
 0x2c1   :  { %vm2216_vm8 = vmor %vm1608_vm10, %vm1960_vm12  ;;  %vm1354_vm12 = vcmp.eq.s32.totalorder %v6475_v60, %v8871_v35  ;;  %vm1963_vm10 = vcmp.eq.s32.totalorder %v6506_v0, %v8869_v47  ;;  %v7443_v30 = vpop.f32.mrf.mxu2  ;;  %v8880_v47 = vld [vmem:[#allocation9_spill] sm:$0xff] }
 0x2c2   :  { %4221 = vmatmul.msk.f32.gmra.mxu0 %vm2216_vm8, %v8596_v43  ;;  %vm1001_vm7 = vmor %vm393_vm1, %vm745_vm2  ;;  %8878 = vst [vmem:[#allocation23_spill] sm:$0xff] %v7443_v30  ;;  %v7445_v44 = vpop.f32.mrf.mxu0 }
 0x2c3   :  { %vm1609_vm5 = vmor %vm1001_vm7, %vm1353_vm13  ;;  %vm752_vm7 = vcmp.eq.s32.totalorder %v6445_v46, %v8876_v38  ;;  %8879 = vst [vmem:[#allocation31_spill] sm:$0xff] %v7445_v44  ;;  %v3015_v44 = vadd.f32 %v5993_v9, %v5960_v14 }
 0x2c4   :  { %vm2217_vm6 = vmor %vm1609_vm5, %vm1961_vm11  ;;  %vm1355_vm11 = vcmp.eq.s32.totalorder %v6506_v0, %v8871_v35  ;;  %vm400_vm5 = vcmp.eq.s32.totalorder %v6445_v46, %v8880_v47  ;;  %v7454_v35 = vpop.f32.mrf.mxu3 }
 0x2c5   :  { %4253 = vmatmul.msk.f32.gmra.mxu1 %vm2217_vm6, %v8596_v43  ;;  %vm1002_vm9 = vmor %vm394_vm3, %vm746_vm15  ;;  %vm1360_vm3 = vcmp.eq.s32.totalorder %v6445_v46, %v8877_v42  ;;  %vm1968_vm6 = vcmp.eq.s32.totalorder %v6445_v46, %v8881_v2  ;;  %8882 = vst [vmem:[#allocation9_spill] sm:$0xff] %v7454_v35  ;;  %v3128_v30 = vadd.f32 %v6009_v63, %v3015_v44 }
 0x2c6   :  { %vm1610_vm1 = vmor %vm1002_vm9, %vm1354_vm12  ;;  %vm753_vm9 = vcmp.eq.s32.totalorder %v6461_v36, %v8876_v38 }
 0x2c7   :  { %vm2218_vm2 = vmor %vm1610_vm1, %vm1962_vm14  ;;  %vm401_vm1 = vcmp.eq.s32.totalorder %v6461_v36, %v8880_v47  ;;  %v7469_v35 = vpop.f32.mrf.mxu1  ;;  %v3241_v44 = vadd.f32 %v6017_v56, %v3128_v30  ;;  %v3018_v30 = vadd.f32 %v6030_v3, %v6000_v23 }
 0x2c8   :  { %4285 = vmatmul.msk.f32.gmra.mxu2 %vm2218_vm2, %v8596_v43  ;;  %vm1003_vm8 = vmor %vm395_vm0, %vm747_vm4  ;;  %vm1361_vm0 = vcmp.eq.s32.totalorder %v6461_v36, %v8877_v42  ;;  %vm1969_vm2 = vcmp.eq.s32.totalorder %v6461_v36, %v8881_v2 }
 0x2c9   :  { %vm1611_vm13 = vmor %vm1003_vm8, %vm1355_vm11  ;;  %vm754_vm8 = vcmp.eq.s32.totalorder %v6475_v60, %v8876_v38  ;;  %v7479_v14 = vpop.f32.mrf.mxu2 }
 0x2ca   :  { %vm2219_vm15 = vmor %vm1611_vm13, %vm1963_vm10  ;;  %v3353_v63 = vpop.f32.mrf.mxu0 }
 0x2cb   :  { %4317 = vmatmul.msk.f32.gmra.mxu3 %vm2219_vm15, %v8596_v43  ;;  %vm1008_vm14 = vmor %vm400_vm5, %vm752_vm7  ;;  %vm1362_vm7 = vcmp.eq.s32.totalorder %v6475_v60, %v8877_v42  ;;  %vm1970_vm15 = vcmp.eq.s32.totalorder %v6475_v60, %v8881_v2 }
 0x2cc   :  { %vm1616_vm12 = vmor %vm1008_vm14, %vm1360_vm3  ;;  %vm402_vm3 = vcmp.eq.s32.totalorder %v6475_v60, %v8880_v47  ;;  %v7487_v9 = vpop.f32.mrf.mxu3 }
 0x2cd   :  { %vm2224_vm4 = vmor %vm1616_vm12, %vm1968_vm6  ;;  %vm755_vm6 = vcmp.eq.s32.totalorder %v6506_v0, %v8876_v38  ;;  %v8883_v38 = vld [vmem:[#allocation7_spill] sm:$0xff] }
 0x2ce   :  { %4222 = vmatmul.msk.f32.gmra.mxu0 %vm2224_vm4, %v8596_v43  ;;  %vm1009_vm10 = vmor %vm401_vm1, %vm753_vm9  ;;  %vm1363_vm9 = vcmp.eq.s32.totalorder %v6506_v0, %v8877_v42  ;;  %vm1971_vm4 = vcmp.eq.s32.totalorder %v6506_v0, %v8881_v2  ;;  %v8884_v2 = vld [vmem:[#allocation26_spill] sm:$0xff]  ;;  %v3354_v42 = vadd.f32 %v3353_v63, %v3241_v44  ;;  %v3131_v44 = vadd.f32 %v6046_v29, %v3018_v30 }
 0x2cf   :  { %vm1617_vm11 = vmor %vm1009_vm10, %vm1361_vm0  ;;  %vm403_vm0 = vcmp.eq.s32.totalorder %v6506_v0, %v8880_v47  ;;  %v3466_v56 = vpop.f32.mrf.mxu1 }
 0x2d0   :  { %vm2225_vm13 = vmor %vm1617_vm11, %vm1969_vm2  ;;  %vm760_vm2 = vcmp.eq.s32.totalorder %v6445_v46, %v5256_v15  ;;  %v3467_v47 = vadd.f32 %v3466_v56, %v3354_v42  ;;  %v8885_v56 = vld [vmem:[#allocation69_spill] sm:$0xff] }
 0x2d1   :  { %4254 = vmatmul.msk.f32.gmra.mxu1 %vm2225_vm13, %v8596_v43  ;;  %vm1010_vm5 = vmor %vm402_vm3, %vm754_vm8  ;;  %vm1368_vm8 = vcmp.eq.s32.totalorder %v6445_v46, %v5377_v31  ;;  %vm1976_vm13 = vcmp.eq.s32.totalorder %v6445_v46, %v8884_v2  ;;  %v3579_v63 = vpop.f32.mrf.mxu2  ;;  %v3244_v30 = vadd.f32 %v8885_v56, %v3131_v44  ;;  %v8890_v44 = vld [vmem:[#allocation67_spill] sm:$0xff]  ;;  %v8892_v56 = vld [vmem:[#allocation73_spill] sm:$0xff] }
 0x2d2   :  { %vm1618_vm14 = vmor %vm1010_vm5, %vm1362_vm7  ;;  %vm408_vm7 = vcmp.eq.s32.totalorder %v6445_v46, %v8883_v38  ;;  %v3580_v3 = vadd.f32 %v3579_v63, %v3467_v47  ;;  %v3356_v42 = vpop.f32.mrf.mxu0  ;;  %v8887_v47 = vld [vmem:[#allocation33_spill] sm:$0xff] }
 0x2d3   :  { %vm2226_vm12 = vmor %vm1618_vm14, %vm1970_vm15  ;;  %vm761_vm15 = vcmp.eq.s32.totalorder %v6461_v36, %v5256_v15 }
 0x2d4   :  { %4286 = vmatmul.msk.f32.gmra.mxu2 %vm2226_vm12, %v8596_v43  ;;  %vm1011_vm1 = vmor %vm403_vm0, %vm755_vm6  ;;  %vm1369_vm6 = vcmp.eq.s32.totalorder %v6461_v36, %v5377_v31  ;;  %vm1977_vm12 = vcmp.eq.s32.totalorder %v6461_v36, %v8884_v2  ;;  %v3692_v23 = vpop.f32.mrf.mxu3 }
 0x2d5   :  { %vm1619_vm10 = vmor %vm1011_vm1, %vm1363_vm9  ;;  %vm409_vm9 = vcmp.eq.s32.totalorder %v6461_v36, %v8883_v38  ;;  %v3693_v29 = vadd.f32 %v3692_v23, %v3580_v3  ;;  %v8891_v3 = vld [vmem:[#allocation72_spill] sm:$0xff] }
 0x2d6   :  { %vm2227_vm11 = vmor %vm1619_vm10, %vm1971_vm4  ;;  %vm762_vm4 = vcmp.eq.s32.totalorder %v6475_v60, %v5256_v15  ;;  %v3021_v23 = vadd.f32 %v8891_v3, %v8890_v44 }
 0x2d7   :  { %4318 = vmatmul.msk.f32.gmra.mxu3 %vm2227_vm11, %v8596_v43  ;;  %vm1016_vm3 = vmor %vm408_vm7, %vm760_vm2  ;;  %vm1370_vm2 = vcmp.eq.s32.totalorder %v6475_v60, %v5377_v31  ;;  %vm1978_vm11 = vcmp.eq.s32.totalorder %v6475_v60, %v8884_v2  ;;  %3788 = vst [vmem:[%s8365_s2] sm:$0xff] %v3693_v29  ;;  %v3469_v63 = vpop.f32.mrf.mxu1 }
 0x2d8   :  { %vm1624_vm5 = vmor %vm1016_vm3, %vm1368_vm8  ;;  %vm410_vm8 = vcmp.eq.s32.totalorder %v6475_v60, %v8883_v38 }
 0x2d9   :  { %vm2232_vm14 = vmor %vm1624_vm5, %vm1976_vm13  ;;  %vm763_vm13 = vcmp.eq.s32.totalorder %v6506_v0, %v5256_v15  ;;  %v8886_v15 = vld [vmem:[#allocation19_spill] sm:$0xff] }
 0x2da   :  { %4223 = vmatmul.msk.f32.gmra.mxu0 %vm2232_vm14, %v8596_v43  ;;  %vm1017_vm0 = vmor %vm409_vm9, %vm761_vm15  ;;  %vm1371_vm15 = vcmp.eq.s32.totalorder %v6506_v0, %v5377_v31  ;;  %vm1979_vm14 = vcmp.eq.s32.totalorder %v6506_v0, %v8884_v2  ;;  %v8888_v31 = vld [vmem:[#allocation29_spill] sm:$0xff]  ;;  %v3357_v2 = vadd.f32 %v3356_v42, %v3244_v30  ;;  %v3582_v42 = vpop.f32.mrf.mxu2  ;;  %v3134_v30 = vadd.f32 %v8892_v56, %v3021_v23  ;;  %v3359_v3 = vpop.f32.mrf.mxu0  ;;  %v8893_v23 = vld [vmem:[#allocation75_spill] sm:$0xff] }
 0x2db   :  { %vm1625_vm1 = vmor %vm1017_vm0, %vm1369_vm6  ;;  %vm411_vm6 = vcmp.eq.s32.totalorder %v6506_v0, %v8883_v38  ;;  %vm768_vm0 = vcmp.eq.s32.totalorder %v6445_v46, %v8887_v47  ;;  %v8889_v38 = vld [vmem:[#allocation35_spill] sm:$0xff] }
 0x2dc   :  { %vm2233_vm10 = vmor %vm1625_vm1, %vm1977_vm12  ;;  %vm416_vm12 = vcmp.eq.s32.totalorder %v6445_v46, %v8886_v15  ;;  %vm1376_vm1 = vcmp.eq.s32.totalorder %v6445_v46, %v8888_v31  ;;  %v3470_v29 = vadd.f32 %v3469_v63, %v3357_v2  ;;  %v3695_v2 = vpop.f32.mrf.mxu3 }
 0x2dd   :  { %4255 = vmatmul.msk.f32.gmra.mxu1 %vm2233_vm10, %v8596_v43  ;;  %vm1018_vm7 = vmor %vm410_vm8, %vm762_vm4  ;;  %vm1984_vm10 = vcmp.eq.s32.totalorder %v6445_v46, %v8889_v38 }
 0x2de   :  { %vm1626_vm3 = vmor %vm1018_vm7, %vm1370_vm2  ;;  %vm769_vm7 = vcmp.eq.s32.totalorder %v6461_v36, %v8887_v47  ;;  %v3583_v44 = vadd.f32 %v3582_v42, %v3470_v29  ;;  %v3247_v29 = vadd.f32 %v8893_v23, %v3134_v30  ;;  %v8898_v30 = vld [vmem:[#allocation74_spill] sm:$0xff]  ;;  %v8900_v23 = vld [vmem:[#allocation80_spill] sm:$0xff] }
 0x2df   :  { %vm2234_vm5 = vmor %vm1626_vm3, %vm1978_vm11  ;;  %vm417_vm11 = vcmp.eq.s32.totalorder %v6461_v36, %v8886_v15  ;;  %vm1377_vm3 = vcmp.eq.s32.totalorder %v6461_v36, %v8888_v31  ;;  %v3472_v56 = vpop.f32.mrf.mxu1 }
 0x2e0   :  { %4287 = vmatmul.msk.f32.gmra.mxu2 %vm2234_vm5, %v8596_v43  ;;  %vm1019_vm9 = vmor %vm411_vm6, %vm763_vm13  ;;  %vm1985_vm5 = vcmp.eq.s32.totalorder %v6461_v36, %v8889_v38  ;;  %v3696_v63 = vadd.f32 %v3695_v2, %v3583_v44  ;;  %v3360_v42 = vadd.f32 %v3359_v3, %v3247_v29  ;;  %v8899_v44 = vld [vmem:[#allocation78_spill] sm:$0xff] }
 0x2e1   :  { %vm1627_vm4 = vmor %vm1019_vm9, %vm1371_vm15  ;;  %vm770_vm9 = vcmp.eq.s32.totalorder %v6475_v60, %v8887_v47  ;;  %v3024_v2 = vadd.f32 %v8899_v44, %v8898_v30 }
 0x2e2   :  { %vm2235_vm2 = vmor %vm1627_vm4, %vm1979_vm14  ;;  %vm418_vm14 = vcmp.eq.s32.totalorder %v6475_v60, %v8886_v15  ;;  %3789 = vst [vmem:[%s8365_s2 + $0x8] sm:$0xff] %v3696_v63  ;;  %v3473_v63 = vadd.f32 %v3472_v56, %v3360_v42  ;;  %v3585_v3 = vpop.f32.mrf.mxu2  ;;  %v3362_v44 = vpop.f32.mrf.mxu0 }
 0x2e3   :  { %4319 = vmatmul.msk.f32.gmra.mxu3 %vm2235_vm2, %v8596_v43  ;;  %vm1024_vm8 = vmor %vm416_vm12, %vm768_vm0  ;;  %vm1378_vm0 = vcmp.eq.s32.totalorder %v6475_v60, %v8888_v31  ;;  %v3137_v29 = vadd.f32 %v8900_v23, %v3024_v2  ;;  %v8901_v2 = vld [vmem:[#allocation82_spill] sm:$0xff] }
 0x2e4   :  { %vm1632_vm13 = vmor %vm1024_vm8, %vm1376_vm1  ;;  %vm1986_vm1 = vcmp.eq.s32.totalorder %v6475_v60, %v8889_v38  ;;  %vm771_vm8 = vcmp.eq.s32.totalorder %v6506_v0, %v8887_v47  ;;  %v8895_v47 = vld [vmem:[#allocation25_spill] sm:$0xff]  ;;  %v3586_v30 = vadd.f32 %v3585_v3, %v3473_v63  ;;  %v3698_v42 = vpop.f32.mrf.mxu3 }
 0x2e5   :  { %vm2240_vm15 = vmor %vm1632_vm13, %vm1984_vm10  ;;  %vm419_vm10 = vcmp.eq.s32.totalorder %v6506_v0, %v8886_v15  ;;  %v8894_v15 = vld [vmem:[#allocation32_spill] sm:$0xff]  ;;  %v3250_v63 = vadd.f32 %v8901_v2, %v3137_v29  ;;  %v8906_v29 = vld [vmem:[#allocation79_spill] sm:$0xff] }
 0x2e6   :  { %4224 = vmatmul.msk.f32.gmra.mxu0 %vm2240_vm15, %v8596_v43  ;;  %vm1025_vm6 = vmor %vm417_vm11, %vm769_vm7  ;;  %vm1379_vm7 = vcmp.eq.s32.totalorder %v6506_v0, %v8888_v31  ;;  %v8896_v31 = vld [vmem:[#allocation37_spill] sm:$0xff]  ;;  %v3699_v56 = vadd.f32 %v3698_v42, %v3586_v30  ;;  %v8908_v2 = vld [vmem:[#allocation86_spill] sm:$0xff] }
 0x2e7   :  { %vm1633_vm12 = vmor %vm1025_vm6, %vm1377_vm3  ;;  %vm1987_vm3 = vcmp.eq.s32.totalorder %v6506_v0, %v8889_v38  ;;  %vm776_vm6 = vcmp.eq.s32.totalorder %v6445_v46, %v8895_v47  ;;  %v8897_v38 = vld [vmem:[#allocation34_spill] sm:$0xff]  ;;  %v3363_v3 = vadd.f32 %v3362_v44, %v3250_v63  ;;  %v3475_v23 = vpop.f32.mrf.mxu1  ;;  %v8907_v30 = vld [vmem:[#allocation85_spill] sm:$0xff] }
 0x2e8   :  { %vm2241_vm4 = vmor %vm1633_vm12, %vm1985_vm5  ;;  %vm424_vm5 = vcmp.eq.s32.totalorder %v6445_v46, %v8894_v15  ;;  %3790 = vst [vmem:[%s8365_s2 + $0x10] sm:$0xff] %v3699_v56  ;;  %v3027_v42 = vadd.f32 %v8907_v30, %v8906_v29 }
 0x2e9   :  { %4256 = vmatmul.msk.f32.gmra.mxu1 %vm2241_vm4, %v8596_v43  ;;  %vm1026_vm2 = vmor %vm418_vm14, %vm770_vm9  ;;  %vm1384_vm9 = vcmp.eq.s32.totalorder %v6445_v46, %v8896_v31  ;;  %v3476_v56 = vadd.f32 %v3475_v23, %v3363_v3 }
 0x2ea   :  { %vm1634_vm11 = vmor %vm1026_vm2, %vm1378_vm0  ;;  %vm1992_vm0 = vcmp.eq.s32.totalorder %v6445_v46, %v8897_v38  ;;  %vm777_vm2 = vcmp.eq.s32.totalorder %v6461_v36, %v8895_v47  ;;  %v3588_v44 = vpop.f32.mrf.mxu2  ;;  %v3140_v63 = vadd.f32 %v8908_v2, %v3027_v42  ;;  %v3365_v30 = vpop.f32.mrf.mxu0  ;;  %v8909_v42 = vld [vmem:[#allocation88_spill] sm:$0xff] }
 0x2eb   :  { %vm2242_vm13 = vmor %vm1634_vm11, %vm1986_vm1  ;;  %vm425_vm1 = vcmp.eq.s32.totalorder %v6461_v36, %v8894_v15  ;;  %v3589_v29 = vadd.f32 %v3588_v44, %v3476_v56 }
 0x2ec   :  { %4288 = vmatmul.msk.f32.gmra.mxu2 %vm2242_vm13, %v8596_v43  ;;  %vm1027_vm15 = vmor %vm419_vm10, %vm771_vm8  ;;  %vm1385_vm8 = vcmp.eq.s32.totalorder %v6461_v36, %v8896_v31  ;;  %v3701_v3 = vpop.f32.mrf.mxu3  ;;  %v3253_v56 = vadd.f32 %v8909_v42, %v3140_v63  ;;  %v8914_v63 = vld [vmem:[#allocation87_spill] sm:$0xff]  ;;  %v8916_v42 = vld [vmem:[#allocation94_spill] sm:$0xff] }
 0x2ed   :  { %vm1635_vm14 = vmor %vm1027_vm15, %vm1379_vm7  ;;  %vm1993_vm7 = vcmp.eq.s32.totalorder %v6461_v36, %v8897_v38  ;;  %vm778_vm15 = vcmp.eq.s32.totalorder %v6475_v60, %v8895_v47  ;;  %v3702_v23 = vadd.f32 %v3701_v3, %v3589_v29  ;;  %v8915_v29 = vld [vmem:[#allocation91_spill] sm:$0xff] }
 0x2ee   :  { %vm2243_vm12 = vmor %vm1635_vm14, %vm1987_vm3  ;;  %vm426_vm3 = vcmp.eq.s32.totalorder %v6475_v60, %v8894_v15  ;;  %v3366_v44 = vadd.f32 %v3365_v30, %v3253_v56  ;;  %v3030_v3 = vadd.f32 %v8915_v29, %v8914_v63 }
 0x2ef   :  { %4320 = vmatmul.msk.f32.gmra.mxu3 %vm2243_vm12, %v8596_v43  ;;  %vm1032_vm4 = vmor %vm424_vm5, %vm776_vm6  ;;  %vm1386_vm6 = vcmp.eq.s32.totalorder %v6475_v60, %v8896_v31  ;;  %3791 = vst [vmem:[%s8365_s2 + $0x18] sm:$0xff] %v3702_v23  ;;  %v3478_v2 = vpop.f32.mrf.mxu1 }
 0x2f0   :  { %vm1640_vm10 = vmor %vm1032_vm4, %vm1384_vm9  ;;  %vm1994_vm9 = vcmp.eq.s32.totalorder %v6475_v60, %v8897_v38  ;;  %vm779_vm4 = vcmp.eq.s32.totalorder %v6506_v0, %v8895_v47  ;;  %v8903_v47 = vld [vmem:[#allocation36_spill] sm:$0xff]  ;;  %v3479_v23 = vadd.f32 %v3478_v2, %v3366_v44  ;;  %v3143_v56 = vadd.f32 %v8916_v42, %v3030_v3 }
 0x2f1   :  { %vm2248_vm11 = vmor %vm1640_vm10, %vm1992_vm0  ;;  %vm427_vm0 = vcmp.eq.s32.totalorder %v6506_v0, %v8894_v15  ;;  %v8902_v15 = vld [vmem:[#allocation39_spill] sm:$0xff]  ;;  %v8917_v3 = vld [vmem:[#allocation96_spill] sm:$0xff] }
 0x2f2   :  { %4225 = vmatmul.msk.f32.gmra.mxu0 %vm2248_vm11, %v8596_v43  ;;  %vm1033_vm13 = vmor %vm425_vm1, %vm777_vm2  ;;  %vm1387_vm2 = vcmp.eq.s32.totalorder %v6506_v0, %v8896_v31  ;;  %v8904_v31 = vld [vmem:[#allocation41_spill] sm:$0xff]  ;;  %v3591_v30 = vpop.f32.mrf.mxu2  ;;  %v3368_v29 = vpop.f32.mrf.mxu0 }
 0x2f3   :  { %vm1641_vm5 = vmor %vm1033_vm13, %vm1385_vm8  ;;  %vm1995_vm8 = vcmp.eq.s32.totalorder %v6506_v0, %v8897_v38  ;;  %vm784_vm13 = vcmp.eq.s32.totalorder %v6445_v46, %v8903_v47  ;;  %v8905_v38 = vld [vmem:[#allocation42_spill] sm:$0xff]  ;;  %v3592_v63 = vadd.f32 %v3591_v30, %v3479_v23  ;;  %v3256_v23 = vadd.f32 %v8917_v3, %v3143_v56  ;;  %v8919_v30 = vld [vmem:[#allocation44_spill] sm:$0xff] }
 0x2f4   :  { %vm2249_vm14 = vmor %vm1641_vm5, %vm1993_vm7  ;;  %vm432_vm7 = vcmp.eq.s32.totalorder %v6445_v46, %v8902_v15  ;;  %v3704_v44 = vpop.f32.mrf.mxu3  ;;  %v8922_v56 = vld [vmem:[#allocation93_spill] sm:$0xff]  ;;  %v8924_v3 = vld [vmem:[#allocation100_spill] sm:$0xff] }
 0x2f5   :  { %4257 = vmatmul.msk.f32.gmra.mxu1 %vm2249_vm14, %v8596_v43  ;;  %vm1034_vm12 = vmor %vm426_vm3, %vm778_vm15  ;;  %vm1392_vm15 = vcmp.eq.s32.totalorder %v6445_v46, %v8904_v31  ;;  %v3705_v2 = vadd.f32 %v3704_v44, %v3592_v63  ;;  %v8923_v63 = vld [vmem:[#allocation98_spill] sm:$0xff] }
 0x2f6   :  { %vm1642_vm1 = vmor %vm1034_vm12, %vm1386_vm6  ;;  %vm2000_vm6 = vcmp.eq.s32.totalorder %v6445_v46, %v8905_v38  ;;  %vm785_vm12 = vcmp.eq.s32.totalorder %v6461_v36, %v8903_v47  ;;  %v3033_v44 = vadd.f32 %v8923_v63, %v8922_v56 }
 0x2f7   :  { %vm2250_vm10 = vmor %vm1642_vm1, %vm1994_vm9  ;;  %vm433_vm9 = vcmp.eq.s32.totalorder %v6461_v36, %v8902_v15  ;;  %3792 = vst [vmem:[%s8365_s2 + $0x20] sm:$0xff] %v3705_v2  ;;  %v3481_v42 = vpop.f32.mrf.mxu1 }
 0x2f8   :  { %4289 = vmatmul.msk.f32.gmra.mxu2 %vm2250_vm10, %v8596_v43  ;;  %vm1035_vm11 = vmor %vm427_vm0, %vm779_vm4  ;;  %vm1393_vm4 = vcmp.eq.s32.totalorder %v6461_v36, %v8904_v31 }
 0x2f9   :  { %vm1643_vm3 = vmor %vm1035_vm11, %vm1387_vm2  ;;  %vm2001_vm2 = vcmp.eq.s32.totalorder %v6461_v36, %v8905_v38  ;;  %vm786_vm11 = vcmp.eq.s32.totalorder %v6475_v60, %v8903_v47 }
 0x2fa   :  { %vm2251_vm5 = vmor %vm1643_vm3, %vm1995_vm8  ;;  %vm434_vm8 = vcmp.eq.s32.totalorder %v6475_v60, %v8902_v15  ;;  %v3371_v63 = vpop.f32.mrf.mxu0 }
 0x2fb   :  { %4321 = vmatmul.msk.f32.gmra.mxu3 %vm2251_vm5, %v8596_v43  ;;  %vm1040_vm14 = vmor %vm432_vm7, %vm784_vm13  ;;  %vm1394_vm13 = vcmp.eq.s32.totalorder %v6475_v60, %v8904_v31 }
 0x2fc   :  { %vm1648_vm0 = vmor %vm1040_vm14, %vm1392_vm15  ;;  %vm2002_vm15 = vcmp.eq.s32.totalorder %v6475_v60, %v8905_v38  ;;  %vm787_vm14 = vcmp.eq.s32.totalorder %v6506_v0, %v8903_v47  ;;  %v8911_v47 = vld [vmem:[#allocation40_spill] sm:$0xff] }
 0x2fd   :  { %vm2256_vm1 = vmor %vm1648_vm0, %vm2000_vm6  ;;  %vm435_vm6 = vcmp.eq.s32.totalorder %v6506_v0, %v8902_v15  ;;  %v8910_v15 = vld [vmem:[#allocation45_spill] sm:$0xff] }
 0x2fe   :  { %4226 = vmatmul.msk.f32.gmra.mxu0 %vm2256_vm1, %v8596_v43  ;;  %vm1041_vm10 = vmor %vm433_vm9, %vm785_vm12  ;;  %vm1395_vm12 = vcmp.eq.s32.totalorder %v6506_v0, %v8904_v31  ;;  %v8912_v31 = vld [vmem:[#allocation38_spill] sm:$0xff] }
 0x2ff   :  { %vm1649_vm7 = vmor %vm1041_vm10, %vm1393_vm4  ;;  %vm2003_vm4 = vcmp.eq.s32.totalorder %v6506_v0, %v8905_v38  ;;  %v8913_v38 = vld [vmem:[#allocation46_spill] sm:$0xff] }
 0x300   :  { %vm2257_vm3 = vmor %vm1649_vm7, %vm2001_vm2  ;;  %vm792_vm2 = vcmp.eq.s32.totalorder %v6445_v46, %v8910_v15  ;;  %vm440_vm7 = vcmp.eq.s32.totalorder %v6445_v46, %v8912_v31 }
 0x301   :  { %4258 = vmatmul.msk.f32.gmra.mxu1 %vm2257_vm3, %v8596_v43  ;;  %vm1042_vm5 = vmor %vm434_vm8, %vm786_vm11  ;;  %vm1400_vm8 = vcmp.eq.s32.totalorder %v6445_v46, %v8911_v47 }
 0x302   :  { %vm1650_vm9 = vmor %vm1042_vm5, %vm1394_vm13  ;;  %vm2008_vm13 = vcmp.eq.s32.totalorder %v6445_v46, %v8913_v38 }
 0x303   :  { %vm2258_vm0 = vmor %vm1650_vm9, %vm2002_vm15  ;;  %vm793_vm15 = vcmp.eq.s32.totalorder %v6461_v36, %v8910_v15  ;;  %vm441_vm9 = vcmp.eq.s32.totalorder %v6461_v36, %v8912_v31 }
 0x304   :  { %4290 = vmatmul.msk.f32.gmra.mxu2 %vm2258_vm0, %v8596_v43  ;;  %vm1043_vm1 = vmor %vm435_vm6, %vm787_vm14  ;;  %vm1401_vm6 = vcmp.eq.s32.totalorder %v6461_v36, %v8911_v47 }
 0x305   :  { %vm1651_vm10 = vmor %vm1043_vm1, %vm1395_vm12  ;;  %vm2009_vm12 = vcmp.eq.s32.totalorder %v6461_v36, %v8913_v38 }
 0x306   :  { %vm2259_vm11 = vmor %vm1651_vm10, %vm2003_vm4  ;;  %vm794_vm4 = vcmp.eq.s32.totalorder %v6475_v60, %v8910_v15 }
 0x307   :  { %4322 = vmatmul.msk.f32.gmra.mxu3 %vm2259_vm11, %v8596_v43  ;;  %vm1048_vm3 = vmor %vm440_vm7, %vm792_vm2  ;;  %vm1402_vm2 = vcmp.eq.s32.totalorder %v6475_v60, %v8911_v47  ;;  %vm2010_vm11 = vcmp.eq.s32.totalorder %v6475_v60, %v8913_v38 }
 0x308   :  { %vm1656_vm5 = vmor %vm1048_vm3, %vm1400_vm8  ;;  %vm442_vm8 = vcmp.eq.s32.totalorder %v6475_v60, %v8912_v31 }
 0x309   :  { %vm2264_vm14 = vmor %vm1656_vm5, %vm2008_vm13  ;;  %vm795_vm13 = vcmp.eq.s32.totalorder %v6506_v0, %v8910_v15  ;;  %v8918_v15 = vld [vmem:[#allocation48_spill] sm:$0xff] }
 0x30a   :  { %4227 = vmatmul.msk.f32.gmra.mxu0 %vm2264_vm14, %v8596_v43  ;;  %vm1049_vm0 = vmor %vm441_vm9, %vm793_vm15  ;;  %vm1403_vm15 = vcmp.eq.s32.totalorder %v6506_v0, %v8911_v47  ;;  %vm2011_vm14 = vcmp.eq.s32.totalorder %v6506_v0, %v8913_v38  ;;  %v8920_v47 = vld [vmem:[#allocation51_spill] sm:$0xff]  ;;  %v3369_v38 = vadd.f32 %v3368_v29, %v3256_v23  ;;  %v3594_v29 = vpop.f32.mrf.mxu2  ;;  %v3146_v23 = vadd.f32 %v8924_v3, %v3033_v44  ;;  %v8925_v44 = vld [vmem:[#allocation102_spill] sm:$0xff]  ;;  %v3484_v3 = vpop.f32.mrf.mxu1 }
 0x30b   :  { %vm1657_vm1 = vmor %vm1049_vm0, %vm1401_vm6  ;;  %vm443_vm6 = vcmp.eq.s32.totalorder %v6506_v0, %v8912_v31  ;;  %vm800_vm0 = vcmp.eq.s32.totalorder %v6445_v46, %v8919_v30  ;;  %v8921_v31 = vld [vmem:[#allocation47_spill] sm:$0xff] }
 0x30c   :  { %vm2265_vm10 = vmor %vm1657_vm1, %vm2009_vm12  ;;  %vm448_vm12 = vcmp.eq.s32.totalorder %v6445_v46, %v8918_v15  ;;  %vm1408_vm1 = vcmp.eq.s32.totalorder %v6445_v46, %v8920_v47  ;;  %v3482_v2 = vadd.f32 %v3481_v42, %v3369_v38  ;;  %v3707_v38 = vpop.f32.mrf.mxu3 }
 0x30d   :  { %4259 = vmatmul.msk.f32.gmra.mxu1 %vm2265_vm10, %v8596_v43  ;;  %vm1050_vm7 = vmor %vm442_vm8, %vm794_vm4  ;;  %vm2016_vm10 = vcmp.eq.s32.totalorder %v6445_v46, %v8921_v31 }
 0x30e   :  { %vm1658_vm3 = vmor %vm1050_vm7, %vm1402_vm2  ;;  %vm801_vm7 = vcmp.eq.s32.totalorder %v6461_v36, %v8919_v30  ;;  %v3595_v56 = vadd.f32 %v3594_v29, %v3482_v2  ;;  %v3259_v2 = vadd.f32 %v8925_v44, %v3146_v23  ;;  %v8930_v23 = vld [vmem:[#allocation99_spill] sm:$0xff]  ;;  %v8932_v44 = vld [vmem:[#allocation105_spill] sm:$0xff] }
 0x30f   :  { %vm2266_vm5 = vmor %vm1658_vm3, %vm2010_vm11  ;;  %vm449_vm11 = vcmp.eq.s32.totalorder %v6461_v36, %v8918_v15  ;;  %vm1409_vm3 = vcmp.eq.s32.totalorder %v6461_v36, %v8920_v47 }
 0x310   :  { %4291 = vmatmul.msk.f32.gmra.mxu2 %vm2266_vm5, %v8596_v43  ;;  %vm1051_vm9 = vmor %vm443_vm6, %vm795_vm13  ;;  %vm2017_vm5 = vcmp.eq.s32.totalorder %v6461_v36, %v8921_v31  ;;  %v3708_v42 = vadd.f32 %v3707_v38, %v3595_v56  ;;  %v3372_v29 = vadd.f32 %v3371_v63, %v3259_v2  ;;  %v8931_v56 = vld [vmem:[#allocation104_spill] sm:$0xff] }
 0x311   :  { %vm1659_vm4 = vmor %vm1051_vm9, %vm1403_vm15  ;;  %vm802_vm9 = vcmp.eq.s32.totalorder %v6475_v60, %v8919_v30  ;;  %v3036_v38 = vadd.f32 %v8931_v56, %v8930_v23  ;;  %v3374_v56 = vpop.f32.mrf.mxu0 }
 0x312   :  { %vm2267_vm2 = vmor %vm1659_vm4, %vm2011_vm14  ;;  %vm450_vm14 = vcmp.eq.s32.totalorder %v6475_v60, %v8918_v15  ;;  %3793 = vst [vmem:[%s8365_s2 + $0x28] sm:$0xff] %v3708_v42  ;;  %v3485_v42 = vadd.f32 %v3484_v3, %v3372_v29  ;;  %v3597_v63 = vpop.f32.mrf.mxu2 }
 0x313   :  { %4323 = vmatmul.msk.f32.gmra.mxu3 %vm2267_vm2, %v8596_v43  ;;  %vm1056_vm8 = vmor %vm448_vm12, %vm800_vm0  ;;  %vm1410_vm0 = vcmp.eq.s32.totalorder %v6475_v60, %v8920_v47  ;;  %v3149_v2 = vadd.f32 %v8932_v44, %v3036_v38  ;;  %v8933_v38 = vld [vmem:[#allocation108_spill] sm:$0xff]  ;;  %v3487_v44 = vpop.f32.mrf.mxu1 }
 0x314   :  { %vm1664_vm13 = vmor %vm1056_vm8, %vm1408_vm1  ;;  %vm2018_vm1 = vcmp.eq.s32.totalorder %v6475_v60, %v8921_v31  ;;  %vm803_vm8 = vcmp.eq.s32.totalorder %v6506_v0, %v8919_v30  ;;  %v8927_v30 = vld [vmem:[#allocation53_spill] sm:$0xff]  ;;  %v3598_v23 = vadd.f32 %v3597_v63, %v3485_v42  ;;  %v3710_v29 = vpop.f32.mrf.mxu3 }
 0x315   :  { %vm2272_vm15 = vmor %vm1664_vm13, %vm2016_vm10  ;;  %vm451_vm10 = vcmp.eq.s32.totalorder %v6506_v0, %v8918_v15  ;;  %v8926_v15 = vld [vmem:[#allocation54_spill] sm:$0xff]  ;;  %v3262_v42 = vadd.f32 %v8933_v38, %v3149_v2  ;;  %v8938_v2 = vld [vmem:[#allocation107_spill] sm:$0xff] }
 0x316   :  { %4228 = vmatmul.msk.f32.gmra.mxu0 %vm2272_vm15, %v8596_v43  ;;  %vm1057_vm6 = vmor %vm449_vm11, %vm801_vm7  ;;  %vm1411_vm7 = vcmp.eq.s32.totalorder %v6506_v0, %v8920_v47  ;;  %v8928_v47 = vld [vmem:[#allocation49_spill] sm:$0xff]  ;;  %v3711_v3 = vadd.f32 %v3710_v29, %v3598_v23  ;;  %v8939_v23 = vld [vmem:[#allocation111_spill] sm:$0xff] }
 0x317   :  { %vm1665_vm12 = vmor %vm1057_vm6, %vm1409_vm3  ;;  %vm2019_vm3 = vcmp.eq.s32.totalorder %v6506_v0, %v8921_v31  ;;  %vm808_vm6 = vcmp.eq.s32.totalorder %v6445_v46, %v8927_v30  ;;  %v8929_v31 = vld [vmem:[#allocation56_spill] sm:$0xff]  ;;  %v3375_v63 = vadd.f32 %v3374_v56, %v3262_v42  ;;  %v3039_v29 = vadd.f32 %v8939_v23, %v8938_v2  ;;  %v8940_v38 = vld [vmem:[#allocation113_spill] sm:$0xff] }
 0x318   :  { %vm2273_vm4 = vmor %vm1665_vm12, %vm2017_vm5  ;;  %vm456_vm5 = vcmp.eq.s32.totalorder %v6445_v46, %v8926_v15  ;;  %3794 = vst [vmem:[%s8365_s2 + $0x30] sm:$0xff] %v3711_v3 }
 0x319   :  { %4260 = vmatmul.msk.f32.gmra.mxu1 %vm2273_vm4, %v8596_v43  ;;  %vm1058_vm2 = vmor %vm450_vm14, %vm802_vm9  ;;  %vm1416_vm9 = vcmp.eq.s32.totalorder %v6445_v46, %v8928_v47  ;;  %v3488_v3 = vadd.f32 %v3487_v44, %v3375_v63  ;;  %v3152_v42 = vadd.f32 %v8940_v38, %v3039_v29  ;;  %v3377_v23 = vpop.f32.mrf.mxu0  ;;  %v8941_v29 = vld [vmem:[#allocation114_spill] sm:$0xff]  ;;  %v8946_v38 = vld [vmem:[#allocation112_spill] sm:$0xff] }
 0x31a   :  { %vm1666_vm11 = vmor %vm1058_vm2, %vm1410_vm0  ;;  %vm2024_vm0 = vcmp.eq.s32.totalorder %v6445_v46, %v8929_v31  ;;  %vm809_vm2 = vcmp.eq.s32.totalorder %v6461_v36, %v8927_v30  ;;  %v3600_v56 = vpop.f32.mrf.mxu2 }
 0x31b   :  { %vm2274_vm13 = vmor %vm1666_vm11, %vm2018_vm1  ;;  %vm457_vm1 = vcmp.eq.s32.totalorder %v6461_v36, %v8926_v15  ;;  %v3601_v2 = vadd.f32 %v3600_v56, %v3488_v3  ;;  %v3265_v3 = vadd.f32 %v8941_v29, %v3152_v42  ;;  %v8945_v56 = vld [vmem:[#allocation43_spill] sm:$0xff]  ;;  %v8947_v42 = vld [vmem:[#allocation117_spill] sm:$0xff] }
 0x31c   :  { %4292 = vmatmul.msk.f32.gmra.mxu2 %vm2274_vm13, %v8596_v43  ;;  %vm1059_vm15 = vmor %vm451_vm10, %vm803_vm8  ;;  %vm1417_vm8 = vcmp.eq.s32.totalorder %v6461_v36, %v8928_v47  ;;  %v3713_v63 = vpop.f32.mrf.mxu3  ;;  %v8948_v29 = vld [vmem:[#allocation118_spill] sm:$0xff] }
 0x31d   :  { %vm1667_vm14 = vmor %vm1059_vm15, %vm1411_vm7  ;;  %vm2025_vm7 = vcmp.eq.s32.totalorder %v6461_v36, %v8929_v31  ;;  %vm810_vm15 = vcmp.eq.s32.totalorder %v6475_v60, %v8927_v30  ;;  %v3714_v44 = vadd.f32 %v3713_v63, %v3601_v2  ;;  %v3042_v2 = vadd.f32 %v8947_v42, %v8946_v38  ;;  %v3490_v63 = vpop.f32.mrf.mxu1 }
 0x31e   :  { %vm2275_vm12 = vmor %vm1667_vm14, %vm2019_vm3  ;;  %vm458_vm3 = vcmp.eq.s32.totalorder %v6475_v60, %v8926_v15 }
 0x31f   :  { %4324 = vmatmul.msk.f32.gmra.mxu3 %vm2275_vm12, %v8596_v43  ;;  %vm1064_vm4 = vmor %vm456_vm5, %vm808_vm6  ;;  %vm1418_vm6 = vcmp.eq.s32.totalorder %v6475_v60, %v8928_v47  ;;  %3795 = vst [vmem:[%s8365_s2 + $0x38] sm:$0xff] %v3714_v44 }
 0x320   :  { %vm1672_vm10 = vmor %vm1064_vm4, %vm1416_vm9  ;;  %vm2026_vm9 = vcmp.eq.s32.totalorder %v6475_v60, %v8929_v31  ;;  %vm811_vm4 = vcmp.eq.s32.totalorder %v6506_v0, %v8927_v30  ;;  %v8935_v30 = vld [vmem:[#allocation28_spill] sm:$0xff] }
 0x321   :  { %vm2280_vm11 = vmor %vm1672_vm10, %vm2024_vm0  ;;  %vm459_vm0 = vcmp.eq.s32.totalorder %v6506_v0, %v8926_v15  ;;  %v8934_v15 = vld [vmem:[#allocation52_spill] sm:$0xff] }
 0x322   :  { %4229 = vmatmul.msk.f32.gmra.mxu0 %vm2280_vm11, %v8596_v43  ;;  %vm1065_vm13 = vmor %vm457_vm1, %vm809_vm2  ;;  %vm1419_vm2 = vcmp.eq.s32.totalorder %v6506_v0, %v8928_v47  ;;  %v8936_v47 = vld [vmem:[#allocation58_spill] sm:$0xff] }
 0x323   :  { %vm1673_vm5 = vmor %vm1065_vm13, %vm1417_vm8  ;;  %vm2027_vm8 = vcmp.eq.s32.totalorder %v6506_v0, %v8929_v31  ;;  %vm816_vm13 = vcmp.eq.s32.totalorder %v6445_v46, %v8935_v30  ;;  %v8937_v31 = vld [vmem:[#allocation55_spill] sm:$0xff] }
 0x324   :  { %vm2281_vm14 = vmor %vm1673_vm5, %vm2025_vm7  ;;  %vm464_vm7 = vcmp.eq.s32.totalorder %v6445_v46, %v8934_v15 }
 0x325   :  { %4261 = vmatmul.msk.f32.gmra.mxu1 %vm2281_vm14, %v8596_v43  ;;  %vm1066_vm12 = vmor %vm458_vm3, %vm810_vm15  ;;  %vm1424_vm15 = vcmp.eq.s32.totalorder %v6445_v46, %v8936_v47 }
 0x326   :  { %vm1674_vm1 = vmor %vm1066_vm12, %vm1418_vm6  ;;  %vm2032_vm6 = vcmp.eq.s32.totalorder %v6445_v46, %v8937_v31  ;;  %vm817_vm12 = vcmp.eq.s32.totalorder %v6461_v36, %v8935_v30 }
 0x327   :  { %vm2282_vm10 = vmor %vm1674_vm1, %vm2026_vm9  ;;  %vm465_vm9 = vcmp.eq.s32.totalorder %v6461_v36, %v8934_v15 }
 0x328   :  { %4293 = vmatmul.msk.f32.gmra.mxu2 %vm2282_vm10, %v8596_v43  ;;  %vm1067_vm11 = vmor %vm459_vm0, %vm811_vm4  ;;  %vm1425_vm4 = vcmp.eq.s32.totalorder %v6461_v36, %v8936_v47 }
 0x329   :  { %vm1675_vm3 = vmor %vm1067_vm11, %vm1419_vm2  ;;  %vm2033_vm2 = vcmp.eq.s32.totalorder %v6461_v36, %v8937_v31  ;;  %vm818_vm11 = vcmp.eq.s32.totalorder %v6475_v60, %v8935_v30 }
 0x32a   :  { %vm2283_vm5 = vmor %vm1675_vm3, %vm2027_vm8  ;;  %vm466_vm8 = vcmp.eq.s32.totalorder %v6475_v60, %v8934_v15 }
 0x32b   :  { %4325 = vmatmul.msk.f32.gmra.mxu3 %vm2283_vm5, %v8596_v43  ;;  %vm1072_vm14 = vmor %vm464_vm7, %vm816_vm13  ;;  %vm1426_vm13 = vcmp.eq.s32.totalorder %v6475_v60, %v8936_v47 }
 0x32c   :  { %vm1680_vm0 = vmor %vm1072_vm14, %vm1424_vm15  ;;  %vm2034_vm15 = vcmp.eq.s32.totalorder %v6475_v60, %v8937_v31  ;;  %vm819_vm14 = vcmp.eq.s32.totalorder %v6506_v0, %v8935_v30  ;;  %v8943_v30 = vld [vmem:[#allocation57_spill] sm:$0xff] }
 0x32d   :  { %vm2288_vm1 = vmor %vm1680_vm0, %vm2032_vm6  ;;  %vm467_vm6 = vcmp.eq.s32.totalorder %v6506_v0, %v8934_v15  ;;  %v8942_v15 = vld [vmem:[#allocation60_spill] sm:$0xff] }
 0x32e   :  { %4230 = vmatmul.msk.f32.gmra.mxu0 %vm2288_vm1, %v8596_v43  ;;  %vm1073_vm10 = vmor %vm465_vm9, %vm817_vm12  ;;  %vm1427_vm12 = vcmp.eq.s32.totalorder %v6506_v0, %v8936_v47  ;;  %v8944_v47 = vld [vmem:[#allocation62_spill] sm:$0xff] }
 0x32f   :  { %vm1681_vm7 = vmor %vm1073_vm10, %vm1425_vm4  ;;  %vm2035_vm4 = vcmp.eq.s32.totalorder %v6506_v0, %v8937_v31  ;;  %vm824_vm10 = vcmp.eq.s32.totalorder %v6445_v46, %v8943_v30  ;;  %v3378_v31 = vadd.f32 %v3377_v23, %v3265_v3  ;;  %v3603_v23 = vpop.f32.mrf.mxu2  ;;  %v3155_v3 = vadd.f32 %v8948_v29, %v3042_v2  ;;  %v3380_v2 = vpop.f32.mrf.mxu0 }
 0x330   :  { %vm2289_vm3 = vmor %vm1681_vm7, %vm2033_vm2  ;;  %vm472_vm2 = vcmp.eq.s32.totalorder %v6445_v46, %v8942_v15  ;;  %vm2040_vm7 = vcmp.eq.s32.totalorder %v6445_v46, %v8944_v47 }
 0x331   :  { %4262 = vmatmul.msk.f32.gmra.mxu1 %vm2289_vm3, %v8596_v43  ;;  %vm1074_vm5 = vmor %vm466_vm8, %vm818_vm11  ;;  %vm1432_vm3 = vcmp.eq.s32.totalorder %v6445_v46, %v8945_v56  ;;  %v3491_v44 = vadd.f32 %v3490_v63, %v3378_v31  ;;  %v3716_v31 = vpop.f32.mrf.mxu3  ;;  %v8949_v63 = vld [vmem:[#allocation120_spill] sm:$0xff] }
 0x332   :  { %vm1682_vm9 = vmor %vm1074_vm5, %vm1426_vm13  ;;  %vm825_vm5 = vcmp.eq.s32.totalorder %v6461_v36, %v8943_v30 }
 0x333   :  { %vm2290_vm0 = vmor %vm1682_vm9, %vm2034_vm15  ;;  %vm473_vm15 = vcmp.eq.s32.totalorder %v6461_v36, %v8942_v15  ;;  %vm2041_vm9 = vcmp.eq.s32.totalorder %v6461_v36, %v8944_v47  ;;  %v3604_v38 = vadd.f32 %v3603_v23, %v3491_v44  ;;  %v3268_v44 = vadd.f32 %v8949_v63, %v3155_v3  ;;  %v8953_v23 = vld [vmem:[#allocation50_spill] sm:$0xff]  ;;  %v8954_v3 = vld [vmem:[#allocation119_spill] sm:$0xff] }
 0x334   :  { %4294 = vmatmul.msk.f32.gmra.mxu2 %vm2290_vm0, %v8596_v43  ;;  %vm1075_vm1 = vmor %vm467_vm6, %vm819_vm14  ;;  %vm1433_vm0 = vcmp.eq.s32.totalorder %v6461_v36, %v8945_v56  ;;  %v8956_v63 = vld [vmem:[#allocation125_spill] sm:$0xff] }
 0x335   :  { %vm1683_vm8 = vmor %vm1075_vm1, %vm1427_vm12  ;;  %vm826_vm1 = vcmp.eq.s32.totalorder %v6475_v60, %v8943_v30  ;;  %v3717_v42 = vadd.f32 %v3716_v31, %v3604_v38  ;;  %v3381_v29 = vadd.f32 %v3380_v2, %v3268_v44  ;;  %v8955_v38 = vld [vmem:[#allocation124_spill] sm:$0xff] }
 0x336   :  { %vm2291_vm11 = vmor %vm1683_vm8, %vm2035_vm4  ;;  %vm474_vm4 = vcmp.eq.s32.totalorder %v6475_v60, %v8942_v15  ;;  %vm2042_vm8 = vcmp.eq.s32.totalorder %v6475_v60, %v8944_v47  ;;  %v3045_v31 = vadd.f32 %v8955_v38, %v8954_v3 }
 0x337   :  { %4326 = vmatmul.msk.f32.gmra.mxu3 %vm2291_vm11, %v8596_v43  ;;  %vm1080_vm13 = vmor %vm472_vm2, %vm824_vm10  ;;  %3796 = vst [vmem:[%s8365_s2 + $0x40] sm:$0xff] %v3717_v42  ;;  %v3606_v2 = vpop.f32.mrf.mxu2  ;;  %v3383_v38 = vpop.f32.mrf.mxu0 }
 0x338   :  { %vm1688_vm6 = vmor %vm1080_vm13, %vm1432_vm3  ;;  %vm475_vm13 = vcmp.eq.s32.totalorder %v6506_v0, %v8942_v15  ;;  %vm827_vm3 = vcmp.eq.s32.totalorder %v6506_v0, %v8943_v30  ;;  %v8950_v15 = vld [vmem:[#allocation63_spill] sm:$0xff]  ;;  %v8951_v30 = vld [vmem:[#allocation61_spill] sm:$0xff]  ;;  %v3158_v44 = vadd.f32 %v8956_v63, %v3045_v31 }
 0x339   :  { %vm2296_vm14 = vmor %vm1688_vm6, %vm2040_vm7  ;;  %vm1434_vm7 = vcmp.eq.s32.totalorder %v6475_v60, %v8945_v56  ;;  %vm2043_vm6 = vcmp.eq.s32.totalorder %v6506_v0, %v8944_v47  ;;  %v8952_v47 = vld [vmem:[#allocation59_spill] sm:$0xff]  ;;  %v8957_v31 = vld [vmem:[#allocation128_spill] sm:$0xff] }
 0x33a   :  { %4231 = vmatmul.msk.f32.gmra.mxu0 %vm2296_vm14, %v8596_v43  ;;  %vm1081_vm12 = vmor %vm473_vm15, %vm825_vm5 }
 0x33b   :  { %vm1689_vm2 = vmor %vm1081_vm12, %vm1433_vm0  ;;  %vm832_vm12 = vcmp.eq.s32.totalorder %v6445_v46, %v8950_v15 }
 0x33c   :  { %vm2297_vm10 = vmor %vm1689_vm2, %vm2041_vm9  ;;  %vm1435_vm9 = vcmp.eq.s32.totalorder %v6506_v0, %v8945_v56  ;;  %vm480_vm2 = vcmp.eq.s32.totalorder %v6445_v46, %v8952_v47  ;;  %v3493_v56 = vpop.f32.mrf.mxu1 }
 0x33d   :  { %4263 = vmatmul.msk.f32.gmra.mxu1 %vm2297_vm10, %v8596_v43  ;;  %vm1082_vm11 = vmor %vm474_vm4, %vm826_vm1  ;;  %vm1440_vm4 = vcmp.eq.s32.totalorder %v6445_v46, %v8951_v30  ;;  %vm2048_vm10 = vcmp.eq.s32.totalorder %v6445_v46, %v8953_v23  ;;  %v3494_v42 = vadd.f32 %v3493_v56, %v3381_v29  ;;  %v3719_v29 = vpop.f32.mrf.mxu3 }
 0x33e   :  { %vm1690_vm15 = vmor %vm1082_vm11, %vm1434_vm7  ;;  %vm833_vm11 = vcmp.eq.s32.totalorder %v6461_v36, %v8950_v15 }
 0x33f   :  { %vm2298_vm5 = vmor %vm1690_vm15, %vm2042_vm8  ;;  %vm481_vm15 = vcmp.eq.s32.totalorder %v6461_v36, %v8952_v47  ;;  %v3607_v3 = vadd.f32 %v3606_v2, %v3494_v42  ;;  %v3271_v42 = vadd.f32 %v8957_v31, %v3158_v44  ;;  %v8959_v2 = vld [vmem:[#allocation64_spill] sm:$0xff]  ;;  %v8962_v44 = vld [vmem:[#allocation126_spill] sm:$0xff] }
 0x340   :  { %4295 = vmatmul.msk.f32.gmra.mxu2 %vm2298_vm5, %v8596_v43  ;;  %vm1083_vm14 = vmor %vm475_vm13, %vm827_vm3  ;;  %vm1441_vm13 = vcmp.eq.s32.totalorder %v6461_v36, %v8951_v30  ;;  %vm2049_vm5 = vcmp.eq.s32.totalorder %v6461_v36, %v8953_v23  ;;  %v8964_v31 = vld [vmem:[#allocation131_spill] sm:$0xff] }
 0x341   :  { %vm1691_vm0 = vmor %vm1083_vm14, %vm1435_vm9  ;;  %vm834_vm14 = vcmp.eq.s32.totalorder %v6475_v60, %v8950_v15  ;;  %v3720_v56 = vadd.f32 %v3719_v29, %v3607_v3  ;;  %v8963_v3 = vld [vmem:[#allocation129_spill] sm:$0xff] }
 0x342   :  { %vm2299_vm1 = vmor %vm1691_vm0, %vm2043_vm6  ;;  %v3048_v29 = vadd.f32 %v8963_v3, %v8962_v44  ;;  %v3386_v3 = vpop.f32.mrf.mxu0 }
 0x343   :  { %4327 = vmatmul.msk.f32.gmra.mxu3 %vm2299_vm1, %v8596_v43  ;;  %vm1088_vm8 = vmor %vm480_vm2, %vm832_vm12  ;;  %vm1442_vm12 = vcmp.eq.s32.totalorder %v6475_v60, %v8951_v30  ;;  %vm2050_vm1 = vcmp.eq.s32.totalorder %v6475_v60, %v8953_v23  ;;  %3797 = vst [vmem:[%s8365_s2 + $0x48] sm:$0xff] %v3720_v56 }
 0x344   :  { %vm1696_vm7 = vmor %vm1088_vm8, %vm1440_vm4  ;;  %vm482_vm4 = vcmp.eq.s32.totalorder %v6475_v60, %v8952_v47  ;;  %v3496_v63 = vpop.f32.mrf.mxu1 }
 0x345   :  { %vm2304_vm3 = vmor %vm1696_vm7, %vm2048_vm10  ;;  %vm835_vm10 = vcmp.eq.s32.totalorder %v6506_v0, %v8950_v15  ;;  %v8958_v15 = vld [vmem:[#allocation66_spill] sm:$0xff] }
 0x346   :  { %4232 = vmatmul.msk.f32.gmra.mxu0 %vm2304_vm3, %v8596_v43  ;;  %vm1089_vm6 = vmor %vm481_vm15, %vm833_vm11  ;;  %vm1443_vm11 = vcmp.eq.s32.totalorder %v6506_v0, %v8951_v30  ;;  %vm2051_vm3 = vcmp.eq.s32.totalorder %v6506_v0, %v8953_v23  ;;  %v8960_v30 = vld [vmem:[#allocation70_spill] sm:$0xff]  ;;  %v3384_v23 = vadd.f32 %v3383_v38, %v3271_v42  ;;  %v3609_v38 = vpop.f32.mrf.mxu2  ;;  %v3161_v42 = vadd.f32 %v8964_v31, %v3048_v29  ;;  %v8965_v29 = vld [vmem:[#allocation133_spill] sm:$0xff] }
 0x347   :  { %vm1697_vm9 = vmor %vm1089_vm6, %vm1441_vm13  ;;  %vm483_vm13 = vcmp.eq.s32.totalorder %v6506_v0, %v8952_v47  ;;  %vm840_vm6 = vcmp.eq.s32.totalorder %v6445_v46, %v8959_v2  ;;  %v8961_v47 = vld [vmem:[#allocation65_spill] sm:$0xff] }
 0x348   :  { %vm2305_vm0 = vmor %vm1697_vm9, %vm2049_vm5  ;;  %vm488_vm5 = vcmp.eq.s32.totalorder %v6445_v46, %v8958_v15  ;;  %vm1448_vm9 = vcmp.eq.s32.totalorder %v6445_v46, %v8960_v30  ;;  %v3497_v56 = vadd.f32 %v3496_v63, %v3384_v23  ;;  %v3722_v23 = vpop.f32.mrf.mxu3 }
 0x349   :  { %4264 = vmatmul.msk.f32.gmra.mxu1 %vm2305_vm0, %v8596_v43  ;;  %vm1090_vm2 = vmor %vm482_vm4, %vm834_vm14  ;;  %vm2056_vm0 = vcmp.eq.s32.totalorder %v6445_v46, %v8961_v47 }
 0x34a   :  { %vm1698_vm8 = vmor %vm1090_vm2, %vm1442_vm12  ;;  %vm841_vm2 = vcmp.eq.s32.totalorder %v6461_v36, %v8959_v2  ;;  %v3610_v44 = vadd.f32 %v3609_v38, %v3497_v56  ;;  %v3274_v56 = vadd.f32 %v8965_v29, %v3161_v42  ;;  %v8970_v42 = vld [vmem:[#allocation132_spill] sm:$0xff]  ;;  %v8972_v29 = vld [vmem:[#allocation137_spill] sm:$0xff] }
 0x34b   :  { %vm2306_vm7 = vmor %vm1698_vm8, %vm2050_vm1  ;;  %vm489_vm1 = vcmp.eq.s32.totalorder %v6461_v36, %v8958_v15  ;;  %vm1449_vm8 = vcmp.eq.s32.totalorder %v6461_v36, %v8960_v30 }
 0x34c   :  { %4296 = vmatmul.msk.f32.gmra.mxu2 %vm2306_vm7, %v8596_v43  ;;  %vm1091_vm15 = vmor %vm483_vm13, %vm835_vm10  ;;  %vm2057_vm7 = vcmp.eq.s32.totalorder %v6461_v36, %v8961_v47  ;;  %v3723_v63 = vadd.f32 %v3722_v23, %v3610_v44  ;;  %v3387_v38 = vadd.f32 %v3386_v3, %v3274_v56  ;;  %v3499_v31 = vpop.f32.mrf.mxu1  ;;  %v8971_v44 = vld [vmem:[#allocation136_spill] sm:$0xff] }
 0x34d   :  { %vm1699_vm14 = vmor %vm1091_vm15, %vm1443_vm11  ;;  %vm842_vm15 = vcmp.eq.s32.totalorder %v6475_v60, %v8959_v2  ;;  %v3051_v23 = vadd.f32 %v8971_v44, %v8970_v42  ;;  %v3389_v44 = vpop.f32.mrf.mxu0 }
 0x34e   :  { %vm2307_vm12 = vmor %vm1699_vm14, %vm2051_vm3  ;;  %vm490_vm3 = vcmp.eq.s32.totalorder %v6475_v60, %v8958_v15  ;;  %3798 = vst [vmem:[%s8365_s2 + $0x50] sm:$0xff] %v3723_v63  ;;  %v3500_v63 = vadd.f32 %v3499_v31, %v3387_v38  ;;  %v3612_v3 = vpop.f32.mrf.mxu2 }
 0x34f   :  { %4328 = vmatmul.msk.f32.gmra.mxu3 %vm2307_vm12, %v8596_v43  ;;  %vm1096_vm4 = vmor %vm488_vm5, %vm840_vm6  ;;  %vm1450_vm6 = vcmp.eq.s32.totalorder %v6475_v60, %v8960_v30  ;;  %v3164_v56 = vadd.f32 %v8972_v29, %v3051_v23 }
 0x350   :  { %vm1704_vm10 = vmor %vm1096_vm4, %vm1448_vm9  ;;  %vm2058_vm9 = vcmp.eq.s32.totalorder %v6475_v60, %v8961_v47  ;;  %vm843_vm4 = vcmp.eq.s32.totalorder %v6506_v0, %v8959_v2  ;;  %v8967_v2 = vld [vmem:[#allocation76_spill] sm:$0xff]  ;;  %v3613_v42 = vadd.f32 %v3612_v3, %v3500_v63  ;;  %v3725_v38 = vpop.f32.mrf.mxu3  ;;  %v8977_v3 = vld [vmem:[#allocation138_spill] sm:$0xff] }
 0x351   :  { %vm2312_vm11 = vmor %vm1704_vm10, %vm2056_vm0  ;;  %vm491_vm0 = vcmp.eq.s32.totalorder %v6506_v0, %v8958_v15  ;;  %v8966_v15 = vld [vmem:[#allocation71_spill] sm:$0xff]  ;;  %v3277_v23 = vadd.f32 %v6696_v40, %v3164_v56  ;;  %v3054_v29 = vadd.f32 %v6763_v55, %v8977_v3 }
 0x352   :  { %4233 = vmatmul.msk.f32.gmra.mxu0 %vm2312_vm11, %v8596_v43  ;;  %vm1097_vm13 = vmor %vm489_vm1, %vm841_vm2  ;;  %vm1451_vm2 = vcmp.eq.s32.totalorder %v6506_v0, %v8960_v30  ;;  %v8968_v30 = vld [vmem:[#allocation68_spill] sm:$0xff]  ;;  %v3726_v31 = vadd.f32 %v3725_v38, %v3613_v42 }
 0x353   :  { %vm1705_vm5 = vmor %vm1097_vm13, %vm1449_vm8  ;;  %vm2059_vm8 = vcmp.eq.s32.totalorder %v6506_v0, %v8961_v47  ;;  %vm848_vm13 = vcmp.eq.s32.totalorder %v6445_v46, %v8967_v2  ;;  %v8969_v47 = vld [vmem:[#allocation81_spill] sm:$0xff]  ;;  %v3390_v40 = vadd.f32 %v3389_v44, %v3277_v23  ;;  %v3167_v38 = vadd.f32 %v6780_v58, %v3054_v29 }
 0x354   :  { %vm2313_vm14 = vmor %vm1705_vm5, %vm2057_vm7  ;;  %vm496_vm7 = vcmp.eq.s32.totalorder %v6445_v46, %v8966_v15  ;;  %3799 = vst [vmem:[%s8365_s2 + $0x58] sm:$0xff] %v3726_v31  ;;  %v3502_v63 = vpop.f32.mrf.mxu1 }
 0x355   :  { %4265 = vmatmul.msk.f32.gmra.mxu1 %vm2313_vm14, %v8596_v43  ;;  %vm1098_vm12 = vmor %vm490_vm3, %vm842_vm15  ;;  %vm1456_vm15 = vcmp.eq.s32.totalorder %v6445_v46, %v8968_v30  ;;  %v3503_v56 = vadd.f32 %v3502_v63, %v3390_v40  ;;  %v3392_v44 = vpop.f32.mrf.mxu0  ;;  %v3280_v23 = vadd.f32 %v6801_v41, %v3167_v38  ;;  %v3057_v63 = vadd.f32 %v6829_v4, %v6782_v48 }
 0x356   :  { %vm1706_vm1 = vmor %vm1098_vm12, %vm1450_vm6  ;;  %vm2064_vm6 = vcmp.eq.s32.totalorder %v6445_v46, %v8969_v47  ;;  %vm849_vm12 = vcmp.eq.s32.totalorder %v6461_v36, %v8967_v2  ;;  %v3615_v42 = vpop.f32.mrf.mxu2 }
 0x357   :  { %vm2314_vm10 = vmor %vm1706_vm1, %vm2058_vm9  ;;  %vm497_vm9 = vcmp.eq.s32.totalorder %v6461_v36, %v8966_v15  ;;  %v3616_v55 = vadd.f32 %v3615_v42, %v3503_v56  ;;  %v3393_v41 = vadd.f32 %v3392_v44, %v3280_v23  ;;  %v3170_v56 = vadd.f32 %v6848_v49, %v3057_v63  ;;  %v8984_v44 = vld [vmem:[#allocation97_spill] sm:$0xff] }
 0x358   :  { %4297 = vmatmul.msk.f32.gmra.mxu2 %vm2314_vm10, %v8596_v43  ;;  %vm1099_vm11 = vmor %vm491_vm0, %vm843_vm4  ;;  %vm1457_vm4 = vcmp.eq.s32.totalorder %v6461_v36, %v8968_v30  ;;  %v3728_v31 = vpop.f32.mrf.mxu3 }
 0x359   :  { %vm1707_vm3 = vmor %vm1099_vm11, %vm1451_vm2  ;;  %vm2065_vm2 = vcmp.eq.s32.totalorder %v6461_v36, %v8969_v47  ;;  %vm850_vm11 = vcmp.eq.s32.totalorder %v6475_v60, %v8967_v2  ;;  %v3729_v58 = vadd.f32 %v3728_v31, %v3616_v55  ;;  %v3283_v38 = vadd.f32 %v6865_v6, %v3170_v56  ;;  %v8982_v55 = vld [vmem:[#allocation109_spill] sm:$0xff]  ;;  %v8985_v6 = vld [vmem:[#allocation106_spill] sm:$0xff] }
 0x35a   :  { %vm2315_vm5 = vmor %vm1707_vm3, %vm2059_vm8  ;;  %vm498_vm8 = vcmp.eq.s32.totalorder %v6475_v60, %v8966_v15  ;;  %v8988_v56 = vld [vmem:[#allocation121_spill] sm:$0xff] }
 0x35b   :  { %4329 = vmatmul.msk.f32.gmra.mxu3 %vm2315_vm5, %v8596_v43  ;;  %vm1104_vm14 = vmor %vm496_vm7, %vm848_vm13  ;;  %vm1458_vm13 = vcmp.eq.s32.totalorder %v6475_v60, %v8968_v30  ;;  %3800 = vst [vmem:[%s8365_s2 + $0x60] sm:$0xff] %v3729_v58  ;;  %v8983_v58 = vld [vmem:[#allocation103_spill] sm:$0xff] }
 0x35c   :  { %vm1712_vm0 = vmor %vm1104_vm14, %vm1456_vm15  ;;  %vm2066_vm15 = vcmp.eq.s32.totalorder %v6475_v60, %v8969_v47  ;;  %vm851_vm14 = vcmp.eq.s32.totalorder %v6506_v0, %v8967_v2  ;;  %v8974_v2 = vld [vmem:[#allocation83_spill] sm:$0xff]  ;;  %v3505_v40 = vpop.f32.mrf.mxu1 }
 0x35d   :  { %vm2320_vm1 = vmor %vm1712_vm0, %vm2064_vm6  ;;  %vm499_vm6 = vcmp.eq.s32.totalorder %v6506_v0, %v8966_v15  ;;  %v8973_v15 = vld [vmem:[#allocation77_spill] sm:$0xff]  ;;  %v3506_v3 = vadd.f32 %v3505_v40, %v3393_v41  ;;  %v3395_v42 = vpop.f32.mrf.mxu0 }
 0x35e   :  { %4234 = vmatmul.msk.f32.gmra.mxu0 %vm2320_vm1, %v8596_v43  ;;  %vm1105_vm10 = vmor %vm497_vm9, %vm849_vm12  ;;  %vm1459_vm12 = vcmp.eq.s32.totalorder %v6506_v0, %v8968_v30  ;;  %v8975_v30 = vld [vmem:[#allocation89_spill] sm:$0xff]  ;;  %v3618_v29 = vpop.f32.mrf.mxu2  ;;  %v3396_v23 = vadd.f32 %v3395_v42, %v3283_v38 }
 0x35f   :  { %vm1713_vm7 = vmor %vm1105_vm10, %vm1457_vm4  ;;  %vm2067_vm4 = vcmp.eq.s32.totalorder %v6506_v0, %v8969_v47  ;;  %vm856_vm10 = vcmp.eq.s32.totalorder %v6445_v46, %v8974_v2  ;;  %v8976_v47 = vld [vmem:[#allocation84_spill] sm:$0xff]  ;;  %v3619_v48 = vadd.f32 %v3618_v29, %v3506_v3  ;;  %v8986_v3 = vld [vmem:[#allocation115_spill] sm:$0xff] }
 0x360   :  { %vm2321_vm3 = vmor %vm1713_vm7, %vm2065_vm2  ;;  %vm504_vm2 = vcmp.eq.s32.totalorder %v6445_v46, %v8973_v15  ;;  %v3731_v4 = vpop.f32.mrf.mxu3  ;;  %v8987_v29 = vld [vmem:[#allocation110_spill] sm:$0xff] }
 0x361   :  { %4266 = vmatmul.msk.f32.gmra.mxu1 %vm2321_vm3, %v8596_v43  ;;  %vm1106_vm5 = vmor %vm498_vm8, %vm850_vm11  ;;  %vm1464_vm11 = vcmp.eq.s32.totalorder %v6445_v46, %v8975_v30  ;;  %v3732_v49 = vadd.f32 %v3731_v4, %v3619_v48  ;;  %v8989_v48 = vld [vmem:[#allocation116_spill] sm:$0xff] }
 0x362   :  { %vm1714_vm9 = vmor %vm1106_vm5, %vm1458_vm13  ;;  %vm2072_vm13 = vcmp.eq.s32.totalorder %v6445_v46, %v8976_v47  ;;  %vm857_vm5 = vcmp.eq.s32.totalorder %v6461_v36, %v8974_v2 }
 0x363   :  { %vm2322_vm0 = vmor %vm1714_vm9, %vm2066_vm15  ;;  %vm505_vm15 = vcmp.eq.s32.totalorder %v6461_v36, %v8973_v15  ;;  %3801 = vst [vmem:[%s8365_s2 + $0x68] sm:$0xff] %v3732_v49 }
 0x364   :  { %4298 = vmatmul.msk.f32.gmra.mxu2 %vm2322_vm0, %v8596_v43  ;;  %vm1107_vm1 = vmor %vm499_vm6, %vm851_vm14  ;;  %vm1465_vm14 = vcmp.eq.s32.totalorder %v6461_v36, %v8975_v30  ;;  %v3508_v31 = vpop.f32.mrf.mxu1 }
 0x365   :  { %vm1715_vm8 = vmor %vm1107_vm1, %vm1459_vm12  ;;  %vm2073_vm12 = vcmp.eq.s32.totalorder %v6461_v36, %v8976_v47  ;;  %vm858_vm1 = vcmp.eq.s32.totalorder %v6475_v60, %v8974_v2  ;;  %v3398_v41 = vpop.f32.mrf.mxu0 }
 0x366   :  { %vm2323_vm7 = vmor %vm1715_vm8, %vm2067_vm4  ;;  %vm506_vm4 = vcmp.eq.s32.totalorder %v6475_v60, %v8973_v15 }
 0x367   :  { %4330 = vmatmul.msk.f32.gmra.mxu3 %vm2323_vm7, %v8596_v43  ;;  %vm1112_vm3 = vmor %vm504_vm2, %vm856_vm10  ;;  %vm1466_vm10 = vcmp.eq.s32.totalorder %v6475_v60, %v8975_v30 }
 0x368   :  { %vm1720_vm6 = vmor %vm1112_vm3, %vm1464_vm11  ;;  %vm2074_vm11 = vcmp.eq.s32.totalorder %v6475_v60, %v8976_v47  ;;  %vm859_vm3 = vcmp.eq.s32.totalorder %v6506_v0, %v8974_v2  ;;  %v8979_v2 = vld [vmem:[#allocation90_spill] sm:$0xff] }
 0x369   :  { %vm2328_vm9 = vmor %vm1720_vm6, %vm2072_vm13  ;;  %vm507_vm13 = vcmp.eq.s32.totalorder %v6506_v0, %v8973_v15  ;;  %v8978_v15 = vld [vmem:[#allocation95_spill] sm:$0xff] }
 0x36a   :  { %4235 = vmatmul.msk.f32.gmra.mxu0 %vm2328_vm9, %v8596_v43  ;;  %vm1113_vm0 = vmor %vm505_vm15, %vm857_vm5  ;;  %vm1467_vm5 = vcmp.eq.s32.totalorder %v6506_v0, %v8975_v30  ;;  %v8980_v30 = vld [vmem:[#allocation92_spill] sm:$0xff] }
 0x36b   :  { %vm1721_vm2 = vmor %vm1113_vm0, %vm1465_vm14  ;;  %vm2075_vm14 = vcmp.eq.s32.totalorder %v6506_v0, %v8976_v47  ;;  %vm864_vm0 = vcmp.eq.s32.totalorder %v6445_v46, %v8979_v2  ;;  %v8981_v47 = vld [vmem:[#allocation101_spill] sm:$0xff] }
 0x36c   :  { %vm2329_vm8 = vmor %vm1721_vm2, %vm2073_vm12  ;;  %vm512_vm12 = vcmp.eq.s32.totalorder %v6445_v46, %v8978_v15  ;;  %v3511_v40 = vpop.f32.mrf.mxu1 }
 0x36d   :  { %4267 = vmatmul.msk.f32.gmra.mxu1 %vm2329_vm8, %v8596_v43  ;;  %vm1114_vm7 = vmor %vm506_vm4, %vm858_vm1  ;;  %vm1472_vm1 = vcmp.eq.s32.totalorder %v6445_v46, %v8980_v30 }
 0x36e   :  { %vm1722_vm15 = vmor %vm1114_vm7, %vm1466_vm10  ;;  %vm2080_vm10 = vcmp.eq.s32.totalorder %v6445_v46, %v8981_v47  ;;  %vm865_vm7 = vcmp.eq.s32.totalorder %v6461_v36, %v8979_v2 }
 0x36f   :  { %vm2330_vm6 = vmor %vm1722_vm15, %vm2074_vm11  ;;  %vm513_vm11 = vcmp.eq.s32.totalorder %v6461_v36, %v8978_v15 }
 0x370   :  { %4299 = vmatmul.msk.f32.gmra.mxu2 %vm2330_vm6, %v8596_v43  ;;  %vm1115_vm9 = vmor %vm507_vm13, %vm859_vm3  ;;  %vm1473_vm3 = vcmp.eq.s32.totalorder %v6461_v36, %v8980_v30 }
 0x371   :  { %vm1723_vm4 = vmor %vm1115_vm9, %vm1467_vm5  ;;  %vm2081_vm5 = vcmp.eq.s32.totalorder %v6461_v36, %v8981_v47  ;;  %vm866_vm9 = vcmp.eq.s32.totalorder %v6475_v60, %v8979_v2 }
 0x372   :  { %vm2331_vm2 = vmor %vm1723_vm4, %vm2075_vm14  ;;  %vm514_vm14 = vcmp.eq.s32.totalorder %v6475_v60, %v8978_v15 }
 0x373   :  { %4331 = vmatmul.msk.f32.gmra.mxu3 %vm2331_vm2, %v8596_v43  ;;  %vm1120_vm8 = vmor %vm512_vm12, %vm864_vm0  ;;  %vm1474_vm0 = vcmp.eq.s32.totalorder %v6475_v60, %v8980_v30 }
 0x374   :  { %vm1728_vm13 = vmor %vm1120_vm8, %vm1472_vm1  ;;  %vm2082_vm1 = vcmp.eq.s32.totalorder %v6475_v60, %v8981_v47  ;;  %vm867_vm8 = vcmp.eq.s32.totalorder %v6506_v0, %v8979_v2  ;;  %v3509_v2 = vadd.f32 %v3508_v31, %v3396_v23  ;;  %v3514_v31 = vpop.f32.mrf.mxu1  ;;  %v8990_v23 = vld [vmem:[#allocation123_spill] sm:$0xff] }
 0x375   :  { %vm2336_vm15 = vmor %vm1728_vm13, %vm2080_vm10  ;;  %vm515_vm10 = vcmp.eq.s32.totalorder %v6506_v0, %v8978_v15  ;;  %v3060_v15 = vadd.f32 %v6895_v21, %v6850_v10  ;;  %v3734_v21 = vpop.f32.mrf.mxu3 }
 0x376   :  { %4236 = vmatmul.msk.f32.gmra.mxu0 %vm2336_vm15, %v8596_v43  ;;  %vm1121_vm6 = vmor %vm513_vm11, %vm865_vm7  ;;  %vm1475_vm7 = vcmp.eq.s32.totalorder %v6506_v0, %v8980_v30  ;;  %v3621_v30 = vpop.f32.mrf.mxu2 }
 0x377   :  { %vm1729_vm12 = vmor %vm1121_vm6, %vm1473_vm3  ;;  %vm2083_vm3 = vcmp.eq.s32.totalorder %v6506_v0, %v8981_v47  ;;  %v3173_v47 = vadd.f32 %v6910_v19, %v3060_v15  ;;  %v3622_v10 = vadd.f32 %v3621_v30, %v3509_v2  ;;  %v8991_v15 = vld [vmem:[#allocation127_spill] sm:$0xff] }
 0x378   :  { %vm2337_vm4 = vmor %vm1729_vm12, %vm2081_vm5  ;;  %vm872_vm5 = vcmp.eq.s32.totalorder %v6445_v46, %v8982_v55  ;;  %vm520_vm12 = vcmp.eq.s32.totalorder %v6445_v46, %v8984_v44 }
 0x379   :  { %4268 = vmatmul.msk.f32.gmra.mxu1 %vm2337_vm4, %v8596_v43  ;;  %vm1122_vm2 = vmor %vm514_vm14, %vm866_vm9  ;;  %vm1480_vm14 = vcmp.eq.s32.totalorder %v6445_v46, %v8983_v58  ;;  %v3735_v19 = vadd.f32 %v3734_v21, %v3622_v10  ;;  %v3286_v63 = vadd.f32 %v6929_v57, %v3173_v47  ;;  %v3063_v57 = vadd.f32 %v6955_v33, %v6912_v17 }
 0x37a   :  { %vm1730_vm11 = vmor %vm1122_vm2, %vm1474_vm0  ;;  %vm2088_vm0 = vcmp.eq.s32.totalorder %v6445_v46, %v8985_v6 }
 0x37b   :  { %vm2338_vm13 = vmor %vm1730_vm11, %vm2082_vm1  ;;  %vm873_vm1 = vcmp.eq.s32.totalorder %v6461_v36, %v8982_v55  ;;  %vm521_vm11 = vcmp.eq.s32.totalorder %v6461_v36, %v8984_v44  ;;  %3802 = vst [vmem:[%s8365_s2 + $0x70] sm:$0xff] %v3735_v19  ;;  %v3399_v4 = vadd.f32 %v3398_v41, %v3286_v63  ;;  %v3176_v49 = vadd.f32 %v6970_v11, %v3063_v57 }
 0x37c   :  { %4300 = vmatmul.msk.f32.gmra.mxu2 %vm2338_vm13, %v8596_v43  ;;  %vm1123_vm15 = vmor %vm515_vm10, %vm867_vm8  ;;  %vm1481_vm10 = vcmp.eq.s32.totalorder %v6461_v36, %v8983_v58  ;;  %v3069_v41 = vadd.f32 %v7047_v51, %v7020_v24 }
 0x37d   :  { %vm1731_vm6 = vmor %vm1123_vm15, %vm1475_vm7  ;;  %vm2089_vm7 = vcmp.eq.s32.totalorder %v6461_v36, %v8985_v6  ;;  %v3512_v17 = vadd.f32 %v3511_v40, %v3399_v4  ;;  %v3737_v11 = vpop.f32.mrf.mxu3  ;;  %v3289_v42 = vadd.f32 %v6981_v45, %v3176_v49  ;;  %v3072_v49 = vadd.f32 %v7079_v16, %v7058_v62 }
 0x37e   :  { %vm2339_vm9 = vmor %vm1731_vm6, %vm2083_vm3  ;;  %vm874_vm3 = vcmp.eq.s32.totalorder %v6475_v60, %v8982_v55  ;;  %v3624_v33 = vpop.f32.mrf.mxu2  ;;  %v3517_v19 = vpop.f32.mrf.mxu1  ;;  %v3182_v24 = vadd.f32 %v7056_v5, %v3069_v41  ;;  %v8996_v41 = vld [vmem:[#allocation139_spill] sm:$0xff] }
 0x37f   :  { %4332 = vmatmul.msk.f32.gmra.mxu3 %vm2339_vm9, %v8596_v43  ;;  %vm1128_vm4 = vmor %vm520_vm12, %vm872_vm5  ;;  %vm1482_vm5 = vcmp.eq.s32.totalorder %v6475_v60, %v8983_v58  ;;  %vm2090_vm9 = vcmp.eq.s32.totalorder %v6475_v60, %v8985_v6  ;;  %v3625_v38 = vadd.f32 %v3624_v33, %v3512_v17  ;;  %v3185_v33 = vadd.f32 %v7087_v26, %v3072_v49 }
 0x380   :  { %vm1736_vm2 = vmor %vm1128_vm4, %vm1480_vm14  ;;  %vm522_vm14 = vcmp.eq.s32.totalorder %v6475_v60, %v8984_v44 }
 0x381   :  { %vm2344_vm8 = vmor %vm1736_vm2, %vm2088_vm0  ;;  %vm875_vm0 = vcmp.eq.s32.totalorder %v6506_v0, %v8982_v55  ;;  %v3401_v55 = vpop.f32.mrf.mxu0  ;;  %v3738_v45 = vadd.f32 %v3737_v11, %v3625_v38  ;;  %v3298_v26 = vadd.f32 %v7098_v13, %v3185_v33  ;;  %v3075_v38 = vadd.f32 %v7113_v28, %v7089_v37 }
 0x382   :  { %4237 = vmatmul.msk.f32.gmra.mxu0 %vm2344_vm8, %v8596_v43  ;;  %vm1129_vm13 = vmor %vm521_vm11, %vm873_vm1  ;;  %vm1483_vm1 = vcmp.eq.s32.totalorder %v6506_v0, %v8983_v58  ;;  %vm2091_vm8 = vcmp.eq.s32.totalorder %v6506_v0, %v8985_v6  ;;  %v3066_v58 = vadd.f32 %v7009_v54, %v6972_v8  ;;  %v8992_v8 = vld [vmem:[#allocation122_spill] sm:$0xff] }
 0x383   :  { %vm1737_vm15 = vmor %vm1129_vm13, %vm1481_vm10  ;;  %vm523_vm10 = vcmp.eq.s32.totalorder %v6506_v0, %v8984_v44  ;;  %vm880_vm13 = vcmp.eq.s32.totalorder %v6445_v46, %v8987_v29  ;;  %v3402_v44 = vadd.f32 %v3401_v55, %v3289_v42  ;;  %3803 = vst [vmem:[%s8365_s2 + $0x78] sm:$0xff] %v3738_v45  ;;  %v8993_v54 = vld [vmem:[#allocation134_spill] sm:$0xff]  ;;  %v3188_v55 = vadd.f32 %v7122_v50, %v3075_v38 }
 0x384   :  { %vm2345_vm6 = vmor %vm1737_vm15, %vm2089_vm7  ;;  %vm528_vm7 = vcmp.eq.s32.totalorder %v6445_v46, %v8986_v3  ;;  %vm1488_vm15 = vcmp.eq.s32.totalorder %v6445_v46, %v8988_v56  ;;  %v3179_v6 = vadd.f32 %v7018_v1, %v3066_v58  ;;  %v3078_v50 = vadd.f32 %v7146_v53, %v7124_v22 }
 0x385   :  { %4269 = vmatmul.msk.f32.gmra.mxu1 %vm2345_vm6, %v8596_v43  ;;  %vm1130_vm12 = vmor %vm522_vm14, %vm874_vm3  ;;  %vm2096_vm6 = vcmp.eq.s32.totalorder %v6445_v46, %v8989_v48  ;;  %v3515_v1 = vadd.f32 %v3514_v31, %v3402_v44  ;;  %v3740_v30 = vpop.f32.mrf.mxu3  ;;  %v3301_v31 = vadd.f32 %v7133_v32, %v3188_v55 }
 0x386   :  { %vm1738_vm4 = vmor %vm1130_vm12, %vm1482_vm5  ;;  %vm881_vm12 = vcmp.eq.s32.totalorder %v6461_v36, %v8987_v29  ;;  %v3627_v2 = vpop.f32.mrf.mxu2  ;;  %v3292_v47 = vadd.f32 %v7031_v52, %v3179_v6  ;;  %v3191_v6 = vadd.f32 %v7153_v7, %v3078_v50 }
 0x387   :  { %vm2346_vm2 = vmor %vm1738_vm4, %vm2090_vm9  ;;  %vm529_vm9 = vcmp.eq.s32.totalorder %v6461_v36, %v8986_v3  ;;  %vm1489_vm4 = vcmp.eq.s32.totalorder %v6461_v36, %v8988_v56  ;;  %v3628_v10 = vadd.f32 %v3627_v2, %v3515_v1  ;;  %v3081_v2 = vadd.f32 %v7177_v25, %v7155_v61 }
 0x388   :  { %4301 = vmatmul.msk.f32.gmra.mxu2 %vm2346_vm2, %v8596_v43  ;;  %vm1131_vm11 = vmor %vm523_vm10, %vm875_vm0  ;;  %vm2097_vm2 = vcmp.eq.s32.totalorder %v6461_v36, %v8989_v48 }
 0x389   :  { %vm1739_vm3 = vmor %vm1131_vm11, %vm1483_vm1  ;;  %vm882_vm11 = vcmp.eq.s32.totalorder %v6475_v60, %v8987_v29  ;;  %v3404_v21 = vpop.f32.mrf.mxu0  ;;  %v3741_v52 = vadd.f32 %v3740_v30, %v3628_v10  ;;  %v3194_v30 = vadd.f32 %v7183_v39, %v3081_v2 }
 0x38a   :  { %vm2347_vm5 = vmor %vm1739_vm3, %vm2091_vm8  ;;  %vm530_vm8 = vcmp.eq.s32.totalorder %v6475_v60, %v8986_v3  ;;  %v3405_v40 = vadd.f32 %v3404_v21, %v3292_v47  ;;  %v3520_v4 = vpop.f32.mrf.mxu1 }
 0x38b   :  { %4333 = vmatmul.msk.f32.gmra.mxu3 %vm2347_vm5, %v8596_v43  ;;  %vm1136_vm14 = vmor %vm528_vm7, %vm880_vm13  ;;  %vm1490_vm13 = vcmp.eq.s32.totalorder %v6475_v60, %v8988_v56  ;;  %3804 = vst [vmem:[%s8365_s2 + $0x80] sm:$0xff] %v3741_v52  ;;  %v3307_v21 = vadd.f32 %v7192_v20, %v3194_v30  ;;  %v8997_v52 = vld [vmem:[#allocation5_spill] sm:$0xff] }
 0x38c   :  { %vm1744_vm0 = vmor %vm1136_vm14, %vm1488_vm15  ;;  %vm2098_vm15 = vcmp.eq.s32.totalorder %v6475_v60, %v8989_v48  ;;  %vm883_vm14 = vcmp.eq.s32.totalorder %v6506_v0, %v8987_v29  ;;  %v3518_v51 = vadd.f32 %v3517_v19, %v3405_v40  ;;  %v8994_v29 = vld [vmem:[#allocation130_spill] sm:$0xff]  ;;  %v3084_v40 = vadd.f32 %v8997_v52, %v8996_v41  ;;  %v9010_v30 = vld [vmem:[#allocation21_spill] sm:$0xff] }
 0x38d   :  { %vm2352_vm1 = vmor %vm1744_vm0, %vm2096_vm6  ;;  %vm531_vm6 = vcmp.eq.s32.totalorder %v6506_v0, %v8986_v3  ;;  %v3743_v63 = vpop.f32.mrf.mxu3  ;;  %v3295_v3 = vadd.f32 %v7065_v18, %v3182_v24 }
 0x38e   :  { %4238 = vmatmul.msk.f32.gmra.mxu0 %vm2352_vm1, %v8596_v43  ;;  %vm1137_vm10 = vmor %vm529_vm9, %vm881_vm12  ;;  %vm1491_vm12 = vcmp.eq.s32.totalorder %v6506_v0, %v8988_v56  ;;  %v3630_v5 = vpop.f32.mrf.mxu2  ;;  %v8995_v56 = vld [vmem:[#allocation135_spill] sm:$0xff] }
 0x38f   :  { %vm1745_vm7 = vmor %vm1137_vm10, %vm1489_vm4  ;;  %vm2099_vm4 = vcmp.eq.s32.totalorder %v6506_v0, %v8989_v48  ;;  %vm888_vm10 = vcmp.eq.s32.totalorder %v6445_v46, %v8991_v15  ;;  %v3631_v57 = vadd.f32 %v3630_v5, %v3518_v51  ;;  %v8998_v51 = vld [vmem:[#allocation15_spill] sm:$0xff] }
 0x390   :  { %vm2353_vm3 = vmor %vm1745_vm7, %vm2097_vm2  ;;  %vm536_vm2 = vcmp.eq.s32.totalorder %v6445_v46, %v8990_v23  ;;  %v3197_v5 = vadd.f32 %v8998_v51, %v3084_v40 }
 0x391   :  { %4270 = vmatmul.msk.f32.gmra.mxu1 %vm2353_vm3, %v8596_v43  ;;  %vm1138_vm5 = vmor %vm530_vm8, %vm882_vm11  ;;  %vm1496_vm11 = vcmp.eq.s32.totalorder %v6445_v46, %v8992_v8  ;;  %v3407_v48 = vpop.f32.mrf.mxu0  ;;  %v3744_v18 = vadd.f32 %v3743_v63, %v3631_v57 }
 0x392   :  { %vm1746_vm9 = vmor %vm1138_vm5, %vm1490_vm13  ;;  %vm2104_vm13 = vcmp.eq.s32.totalorder %v6445_v46, %v8993_v54  ;;  %vm889_vm5 = vcmp.eq.s32.totalorder %v6461_v36, %v8991_v15  ;;  %v3408_v17 = vadd.f32 %v3407_v48, %v3295_v3  ;;  %v8999_v3 = vld [vmem:[#allocation141_spill] sm:$0xff] }
 0x393   :  { %vm2354_vm0 = vmor %vm1746_vm9, %vm2098_vm15  ;;  %vm537_vm15 = vcmp.eq.s32.totalorder %v6461_v36, %v8990_v23  ;;  %3805 = vst [vmem:[%s8365_s2 + $0x88] sm:$0xff] %v3744_v18  ;;  %v9000_v18 = vld [vmem:[#allocation140_spill] sm:$0xff] }
 0x394   :  { %4302 = vmatmul.msk.f32.gmra.mxu2 %vm2354_vm0, %v8596_v43  ;;  %vm1139_vm1 = vmor %vm531_vm6, %vm883_vm14  ;;  %vm1497_vm14 = vcmp.eq.s32.totalorder %v6461_v36, %v8992_v8 }
 0x395   :  { %vm1747_vm8 = vmor %vm1139_vm1, %vm1491_vm12  ;;  %vm2105_vm12 = vcmp.eq.s32.totalorder %v6461_v36, %v8993_v54  ;;  %vm890_vm1 = vcmp.eq.s32.totalorder %v6475_v60, %v8991_v15 }
 0x396   :  { %vm2355_vm7 = vmor %vm1747_vm8, %vm2099_vm4  ;;  %vm538_vm4 = vcmp.eq.s32.totalorder %v6475_v60, %v8990_v23  ;;  %v3633_v62 = vpop.f32.mrf.mxu2  ;;  %v3746_v16 = vpop.f32.mrf.mxu3 }
 0x397   :  { %4334 = vmatmul.msk.f32.gmra.mxu3 %vm2355_vm7, %v8596_v43  ;;  %vm1144_vm3 = vmor %vm536_vm2, %vm888_vm10  ;;  %vm1498_vm10 = vcmp.eq.s32.totalorder %v6475_v60, %v8992_v8  ;;  %v3523_v42 = vpop.f32.mrf.mxu1 }
 0x398   :  { %vm1752_vm6 = vmor %vm1144_vm3, %vm1496_vm11  ;;  %vm2106_vm11 = vcmp.eq.s32.totalorder %v6475_v60, %v8993_v54  ;;  %vm891_vm3 = vcmp.eq.s32.totalorder %v6506_v0, %v8991_v15 }
 0x399   :  { %vm2360_vm9 = vmor %vm1752_vm6, %vm2104_vm13  ;;  %vm539_vm13 = vcmp.eq.s32.totalorder %v6506_v0, %v8990_v23  ;;  %v3410_v11 = vpop.f32.mrf.mxu0 }
 0x39a   :  { %4239 = vmatmul.msk.f32.gmra.mxu0 %vm2360_vm9, %v8596_v43  ;;  %vm1145_vm0 = vmor %vm537_vm15, %vm889_vm5  ;;  %vm1499_vm5 = vcmp.eq.s32.totalorder %v6506_v0, %v8992_v8  ;;  %v3411_v13 = vadd.f32 %v3410_v11, %v3298_v26  ;;  %v3304_v8 = vadd.f32 %v7161_v12, %v3191_v6 }
 0x39b   :  { %vm1753_vm2 = vmor %vm1145_vm0, %vm1497_vm14  ;;  %vm2107_vm14 = vcmp.eq.s32.totalorder %v6506_v0, %v8993_v54  ;;  %vm896_vm0 = vcmp.eq.s32.totalorder %v6445_v46, %v8995_v56 }
 0x39c   :  { %vm2361_vm8 = vmor %vm1753_vm2, %vm2105_vm12  ;;  %vm544_vm12 = vcmp.eq.s32.totalorder %v6445_v46, %v8994_v29  ;;  %v3524_v37 = vadd.f32 %v3523_v42, %v3411_v13 }
 0x39d   :  { %4271 = vmatmul.msk.f32.gmra.mxu1 %vm2361_vm8, %v8596_v43  ;;  %vm1146_vm7 = vmor %vm538_vm4, %vm890_vm1  ;;  %vm1504_vm1 = vcmp.eq.s32.totalorder %v6445_v46, %v6712_v59 }
 0x39e   :  { %vm1754_vm15 = vmor %vm1146_vm7, %vm1498_vm10  ;;  %vm2112_vm10 = vcmp.eq.s32.totalorder %v6445_v46, %v6661_v34  ;;  %vm897_vm7 = vcmp.eq.s32.totalorder %v6461_v36, %v8995_v56  ;;  %v3521_v46 = vadd.f32 %v3520_v4, %v3408_v17  ;;  %v9001_v17 = vld [vmem:[#allocation142_spill] sm:$0xff] }
 0x39f   :  { %vm2362_vm6 = vmor %vm1754_vm15, %vm2106_vm11  ;;  %vm545_vm11 = vcmp.eq.s32.totalorder %v6461_v36, %v8994_v29  ;;  %v3087_v33 = vadd.f32 %v9001_v17, %v9000_v18  ;;  %v9016_v18 = vld [vmem:[#allocation6_spill] sm:$0xff] }
 0x3a0   :  { %4303 = vmatmul.msk.f32.gmra.mxu2 %vm2362_vm6, %v8596_v43  ;;  %vm1147_vm9 = vmor %vm539_vm13, %vm891_vm3  ;;  %vm1505_vm3 = vcmp.eq.s32.totalorder %v6461_v36, %v6712_v59 }
 0x3a1   :  { %vm1755_vm4 = vmor %vm1147_vm9, %vm1499_vm5  ;;  %vm2113_vm5 = vcmp.eq.s32.totalorder %v6461_v36, %v6661_v34  ;;  %vm898_vm9 = vcmp.eq.s32.totalorder %v6475_v60, %v8995_v56  ;;  %v3634_v36 = vadd.f32 %v3633_v62, %v3521_v46 }
 0x3a2   :  { %vm2363_vm2 = vmor %vm1755_vm4, %vm2107_vm14  ;;  %vm546_vm14 = vcmp.eq.s32.totalorder %v6475_v60, %v8994_v29  ;;  %v3749_v28 = vpop.f32.mrf.mxu3 }
 0x3a3   :  { %4335 = vmatmul.msk.f32.gmra.mxu3 %vm2363_vm2, %v8596_v43  ;;  %vm1152_vm8 = vmor %vm544_vm12, %vm896_vm0  ;;  %vm1506_vm0 = vcmp.eq.s32.totalorder %v6475_v60, %v6712_v59 }
 0x3a4   :  { %vm1760_vm13 = vmor %vm1152_vm8, %vm1504_vm1  ;;  %vm2114_vm1 = vcmp.eq.s32.totalorder %v6475_v60, %v6661_v34  ;;  %vm899_vm8 = vcmp.eq.s32.totalorder %v6506_v0, %v8995_v56  ;;  %v3747_v60 = vadd.f32 %v3746_v16, %v3634_v36  ;;  %v9002_v16 = vld [vmem:[#allocation13_spill] sm:$0xff] }
 0x3a5   :  { %vm2368_vm15 = vmor %vm1760_vm13, %vm2112_vm10  ;;  %vm547_vm10 = vcmp.eq.s32.totalorder %v6506_v0, %v8994_v29  ;;  %v3310_v29 = vadd.f32 %v8999_v3, %v3197_v5  ;;  %v3200_v26 = vadd.f32 %v9002_v16, %v3087_v33 }
 0x3a6   :  { %4240 = vmatmul.msk.f32.gmra.mxu0 %vm2368_vm15, %v8596_v43  ;;  %vm1153_vm6 = vmor %vm545_vm11, %vm897_vm7  ;;  %vm1507_vm7 = vcmp.eq.s32.totalorder %v6506_v0, %v6712_v59  ;;  %3806 = vst [vmem:[%s8365_s2 + $0x90] sm:$0xff] %v3747_v60  ;;  %v3636_v59 = vpop.f32.mrf.mxu2  ;;  %v9003_v60 = vld [vmem:[#allocation18_spill] sm:$0xff] }
 0x3a7   :  { %vm1761_vm12 = vmor %vm1153_vm6, %vm1505_vm3  ;;  %vm2115_vm3 = vcmp.eq.s32.totalorder %v6506_v0, %v6661_v34  ;;  %v3637_v58 = vadd.f32 %v3636_v59, %v3524_v37  ;;  %v3413_v0 = vpop.f32.mrf.mxu0  ;;  %v3526_v34 = vpop.f32.mrf.mxu1  ;;  %v3313_v13 = vadd.f32 %v9003_v60, %v3200_v26  ;;  %v9004_v59 = vld [vmem:[#allocation11_spill] sm:$0xff] }
 0x3a8   :  { %vm2369_vm4 = vmor %vm1761_vm12, %vm2113_vm5  ;;  %v3414_v44 = vadd.f32 %v3413_v0, %v3301_v31 }
 0x3a9   :  { %4272 = vmatmul.msk.f32.gmra.mxu1 %vm2369_vm4, %v8596_v43  ;;  %vm1154_vm2 = vmor %vm546_vm14, %vm898_vm9  ;;  %v3750_v45 = vadd.f32 %v3749_v28, %v3637_v58  ;;  %v9005_v28 = vld [vmem:[#allocation12_spill] sm:$0xff] }
 0x3aa   :  { %vm1762_vm11 = vmor %vm1154_vm2, %vm1506_vm0  ;;  %v3527_v23 = vadd.f32 %v3526_v34, %v3414_v44  ;;  %v3090_v31 = vadd.f32 %v9005_v28, %v9004_v59  ;;  %v9006_v34 = vld [vmem:[#allocation143_spill] sm:$0xff] }
 0x3ab   :  { %vm2370_vm13 = vmor %vm1762_vm11, %vm2114_vm1  ;;  %3807 = vst [vmem:[%s8365_s2 + $0x98] sm:$0xff] %v3750_v45 }
 0x3ac   :  { %4304 = vmatmul.msk.f32.gmra.mxu2 %vm2370_vm13, %v8596_v43  ;;  %vm1155_vm15 = vmor %vm547_vm10, %vm899_vm8  ;;  %v3203_v50 = vadd.f32 %v9006_v34, %v3090_v31 }
 0x3ad   :  { %vm1763_vm5 = vmor %vm1155_vm15, %vm1507_vm7 }
 0x3ae   :  { %vm2371_vm6 = vmor %vm1763_vm5, %vm2115_vm3  ;;  %v3752_v15 = vpop.f32.mrf.mxu3 }
 0x3af   :  { %4336 = vmatmul.msk.f32.gmra.mxu3 %vm2371_vm6, %v8596_v43  ;;  %v3639_v43 = vpop.f32.mrf.mxu2  ;;  %v3416_v54 = vpop.f32.mrf.mxu0 }
 0x3b0   :  { %v3640_v32 = vadd.f32 %v3639_v43, %v3527_v23  ;;  %v3529_v1 = vpop.f32.mrf.mxu1  ;;  %v3417_v53 = vadd.f32 %v3416_v54, %v3304_v8  ;;  %v9007_v43 = vld [vmem:[#allocation145_spill] sm:$0xff]  ;;  %v9008_v54 = vld [vmem:[#allocation144_spill] sm:$0xff] }
 0x3b2   :  { %v3753_v22 = vadd.f32 %v3752_v15, %v3640_v32  ;;  %v3530_v7 = vadd.f32 %v3529_v1, %v3417_v53  ;;  %v3316_v15 = vadd.f32 %v9007_v43, %v3203_v50  ;;  %v9009_v1 = vld [vmem:[#allocation22_spill] sm:$0xff] }
 0x3b3   :  { %v3093_v2 = vadd.f32 %v9009_v1, %v9008_v54 }
 0x3b4   :  { %3808 = vst [vmem:[%s8365_s2 + $0xa0] sm:$0xff] %v3753_v22 }
 0x3b7   :  { %v3642_v47 = vpop.f32.mrf.mxu2  ;;  %v3419_v19 = vpop.f32.mrf.mxu0 }
 0x3b8   :  { %v3643_v12 = vadd.f32 %v3642_v47, %v3530_v7  ;;  %v3420_v61 = vadd.f32 %v3419_v19, %v3307_v21  ;;  %v3206_v7 = vadd.f32 %v9010_v30, %v3093_v2  ;;  %v9011_v19 = vld [vmem:[#allocation14_spill] sm:$0xff] }
 0x3ba   :  { %v3755_v10 = vpop.f32.mrf.mxu3  ;;  %v3532_v25 = vpop.f32.mrf.mxu1  ;;  %v3319_v41 = vadd.f32 %v9011_v19, %v3206_v7 }
 0x3bb   :  { %v3756_v24 = vadd.f32 %v3755_v10, %v3643_v12  ;;  %v3533_v39 = vadd.f32 %v3532_v25, %v3420_v61  ;;  %v9013_v61 = vld [vmem:[#allocation146_spill] sm:$0xff] }
 0x3bd   :  { %3809 = vst [vmem:[%s8365_s2 + $0xa8] sm:$0xff] %v3756_v24  ;;  %v9012_v24 = vld [vmem:[#allocation8_spill] sm:$0xff] }
 0x3be   :  { %v3096_v25 = vadd.f32 %v9013_v61, %v9012_v24 }
 0x3c3   :  { %v3645_v63 = vpop.f32.mrf.mxu2  ;;  %v3422_v57 = vpop.f32.mrf.mxu0 }
 0x3c4   :  { %v3646_v56 = vadd.f32 %v3645_v63, %v3533_v39  ;;  %v3423_v4 = vadd.f32 %v3422_v57, %v3310_v29  ;;  %v3209_v39 = vadd.f32 %v7343_v27, %v3096_v25 }
 0x3c6   :  { %v3758_v20 = vpop.f32.mrf.mxu3  ;;  %v3535_v49 = vpop.f32.mrf.mxu1 }
 0x3c7   :  { %v3759_v48 = vadd.f32 %v3758_v20, %v3646_v56  ;;  %v3536_v46 = vadd.f32 %v3535_v49, %v3423_v4  ;;  %v9014_v20 = vld [vmem:[#allocation17_spill] sm:$0xff]  ;;  %v9015_v49 = vld [vmem:[#allocation147_spill] sm:$0xff] }
 0x3c8   :  { %v3322_v57 = vadd.f32 %v9014_v20, %v3209_v39  ;;  %v3099_v17 = vadd.f32 %v9016_v18, %v9015_v49 }
 0x3c9   :  { %3810 = vst [vmem:[%s8365_s2 + $0xb0] sm:$0xff] %v3759_v48 }
 0x3cf   :  { %v3648_v62 = vpop.f32.mrf.mxu2  ;;  %v3425_v38 = vpop.f32.mrf.mxu0 }
 0x3d0   :  { %v3649_v36 = vadd.f32 %v3648_v62, %v3536_v46  ;;  %v3426_v55 = vadd.f32 %v3425_v38, %v3313_v13  ;;  %v9017_v62 = vld [vmem:[#allocation10_spill] sm:$0xff] }
 0x3d1   :  { %v3212_v16 = vadd.f32 %v9017_v62, %v3099_v17 }
 0x3d2   :  { %v3761_v11 = vpop.f32.mrf.mxu3  ;;  %v3538_v37 = vpop.f32.mrf.mxu1 }
 0x3d3   :  { %v3762_v42 = vadd.f32 %v3761_v11, %v3649_v36  ;;  %v3539_v58 = vadd.f32 %v3538_v37, %v3426_v55  ;;  %v9019_v55 = vld [vmem:[#allocation148_spill] sm:$0xff] }
 0x3d4   :  { %v9020_v37 = vld [vmem:[#allocation16_spill] sm:$0xff] }
 0x3d5   :  { %3811 = vst [vmem:[%s8365_s2 + $0xb8] sm:$0xff] %v3762_v42  ;;  %v9018_v42 = vld [vmem:[#allocation149_spill] sm:$0xff]  ;;  %v3102_v59 = vadd.f32 %v9020_v37, %v9019_v55 }
 0x3d6   :  { %v3325_v38 = vadd.f32 %v9018_v42, %v3212_v16 }
 0x3db   :  { %v3651_v0 = vpop.f32.mrf.mxu2  ;;  %v3428_v23 = vpop.f32.mrf.mxu0 }
 0x3dc   :  { %v3652_v45 = vadd.f32 %v3651_v0, %v3539_v58  ;;  %v3429_v8 = vadd.f32 %v3428_v23, %v3316_v15  ;;  %v9021_v58 = vld [vmem:[#allocation24_spill] sm:$0xff] }
 0x3dd   :  { %v3215_v0 = vadd.f32 %v9021_v58, %v3102_v59 }
 0x3de   :  { %v3764_v44 = vpop.f32.mrf.mxu3  ;;  %v3541_v32 = vpop.f32.mrf.mxu1 }
 0x3df   :  { %v3765_v6 = vadd.f32 %v3764_v44, %v3652_v45  ;;  %v3542_v22 = vadd.f32 %v3541_v32, %v3429_v8  ;;  %v9023_v8 = vld [vmem:[#allocation27_spill] sm:$0xff]  ;;  %v9024_v32 = vld [vmem:[#allocation150_spill] sm:$0xff] }
 0x3e0   :  { %v3105_v54 = vadd.f32 %v9024_v32, %v9023_v8 }
 0x3e1   :  { %3812 = vst [vmem:[%s8365_s2 + $0xc0] sm:$0xff] %v3765_v6  ;;  %v9022_v6 = vld [vmem:[#allocation20_spill] sm:$0xff] }
 0x3e2   :  { %v3328_v23 = vadd.f32 %v9022_v6, %v3215_v0 }
 0x3e7   :  { %v3654_v53 = vpop.f32.mrf.mxu2  ;;  %v3431_v12 = vpop.f32.mrf.mxu0 }
 0x3e8   :  { %v3655_v47 = vadd.f32 %v3654_v53, %v3542_v22  ;;  %v3432_v52 = vadd.f32 %v3431_v12, %v3319_v41  ;;  %v9025_v22 = vld [vmem:[#allocation23_spill] sm:$0xff] }
 0x3e9   :  { %v3218_v53 = vadd.f32 %v9025_v22, %v3105_v54 }
 0x3ea   :  { %v3767_v10 = vpop.f32.mrf.mxu3  ;;  %v3544_v40 = vpop.f32.mrf.mxu1 }
 0x3eb   :  { %v3768_v21 = vadd.f32 %v3767_v10, %v3655_v47  ;;  %v3545_v51 = vadd.f32 %v3544_v40, %v3432_v52  ;;  %v9027_v52 = vld [vmem:[#allocation31_spill] sm:$0xff] }
 0x3ec   :  { %v3108_v40 = vadd.f32 %v7469_v35, %v9027_v52 }
 0x3ed   :  { %3813 = vst [vmem:[%s8365_s2 + $0xc8] sm:$0xff] %v3768_v21  ;;  %v9026_v21 = vld [vmem:[#allocation9_spill] sm:$0xff] }
 0x3ee   :  { %v3331_v12 = vadd.f32 %v9026_v21, %v3218_v53  ;;  %v3221_v25 = vadd.f32 %v7479_v14, %v3108_v40 }
 0x3f3   :  { %v3657_v5 = vpop.f32.mrf.mxu2  ;;  %v3434_v56 = vpop.f32.mrf.mxu0 }
 0x3f4   :  { %v3658_v63 = vadd.f32 %v3657_v5, %v3545_v51  ;;  %v3435_v48 = vadd.f32 %v3434_v56, %v3322_v57 }
 0x3f6   :  { %v3770_v3 = vpop.f32.mrf.mxu3  ;;  %v3547_v4 = vpop.f32.mrf.mxu1 }
 0x3f7   :  { %v3771_v29 = vadd.f32 %v3770_v3, %v3658_v63  ;;  %v3548_v33 = vadd.f32 %v3547_v4, %v3435_v48  ;;  %v3334_v3 = vadd.f32 %v7487_v9, %v3221_v25 }
 0x3f9   :  { %3814 = vst [vmem:[%s8365_s2 + $0xd0] sm:$0xff] %v3771_v29 }
 0x3ff   :  { %v3660_v46 = vpop.f32.mrf.mxu2  ;;  %v3437_v11 = vpop.f32.mrf.mxu0 }
 0x400   :  { %v3661_v27 = vadd.f32 %v3660_v46, %v3548_v33  ;;  %v3438_v60 = vadd.f32 %v3437_v11, %v3325_v38 }
 0x402   :  { %v3773_v26 = vpop.f32.mrf.mxu3  ;;  %v3550_v13 = vpop.f32.mrf.mxu1 }
 0x403   :  { %v3774_v36 = vadd.f32 %v3773_v26, %v3661_v27  ;;  %v3551_v28 = vadd.f32 %v3550_v13, %v3438_v60 }
 0x405   :  { %3815 = vst [vmem:[%s8365_s2 + $0xd8] sm:$0xff] %v3774_v36 }
 0x40b   :  { %v3663_v31 = vpop.f32.mrf.mxu2  ;;  %v3440_v44 = vpop.f32.mrf.mxu0 }
 0x40c   :  { %v3664_v34 = vadd.f32 %v3663_v31, %v3551_v28  ;;  %v3441_v43 = vadd.f32 %v3440_v44, %v3328_v23 }
 0x40e   :  { %v3776_v50 = vpop.f32.mrf.mxu3  ;;  %v3553_v15 = vpop.f32.mrf.mxu1 }
 0x40f   :  { %v3777_v45 = vadd.f32 %v3776_v50, %v3664_v34  ;;  %v3554_v1 = vadd.f32 %v3553_v15, %v3441_v43 }
 0x411   :  { %3816 = vst [vmem:[%s8365_s2 + $0xe0] sm:$0xff] %v3777_v45 }
 0x417   :  { %v3666_v2 = vpop.f32.mrf.mxu2  ;;  %v3443_v10 = vpop.f32.mrf.mxu0 }
 0x418   :  { %v3667_v30 = vadd.f32 %v3666_v2, %v3554_v1  ;;  %v3444_v19 = vadd.f32 %v3443_v10, %v3331_v12 }
 0x41a   :  { %v3779_v7 = vpop.f32.mrf.mxu3  ;;  %v3556_v41 = vpop.f32.mrf.mxu1 }
 0x41b   :  { %v3780_v47 = vadd.f32 %v3779_v7, %v3667_v30  ;;  %v3557_v24 = vadd.f32 %v3556_v41, %v3444_v19 }
 0x41d   :  { %3817 = vst [vmem:[%s8365_s2 + $0xe8] sm:$0xff] %v3780_v47 }
 0x423   :  { %v3669_v61 = vpop.f32.mrf.mxu2  ;;  %v3446_v63 = vpop.f32.mrf.mxu0 }
 0x424   :  { %v3670_v51 = vadd.f32 %v3669_v61, %v3557_v24  ;;  %v3447_v29 = vadd.f32 %v3446_v63, %v3334_v3 }
 0x426   :  { %v3782_v5 = vpop.f32.mrf.mxu3  ;;  %v3559_v56 = vpop.f32.mrf.mxu1 }
 0x427   :  { %v3783_v39 = vadd.f32 %v3782_v5, %v3670_v51  ;;  %v3560_v20 = vadd.f32 %v3559_v56, %v3447_v29 }
 0x429   :  { %3818 = vst [vmem:[%s8365_s2 + $0xf0] sm:$0xff] %v3783_v39 }
 0x42f   :  { %v3672_v57 = vpop.f32.mrf.mxu2 }
 0x430   :  { %v3673_v48 = vadd.f32 %v3672_v57, %v3560_v20 }
 0x432   :  { %v3785_v35 = vpop.f32.mrf.mxu3 }
 0x433   :  { %v3786_v4 = vadd.f32 %v3785_v35, %v3673_v48 }
 0x435   :  { %3819 = vst [vmem:[%s8365_s2 + $0xf8] sm:$0xff] %v3786_v4 }
 0x436   :  { %3824 = vsyncpa [#allocation3], 1 }

</bundles_post_ra>
